<compile_context>
chip_gen: v7x
topology: tpu7x:2x2x1
jax: 0.10.0
libtpu: 0.0.40
codegen_flags: <defaults>
</compile_context>

<pallas_src>
import math
import jax
import jax.numpy as jnp
from jax import lax
from jax.experimental import pallas as pl
from jax.experimental.pallas import tpu as pltpu


def _lstm2_kernel(x_ref, w1_ref, b1_ref, wih2_ref, whh2_ref, b2_ref, out_ref):
    """Runs both LSTM cells over all timesteps (fully unrolled).

    x_ref   : (N, T)      batch on sublanes, time on lanes
    w1_ref  : (HP, 4*HP)  rows 0..H-1 = W_hh1 (transposed), row HP-1 = W_ih1;
                          gate g occupies lane block [g*HP, g*HP+H)
    b1_ref  : (1, 4*HP)   b_ih1 + b_hh1, zero in padded lanes
    wih2_ref: (4, HP)     second cell W_ih, zero in padded lanes
    whh2_ref: (4, 1)      second cell W_hh
    b2_ref  : (4, 1)      second cell b_ih + b_hh
    out_ref : (N, T)      h2 at every timestep
    """
    N, T = x_ref.shape
    HP = w1_ref.shape[0]

    w1 = w1_ref[...]        # (HP, 4HP)  loop-invariant, loaded once
    b1 = b1_ref[...]        # (1, 4HP)
    w2 = wih2_ref[...]      # (4, HP)
    whh2 = whh2_ref[...]    # (4, 1)
    b2 = b2_ref[...]        # (4, 1)
    x = x_ref[...]          # (N, T)

    # lane mask selecting the "x slot" (last padded lane of the state vector)
    lane = lax.broadcasted_iota(jnp.int32, (N, HP), 1)
    x_slot = lane == (HP - 1)

    h1 = jnp.zeros((N, HP), jnp.float32)
    c1 = jnp.zeros((N, HP), jnp.float32)
    h2 = jnp.zeros((N, 1), jnp.float32)
    c2 = jnp.zeros((N, 1), jnp.float32)

    outs = []
    for t in range(T):  # T is static -> fully unrolled
        x_t = x[:, t:t + 1]                               # (N, 1)
        # fold the input into the recurrent matmul: x_t rides in lane HP-1
        z = jnp.where(x_slot, x_t, h1)                    # (N, HP)

        # ---- first LSTMCell: one MXU dot per step (gate order i, f, g, o) ---
        g1 = jnp.dot(z, w1, preferred_element_type=jnp.float32) + b1  # (N, 4HP)
        i1 = jax.nn.sigmoid(g1[:, 0 * HP:1 * HP])
        f1 = jax.nn.sigmoid(g1[:, 1 * HP:2 * HP])
        gg1 = jnp.tanh(g1[:, 2 * HP:3 * HP])
        o1 = jax.nn.sigmoid(g1[:, 3 * HP:4 * HP])
        c1 = f1 * c1 + i1 * gg1
        h1 = o1 * jnp.tanh(c1)                            # (N, HP); pads stay 0

        # ---- second LSTMCell (hidden=1): VPU mul + XLU lane-reduce ----------
        s_i = jnp.sum(h1 * w2[0:1, :], axis=1, keepdims=True)   # (N, 1)
        s_f = jnp.sum(h1 * w2[1:2, :], axis=1, keepdims=True)
        s_g = jnp.sum(h1 * w2[2:3, :], axis=1, keepdims=True)
        s_o = jnp.sum(h1 * w2[3:4, :], axis=1, keepdims=True)
        i2 = jax.nn.sigmoid(s_i + whh2[0:1, :] * h2 + b2[0:1, :])
        f2 = jax.nn.sigmoid(s_f + whh2[1:2, :] * h2 + b2[1:2, :])
        gg2 = jnp.tanh(s_g + whh2[2:3, :] * h2 + b2[2:3, :])
        o2 = jax.nn.sigmoid(s_o + whh2[3:4, :] * h2 + b2[3:4, :])
        c2 = f2 * c2 + i2 * gg2
        h2 = o2 * jnp.tanh(c2)                            # (N, 1)
        outs.append(h2)

    # single dense store instead of T masked 1-row stores
    out_ref[...] = jnp.concatenate(outs, axis=1)          # (N, T)


def lstmcell_forward(stimulus, params):
    """stimulus: (N, I) float32 -> output (N, I) float32 (PyTorch convention)."""
    f32 = jnp.float32
    N, T = stimulus.shape
    H = params["w_hh1"].shape[1]
    # padded hidden width: room for H hidden units + 1 "x slot" lane, mult of 128
    HP = ((H + 1 + 127) // 128) * 128
    G = 4 * HP

    whh1 = params["w_hh1"].astype(f32)                     # (4H, H)
    wih1 = params["w_ih1"].astype(f32)                     # (4H, 1)
    b1 = (params["b_ih1"] + params["b_hh1"]).astype(f32)   # (4H,)

    # W1[h, g*HP + j] = whh1[g*H + j, h]   (h < H, j < H)
    # W1[HP-1, g*HP + j] = wih1[g*H + j, 0]
    whh1_g = whh1.reshape(4, H, H)                               # [g, j, h]
    blk = jnp.zeros((H, 4, HP), f32).at[:, :, :H].set(
        jnp.transpose(whh1_g, (2, 0, 1)))                        # [h, g, j]
    W1 = jnp.zeros((HP, G), f32)
    W1 = W1.at[:H, :].set(blk.reshape(H, G))
    x_row = jnp.zeros((4, HP), f32).at[:, :H].set(wih1.reshape(4, H))
    W1 = W1.at[HP - 1, :].set(x_row.reshape(G))

    b1_pad = jnp.zeros((4, HP), f32).at[:, :H].set(b1.reshape(4, H)).reshape(1, G)

    # second cell: zero-padded lanes so padded hidden lanes cannot leak in
    wih2 = jnp.zeros((4, HP), f32).at[:, :H].set(params["w_ih2"].astype(f32))
    whh2 = params["w_hh2"].astype(f32).reshape(4, 1)
    b2 = (params["b_ih2"] + params["b_hh2"]).astype(f32).reshape(4, 1)

    x = stimulus.astype(f32)                                # (N, T)

    vmem = pl.BlockSpec(memory_space=pltpu.MemorySpace.VMEM)
    out = pl.pallas_call(
        _lstm2_kernel,
        out_shape=jax.ShapeDtypeStruct((N, T), f32),
        in_specs=[vmem] * 6,
        out_specs=vmem,
    )(x, W1, b1_pad, wih2, whh2, b2)
    return out                                              # (N, I)


# --------------------------- pure-JAX reference -----------------------------
def _ref_cell(x, h, c, w_ih, w_hh, b_ih, b_hh):
    g = x @ w_ih.T + b_ih + h @ w_hh.T + b_hh
    i, f, gg, o = jnp.split(g, 4, axis=1)
    c = jax.nn.sigmoid(f) * c + jax.nn.sigmoid(i) * jnp.tanh(gg)
    h = jax.nn.sigmoid(o) * jnp.tanh(c)
    return h, c


def lstmcell_reference(stimulus, params):
    N, T = stimulus.shape
    H = params["w_hh1"].shape[1]
    h1 = jnp.zeros((N, H), jnp.float32)
    c1 = jnp.zeros((N, H), jnp.float32)
    h2 = jnp.zeros((N, 1), jnp.float32)
    c2 = jnp.zeros((N, 1), jnp.float32)
    cols = []
    for t in range(T):
        x_t = stimulus[:, t].reshape(N, 1)
        h1, c1 = _ref_cell(x_t, h1, c1, params["w_ih1"], params["w_hh1"],
                           params["b_ih1"], params["b_hh1"])
        h2, c2 = _ref_cell(h1, h2, c2, params["w_ih2"], params["w_hh2"],
                           params["b_ih2"], params["b_hh2"])
        cols.append(h2.reshape(N))
    return jnp.stack(cols, axis=1)                           # (N, T)


# --------------------------------- main --------------------------------------
if __name__ == "__main__":
    HIDDEN = 51
    INPUT_SIZE = 1
    N, SEQ = 2, 8                                            # stimulus: (N, I)

    key = jax.random.PRNGKey(0)
    ks = jax.random.split(key, 9)

    k1 = 1.0 / math.sqrt(HIDDEN)   # PyTorch LSTMCell init bound, first cell
    k2 = 1.0                       # second cell: hidden_size=1 -> bound 1
    params = {
        "w_ih1": jax.random.uniform(ks[0], (4 * HIDDEN, INPUT_SIZE), jnp.float32, -k1, k1),
        "w_hh1": jax.random.uniform(ks[1], (4 * HIDDEN, HIDDEN), jnp.float32, -k1, k1),
        "b_ih1": jax.random.uniform(ks[2], (4 * HIDDEN,), jnp.float32, -k1, k1),
        "b_hh1": jax.random.uniform(ks[3], (4 * HIDDEN,), jnp.float32, -k1, k1),
        "w_ih2": jax.random.uniform(ks[4], (4 * 1, HIDDEN), jnp.float32, -k2, k2),
        "w_hh2": jax.random.uniform(ks[5], (4 * 1, 1), jnp.float32, -k2, k2),
        "b_ih2": jax.random.uniform(ks[6], (4 * 1,), jnp.float32, -k2, k2),
        "b_hh2": jax.random.uniform(ks[7], (4 * 1,), jnp.float32, -k2, k2),
    }
    # TODO(synk): self.adjust_layer = nn.Linear(1, 1) is defined in __init__ but
    # never used in forward(), so it is intentionally not instantiated here.

    stimulus = jax.random.normal(ks[8], (N, SEQ), jnp.float32)

    out = jax.block_until_ready(lstmcell_forward(stimulus, params))
    ref = lstmcell_reference(stimulus, params)

    assert out.shape == (N, SEQ)
    assert jnp.allclose(out, ref, atol=1e-5, rtol=1e-5), (
        f"max abs err {jnp.max(jnp.abs(out - ref))}")
    print("KERNEL_OK")
</pallas_src>

<mosaic_0001>
module attributes {stable_mosaic.version = 11 : i64} {
  func.func @_lstm2_kernel(%arg0: memref<2x8xf32, #tpu.memory_space<vmem>>, %arg1: memref<128x512xf32, #tpu.memory_space<vmem>>, %arg2: memref<1x512xf32, #tpu.memory_space<vmem>>, %arg3: memref<4x128xf32, #tpu.memory_space<vmem>>, %arg4: memref<4x1xf32, #tpu.memory_space<vmem>>, %arg5: memref<4x1xf32, #tpu.memory_space<vmem>>, %arg6: memref<2x8xf32, #tpu.memory_space<vmem>>) attributes {dimension_semantics = [], scalar_prefetch = 0 : i64, scratch_operands = 0 : i64, tpu.core_type = #tpu.core_type<tc>} {
    %c0 = arith.constant 0 : index
    %c0_0 = arith.constant 0 : index
    %0 = vector.load %arg1[%c0, %c0_0] : memref<128x512xf32, #tpu.memory_space<vmem>>, vector<128x512xf32>
    %c0_1 = arith.constant 0 : index
    %c0_2 = arith.constant 0 : index
    %1 = vector.load %arg2[%c0_1, %c0_2] : memref<1x512xf32, #tpu.memory_space<vmem>>, vector<1x512xf32>
    %c0_3 = arith.constant 0 : index
    %c0_4 = arith.constant 0 : index
    %2 = vector.load %arg3[%c0_3, %c0_4] : memref<4x128xf32, #tpu.memory_space<vmem>>, vector<4x128xf32>
    %c0_5 = arith.constant 0 : index
    %c0_6 = arith.constant 0 : index
    %3 = vector.load %arg4[%c0_5, %c0_6] : memref<4x1xf32, #tpu.memory_space<vmem>>, vector<4x1xf32>
    %c0_7 = arith.constant 0 : index
    %c0_8 = arith.constant 0 : index
    %4 = vector.load %arg5[%c0_7, %c0_8] : memref<4x1xf32, #tpu.memory_space<vmem>>, vector<4x1xf32>
    %c0_9 = arith.constant 0 : index
    %c0_10 = arith.constant 0 : index
    %5 = vector.load %arg0[%c0_9, %c0_10] : memref<2x8xf32, #tpu.memory_space<vmem>>, vector<2x8xf32>
    %6 = tpu.iota {dimensions = array<i32: 1>} : vector<2x128xi32>
    %c127_i32 = arith.constant 127 : i32
    %7 = vector.broadcast %c127_i32 : i32 to vector<2x128xi32>
    %8 = arith.cmpi eq, %6, %7 : vector<2x128xi32>
    %cst = arith.constant 0.000000e+00 : f32
    %9 = vector.broadcast %cst : f32 to vector<2x128xf32>
    %cst_11 = arith.constant 0.000000e+00 : f32
    %10 = vector.broadcast %cst_11 : f32 to vector<2x128xf32>
    %cst_12 = arith.constant 0.000000e+00 : f32
    %11 = vector.broadcast %cst_12 : f32 to vector<2x1xf32>
    %cst_13 = arith.constant 0.000000e+00 : f32
    %12 = vector.broadcast %cst_13 : f32 to vector<2x1xf32>
    %13 = vector.extract_strided_slice %5 {offsets = [0, 0], sizes = [2, 1], strides = [1, 1]} : vector<2x8xf32> to vector<2x1xf32>
    %14 = vector.shape_cast %13 : vector<2x1xf32> to vector<2x1xf32>
    %15 = vector.broadcast %14 : vector<2x1xf32> to vector<2x128xf32>
    %16 = arith.select %8, %15, %9 : vector<2x128xi1>, vector<2x128xf32>
    %cst_14 = arith.constant dense<0.000000e+00> : vector<2x512xf32>
    %17 = tpu.matmul %16, %0, %cst_14 {dimension_numbers = #tpu.dot_dimension_numbers<[1], [0], [0], [1], [0, 0, 1, 1], [], []>} : vector<2x128xf32>, vector<128x512xf32>, vector<2x512xf32> -> vector<2x512xf32>
    %18 = vector.broadcast %1 : vector<1x512xf32> to vector<2x512xf32>
    %19 = arith.addf %17, %18 : vector<2x512xf32>
    %20 = vector.extract_strided_slice %19 {offsets = [0, 0], sizes = [2, 128], strides = [1, 1]} : vector<2x512xf32> to vector<2x128xf32>
    %21 = arith.negf %20 : vector<2x128xf32>
    %22 = math.exp %21 : vector<2x128xf32>
    %cst_15 = arith.constant 1.000000e+00 : f32
    %23 = vector.broadcast %cst_15 : f32 to vector<2x128xf32>
    %24 = arith.addf %23, %22 : vector<2x128xf32>
    %25 = arith.divf %23, %24 : vector<2x128xf32>
    %26 = vector.extract_strided_slice %19 {offsets = [0, 128], sizes = [2, 128], strides = [1, 1]} : vector<2x512xf32> to vector<2x128xf32>
    %27 = arith.negf %26 : vector<2x128xf32>
    %28 = math.exp %27 : vector<2x128xf32>
    %cst_16 = arith.constant 1.000000e+00 : f32
    %29 = vector.broadcast %cst_16 : f32 to vector<2x128xf32>
    %30 = arith.addf %29, %28 : vector<2x128xf32>
    %31 = arith.divf %29, %30 : vector<2x128xf32>
    %32 = vector.extract_strided_slice %19 {offsets = [0, 256], sizes = [2, 128], strides = [1, 1]} : vector<2x512xf32> to vector<2x128xf32>
    %33 = math.tanh %32 : vector<2x128xf32>
    %34 = vector.extract_strided_slice %19 {offsets = [0, 384], sizes = [2, 128], strides = [1, 1]} : vector<2x512xf32> to vector<2x128xf32>
    %35 = arith.negf %34 : vector<2x128xf32>
    %36 = math.exp %35 : vector<2x128xf32>
    %cst_17 = arith.constant 1.000000e+00 : f32
    %37 = vector.broadcast %cst_17 : f32 to vector<2x128xf32>
    %38 = arith.addf %37, %36 : vector<2x128xf32>
    %39 = arith.divf %37, %38 : vector<2x128xf32>
    %40 = arith.mulf %31, %10 : vector<2x128xf32>
    %41 = arith.mulf %25, %33 : vector<2x128xf32>
    %42 = arith.addf %40, %41 : vector<2x128xf32>
    %43 = math.tanh %42 : vector<2x128xf32>
    %44 = arith.mulf %39, %43 : vector<2x128xf32>
    %45 = vector.extract_strided_slice %2 {offsets = [0, 0], sizes = [1, 128], strides = [1, 1]} : vector<4x128xf32> to vector<1x128xf32>
    %46 = vector.broadcast %45 : vector<1x128xf32> to vector<2x128xf32>
    %47 = arith.mulf %44, %46 : vector<2x128xf32>
    %cst_18 = arith.constant dense<0.000000e+00> : vector<2xf32>
    %48 = vector.multi_reduction <add>, %47, %cst_18 [1] : vector<2x128xf32> to vector<2xf32>
    %49 = vector.shape_cast %48 : vector<2xf32> to vector<2x1xf32>
    %50 = vector.extract_strided_slice %2 {offsets = [1, 0], sizes = [1, 128], strides = [1, 1]} : vector<4x128xf32> to vector<1x128xf32>
    %51 = vector.broadcast %50 : vector<1x128xf32> to vector<2x128xf32>
    %52 = arith.mulf %44, %51 : vector<2x128xf32>
    %cst_19 = arith.constant dense<0.000000e+00> : vector<2xf32>
    %53 = vector.multi_reduction <add>, %52, %cst_19 [1] : vector<2x128xf32> to vector<2xf32>
    %54 = vector.shape_cast %53 : vector<2xf32> to vector<2x1xf32>
    %55 = vector.extract_strided_slice %2 {offsets = [2, 0], sizes = [1, 128], strides = [1, 1]} : vector<4x128xf32> to vector<1x128xf32>
    %56 = vector.broadcast %55 : vector<1x128xf32> to vector<2x128xf32>
    %57 = arith.mulf %44, %56 : vector<2x128xf32>
    %cst_20 = arith.constant dense<0.000000e+00> : vector<2xf32>
    %58 = vector.multi_reduction <add>, %57, %cst_20 [1] : vector<2x128xf32> to vector<2xf32>
    %59 = vector.shape_cast %58 : vector<2xf32> to vector<2x1xf32>
    %60 = vector.extract_strided_slice %2 {offsets = [3, 0], sizes = [1, 128], strides = [1, 1]} : vector<4x128xf32> to vector<1x128xf32>
    %61 = vector.broadcast %60 : vector<1x128xf32> to vector<2x128xf32>
    %62 = arith.mulf %44, %61 : vector<2x128xf32>
    %cst_21 = arith.constant dense<0.000000e+00> : vector<2xf32>
    %63 = vector.multi_reduction <add>, %62, %cst_21 [1] : vector<2x128xf32> to vector<2xf32>
    %64 = vector.shape_cast %63 : vector<2xf32> to vector<2x1xf32>
    %65 = vector.extract_strided_slice %3 {offsets = [0, 0], sizes = [1, 1], strides = [1, 1]} : vector<4x1xf32> to vector<1x1xf32>
    %66 = vector.broadcast %65 : vector<1x1xf32> to vector<2x1xf32>
    %67 = arith.mulf %66, %11 : vector<2x1xf32>
    %68 = arith.addf %49, %67 : vector<2x1xf32>
    %69 = vector.extract_strided_slice %4 {offsets = [0, 0], sizes = [1, 1], strides = [1, 1]} : vector<4x1xf32> to vector<1x1xf32>
    %70 = vector.broadcast %69 : vector<1x1xf32> to vector<2x1xf32>
    %71 = arith.addf %68, %70 : vector<2x1xf32>
    %72 = arith.negf %71 : vector<2x1xf32>
    %73 = math.exp %72 : vector<2x1xf32>
    %cst_22 = arith.constant 1.000000e+00 : f32
    %74 = vector.broadcast %cst_22 : f32 to vector<2x1xf32>
    %75 = arith.addf %74, %73 : vector<2x1xf32>
    %76 = arith.divf %74, %75 : vector<2x1xf32>
    %77 = vector.extract_strided_slice %3 {offsets = [1, 0], sizes = [1, 1], strides = [1, 1]} : vector<4x1xf32> to vector<1x1xf32>
    %78 = vector.broadcast %77 : vector<1x1xf32> to vector<2x1xf32>
    %79 = arith.mulf %78, %11 : vector<2x1xf32>
    %80 = arith.addf %54, %79 : vector<2x1xf32>
    %81 = vector.extract_strided_slice %4 {offsets = [1, 0], sizes = [1, 1], strides = [1, 1]} : vector<4x1xf32> to vector<1x1xf32>
    %82 = vector.broadcast %81 : vector<1x1xf32> to vector<2x1xf32>
    %83 = arith.addf %80, %82 : vector<2x1xf32>
    %84 = arith.negf %83 : vector<2x1xf32>
    %85 = math.exp %84 : vector<2x1xf32>
    %cst_23 = arith.constant 1.000000e+00 : f32
    %86 = vector.broadcast %cst_23 : f32 to vector<2x1xf32>
    %87 = arith.addf %86, %85 : vector<2x1xf32>
    %88 = arith.divf %86, %87 : vector<2x1xf32>
    %89 = vector.extract_strided_slice %3 {offsets = [2, 0], sizes = [1, 1], strides = [1, 1]} : vector<4x1xf32> to vector<1x1xf32>
    %90 = vector.broadcast %89 : vector<1x1xf32> to vector<2x1xf32>
    %91 = arith.mulf %90, %11 : vector<2x1xf32>
    %92 = arith.addf %59, %91 : vector<2x1xf32>
    %93 = vector.extract_strided_slice %4 {offsets = [2, 0], sizes = [1, 1], strides = [1, 1]} : vector<4x1xf32> to vector<1x1xf32>
    %94 = vector.broadcast %93 : vector<1x1xf32> to vector<2x1xf32>
    %95 = arith.addf %92, %94 : vector<2x1xf32>
    %96 = math.tanh %95 : vector<2x1xf32>
    %97 = vector.extract_strided_slice %3 {offsets = [3, 0], sizes = [1, 1], strides = [1, 1]} : vector<4x1xf32> to vector<1x1xf32>
    %98 = vector.broadcast %97 : vector<1x1xf32> to vector<2x1xf32>
    %99 = arith.mulf %98, %11 : vector<2x1xf32>
    %100 = arith.addf %64, %99 : vector<2x1xf32>
    %101 = vector.extract_strided_slice %4 {offsets = [3, 0], sizes = [1, 1], strides = [1, 1]} : vector<4x1xf32> to vector<1x1xf32>
    %102 = vector.broadcast %101 : vector<1x1xf32> to vector<2x1xf32>
    %103 = arith.addf %100, %102 : vector<2x1xf32>
    %104 = arith.negf %103 : vector<2x1xf32>
    %105 = math.exp %104 : vector<2x1xf32>
    %cst_24 = arith.constant 1.000000e+00 : f32
    %106 = vector.broadcast %cst_24 : f32 to vector<2x1xf32>
    %107 = arith.addf %106, %105 : vector<2x1xf32>
    %108 = arith.divf %106, %107 : vector<2x1xf32>
    %109 = arith.mulf %88, %12 : vector<2x1xf32>
    %110 = arith.mulf %76, %96 : vector<2x1xf32>
    %111 = arith.addf %109, %110 : vector<2x1xf32>
    %112 = math.tanh %111 : vector<2x1xf32>
    %113 = arith.mulf %108, %112 : vector<2x1xf32>
    %114 = vector.extract_strided_slice %5 {offsets = [0, 1], sizes = [2, 1], strides = [1, 1]} : vector<2x8xf32> to vector<2x1xf32>
    %115 = vector.shape_cast %114 : vector<2x1xf32> to vector<2x1xf32>
    %116 = vector.broadcast %115 : vector<2x1xf32> to vector<2x128xf32>
    %117 = arith.select %8, %116, %44 : vector<2x128xi1>, vector<2x128xf32>
    %cst_25 = arith.constant dense<0.000000e+00> : vector<2x512xf32>
    %118 = tpu.matmul %117, %0, %cst_25 {dimension_numbers = #tpu.dot_dimension_numbers<[1], [0], [0], [1], [0, 0, 1, 1], [], []>} : vector<2x128xf32>, vector<128x512xf32>, vector<2x512xf32> -> vector<2x512xf32>
    %119 = vector.broadcast %1 : vector<1x512xf32> to vector<2x512xf32>
    %120 = arith.addf %118, %119 : vector<2x512xf32>
    %121 = vector.extract_strided_slice %120 {offsets = [0, 0], sizes = [2, 128], strides = [1, 1]} : vector<2x512xf32> to vector<2x128xf32>
    %122 = arith.negf %121 : vector<2x128xf32>
    %123 = math.exp %122 : vector<2x128xf32>
    %cst_26 = arith.constant 1.000000e+00 : f32
    %124 = vector.broadcast %cst_26 : f32 to vector<2x128xf32>
    %125 = arith.addf %124, %123 : vector<2x128xf32>
    %126 = arith.divf %124, %125 : vector<2x128xf32>
    %127 = vector.extract_strided_slice %120 {offsets = [0, 128], sizes = [2, 128], strides = [1, 1]} : vector<2x512xf32> to vector<2x128xf32>
    %128 = arith.negf %127 : vector<2x128xf32>
    %129 = math.exp %128 : vector<2x128xf32>
    %cst_27 = arith.constant 1.000000e+00 : f32
    %130 = vector.broadcast %cst_27 : f32 to vector<2x128xf32>
    %131 = arith.addf %130, %129 : vector<2x128xf32>
    %132 = arith.divf %130, %131 : vector<2x128xf32>
    %133 = vector.extract_strided_slice %120 {offsets = [0, 256], sizes = [2, 128], strides = [1, 1]} : vector<2x512xf32> to vector<2x128xf32>
    %134 = math.tanh %133 : vector<2x128xf32>
    %135 = vector.extract_strided_slice %120 {offsets = [0, 384], sizes = [2, 128], strides = [1, 1]} : vector<2x512xf32> to vector<2x128xf32>
    %136 = arith.negf %135 : vector<2x128xf32>
    %137 = math.exp %136 : vector<2x128xf32>
    %cst_28 = arith.constant 1.000000e+00 : f32
    %138 = vector.broadcast %cst_28 : f32 to vector<2x128xf32>
    %139 = arith.addf %138, %137 : vector<2x128xf32>
    %140 = arith.divf %138, %139 : vector<2x128xf32>
    %141 = arith.mulf %132, %42 : vector<2x128xf32>
    %142 = arith.mulf %126, %134 : vector<2x128xf32>
    %143 = arith.addf %141, %142 : vector<2x128xf32>
    %144 = math.tanh %143 : vector<2x128xf32>
    %145 = arith.mulf %140, %144 : vector<2x128xf32>
    %146 = vector.extract_strided_slice %2 {offsets = [0, 0], sizes = [1, 128], strides = [1, 1]} : vector<4x128xf32> to vector<1x128xf32>
    %147 = vector.broadcast %146 : vector<1x128xf32> to vector<2x128xf32>
    %148 = arith.mulf %145, %147 : vector<2x128xf32>
    %cst_29 = arith.constant dense<0.000000e+00> : vector<2xf32>
    %149 = vector.multi_reduction <add>, %148, %cst_29 [1] : vector<2x128xf32> to vector<2xf32>
    %150 = vector.shape_cast %149 : vector<2xf32> to vector<2x1xf32>
    %151 = vector.extract_strided_slice %2 {offsets = [1, 0], sizes = [1, 128], strides = [1, 1]} : vector<4x128xf32> to vector<1x128xf32>
    %152 = vector.broadcast %151 : vector<1x128xf32> to vector<2x128xf32>
    %153 = arith.mulf %145, %152 : vector<2x128xf32>
    %cst_30 = arith.constant dense<0.000000e+00> : vector<2xf32>
    %154 = vector.multi_reduction <add>, %153, %cst_30 [1] : vector<2x128xf32> to vector<2xf32>
    %155 = vector.shape_cast %154 : vector<2xf32> to vector<2x1xf32>
    %156 = vector.extract_strided_slice %2 {offsets = [2, 0], sizes = [1, 128], strides = [1, 1]} : vector<4x128xf32> to vector<1x128xf32>
    %157 = vector.broadcast %156 : vector<1x128xf32> to vector<2x128xf32>
    %158 = arith.mulf %145, %157 : vector<2x128xf32>
    %cst_31 = arith.constant dense<0.000000e+00> : vector<2xf32>
    %159 = vector.multi_reduction <add>, %158, %cst_31 [1] : vector<2x128xf32> to vector<2xf32>
    %160 = vector.shape_cast %159 : vector<2xf32> to vector<2x1xf32>
    %161 = vector.extract_strided_slice %2 {offsets = [3, 0], sizes = [1, 128], strides = [1, 1]} : vector<4x128xf32> to vector<1x128xf32>
    %162 = vector.broadcast %161 : vector<1x128xf32> to vector<2x128xf32>
    %163 = arith.mulf %145, %162 : vector<2x128xf32>
    %cst_32 = arith.constant dense<0.000000e+00> : vector<2xf32>
    %164 = vector.multi_reduction <add>, %163, %cst_32 [1] : vector<2x128xf32> to vector<2xf32>
    %165 = vector.shape_cast %164 : vector<2xf32> to vector<2x1xf32>
    %166 = vector.extract_strided_slice %3 {offsets = [0, 0], sizes = [1, 1], strides = [1, 1]} : vector<4x1xf32> to vector<1x1xf32>
    %167 = vector.broadcast %166 : vector<1x1xf32> to vector<2x1xf32>
    %168 = arith.mulf %167, %113 : vector<2x1xf32>
    %169 = arith.addf %150, %168 : vector<2x1xf32>
    %170 = vector.extract_strided_slice %4 {offsets = [0, 0], sizes = [1, 1], strides = [1, 1]} : vector<4x1xf32> to vector<1x1xf32>
    %171 = vector.broadcast %170 : vector<1x1xf32> to vector<2x1xf32>
    %172 = arith.addf %169, %171 : vector<2x1xf32>
    %173 = arith.negf %172 : vector<2x1xf32>
    %174 = math.exp %173 : vector<2x1xf32>
    %cst_33 = arith.constant 1.000000e+00 : f32
    %175 = vector.broadcast %cst_33 : f32 to vector<2x1xf32>
    %176 = arith.addf %175, %174 : vector<2x1xf32>
    %177 = arith.divf %175, %176 : vector<2x1xf32>
    %178 = vector.extract_strided_slice %3 {offsets = [1, 0], sizes = [1, 1], strides = [1, 1]} : vector<4x1xf32> to vector<1x1xf32>
    %179 = vector.broadcast %178 : vector<1x1xf32> to vector<2x1xf32>
    %180 = arith.mulf %179, %113 : vector<2x1xf32>
    %181 = arith.addf %155, %180 : vector<2x1xf32>
    %182 = vector.extract_strided_slice %4 {offsets = [1, 0], sizes = [1, 1], strides = [1, 1]} : vector<4x1xf32> to vector<1x1xf32>
    %183 = vector.broadcast %182 : vector<1x1xf32> to vector<2x1xf32>
    %184 = arith.addf %181, %183 : vector<2x1xf32>
    %185 = arith.negf %184 : vector<2x1xf32>
    %186 = math.exp %185 : vector<2x1xf32>
    %cst_34 = arith.constant 1.000000e+00 : f32
    %187 = vector.broadcast %cst_34 : f32 to vector<2x1xf32>
    %188 = arith.addf %187, %186 : vector<2x1xf32>
    %189 = arith.divf %187, %188 : vector<2x1xf32>
    %190 = vector.extract_strided_slice %3 {offsets = [2, 0], sizes = [1, 1], strides = [1, 1]} : vector<4x1xf32> to vector<1x1xf32>
    %191 = vector.broadcast %190 : vector<1x1xf32> to vector<2x1xf32>
    %192 = arith.mulf %191, %113 : vector<2x1xf32>
    %193 = arith.addf %160, %192 : vector<2x1xf32>
    %194 = vector.extract_strided_slice %4 {offsets = [2, 0], sizes = [1, 1], strides = [1, 1]} : vector<4x1xf32> to vector<1x1xf32>
    %195 = vector.broadcast %194 : vector<1x1xf32> to vector<2x1xf32>
    %196 = arith.addf %193, %195 : vector<2x1xf32>
    %197 = math.tanh %196 : vector<2x1xf32>
    %198 = vector.extract_strided_slice %3 {offsets = [3, 0], sizes = [1, 1], strides = [1, 1]} : vector<4x1xf32> to vector<1x1xf32>
    %199 = vector.broadcast %198 : vector<1x1xf32> to vector<2x1xf32>
    %200 = arith.mulf %199, %113 : vector<2x1xf32>
    %201 = arith.addf %165, %200 : vector<2x1xf32>
    %202 = vector.extract_strided_slice %4 {offsets = [3, 0], sizes = [1, 1], strides = [1, 1]} : vector<4x1xf32> to vector<1x1xf32>
    %203 = vector.broadcast %202 : vector<1x1xf32> to vector<2x1xf32>
    %204 = arith.addf %201, %203 : vector<2x1xf32>
    %205 = arith.negf %204 : vector<2x1xf32>
    %206 = math.exp %205 : vector<2x1xf32>
    %cst_35 = arith.constant 1.000000e+00 : f32
    %207 = vector.broadcast %cst_35 : f32 to vector<2x1xf32>
    %208 = arith.addf %207, %206 : vector<2x1xf32>
    %209 = arith.divf %207, %208 : vector<2x1xf32>
    %210 = arith.mulf %189, %111 : vector<2x1xf32>
    %211 = arith.mulf %177, %197 : vector<2x1xf32>
    %212 = arith.addf %210, %211 : vector<2x1xf32>
    %213 = math.tanh %212 : vector<2x1xf32>
    %214 = arith.mulf %209, %213 : vector<2x1xf32>
    %215 = vector.extract_strided_slice %5 {offsets = [0, 2], sizes = [2, 1], strides = [1, 1]} : vector<2x8xf32> to vector<2x1xf32>
    %216 = vector.shape_cast %215 : vector<2x1xf32> to vector<2x1xf32>
    %217 = vector.broadcast %216 : vector<2x1xf32> to vector<2x128xf32>
    %218 = arith.select %8, %217, %145 : vector<2x128xi1>, vector<2x128xf32>
    %cst_36 = arith.constant dense<0.000000e+00> : vector<2x512xf32>
    %219 = tpu.matmul %218, %0, %cst_36 {dimension_numbers = #tpu.dot_dimension_numbers<[1], [0], [0], [1], [0, 0, 1, 1], [], []>} : vector<2x128xf32>, vector<128x512xf32>, vector<2x512xf32> -> vector<2x512xf32>
    %220 = vector.broadcast %1 : vector<1x512xf32> to vector<2x512xf32>
    %221 = arith.addf %219, %220 : vector<2x512xf32>
    %222 = vector.extract_strided_slice %221 {offsets = [0, 0], sizes = [2, 128], strides = [1, 1]} : vector<2x512xf32> to vector<2x128xf32>
    %223 = arith.negf %222 : vector<2x128xf32>
    %224 = math.exp %223 : vector<2x128xf32>
    %cst_37 = arith.constant 1.000000e+00 : f32
    %225 = vector.broadcast %cst_37 : f32 to vector<2x128xf32>
    %226 = arith.addf %225, %224 : vector<2x128xf32>
    %227 = arith.divf %225, %226 : vector<2x128xf32>
    %228 = vector.extract_strided_slice %221 {offsets = [0, 128], sizes = [2, 128], strides = [1, 1]} : vector<2x512xf32> to vector<2x128xf32>
    %229 = arith.negf %228 : vector<2x128xf32>
    %230 = math.exp %229 : vector<2x128xf32>
    %cst_38 = arith.constant 1.000000e+00 : f32
    %231 = vector.broadcast %cst_38 : f32 to vector<2x128xf32>
    %232 = arith.addf %231, %230 : vector<2x128xf32>
    %233 = arith.divf %231, %232 : vector<2x128xf32>
    %234 = vector.extract_strided_slice %221 {offsets = [0, 256], sizes = [2, 128], strides = [1, 1]} : vector<2x512xf32> to vector<2x128xf32>
    %235 = math.tanh %234 : vector<2x128xf32>
    %236 = vector.extract_strided_slice %221 {offsets = [0, 384], sizes = [2, 128], strides = [1, 1]} : vector<2x512xf32> to vector<2x128xf32>
    %237 = arith.negf %236 : vector<2x128xf32>
    %238 = math.exp %237 : vector<2x128xf32>
    %cst_39 = arith.constant 1.000000e+00 : f32
    %239 = vector.broadcast %cst_39 : f32 to vector<2x128xf32>
    %240 = arith.addf %239, %238 : vector<2x128xf32>
    %241 = arith.divf %239, %240 : vector<2x128xf32>
    %242 = arith.mulf %233, %143 : vector<2x128xf32>
    %243 = arith.mulf %227, %235 : vector<2x128xf32>
    %244 = arith.addf %242, %243 : vector<2x128xf32>
    %245 = math.tanh %244 : vector<2x128xf32>
    %246 = arith.mulf %241, %245 : vector<2x128xf32>
    %247 = vector.extract_strided_slice %2 {offsets = [0, 0], sizes = [1, 128], strides = [1, 1]} : vector<4x128xf32> to vector<1x128xf32>
    %248 = vector.broadcast %247 : vector<1x128xf32> to vector<2x128xf32>
    %249 = arith.mulf %246, %248 : vector<2x128xf32>
    %cst_40 = arith.constant dense<0.000000e+00> : vector<2xf32>
    %250 = vector.multi_reduction <add>, %249, %cst_40 [1] : vector<2x128xf32> to vector<2xf32>
    %251 = vector.shape_cast %250 : vector<2xf32> to vector<2x1xf32>
    %252 = vector.extract_strided_slice %2 {offsets = [1, 0], sizes = [1, 128], strides = [1, 1]} : vector<4x128xf32> to vector<1x128xf32>
    %253 = vector.broadcast %252 : vector<1x128xf32> to vector<2x128xf32>
    %254 = arith.mulf %246, %253 : vector<2x128xf32>
    %cst_41 = arith.constant dense<0.000000e+00> : vector<2xf32>
    %255 = vector.multi_reduction <add>, %254, %cst_41 [1] : vector<2x128xf32> to vector<2xf32>
    %256 = vector.shape_cast %255 : vector<2xf32> to vector<2x1xf32>
    %257 = vector.extract_strided_slice %2 {offsets = [2, 0], sizes = [1, 128], strides = [1, 1]} : vector<4x128xf32> to vector<1x128xf32>
    %258 = vector.broadcast %257 : vector<1x128xf32> to vector<2x128xf32>
    %259 = arith.mulf %246, %258 : vector<2x128xf32>
    %cst_42 = arith.constant dense<0.000000e+00> : vector<2xf32>
    %260 = vector.multi_reduction <add>, %259, %cst_42 [1] : vector<2x128xf32> to vector<2xf32>
    %261 = vector.shape_cast %260 : vector<2xf32> to vector<2x1xf32>
    %262 = vector.extract_strided_slice %2 {offsets = [3, 0], sizes = [1, 128], strides = [1, 1]} : vector<4x128xf32> to vector<1x128xf32>
    %263 = vector.broadcast %262 : vector<1x128xf32> to vector<2x128xf32>
    %264 = arith.mulf %246, %263 : vector<2x128xf32>
    %cst_43 = arith.constant dense<0.000000e+00> : vector<2xf32>
    %265 = vector.multi_reduction <add>, %264, %cst_43 [1] : vector<2x128xf32> to vector<2xf32>
    %266 = vector.shape_cast %265 : vector<2xf32> to vector<2x1xf32>
    %267 = vector.extract_strided_slice %3 {offsets = [0, 0], sizes = [1, 1], strides = [1, 1]} : vector<4x1xf32> to vector<1x1xf32>
    %268 = vector.broadcast %267 : vector<1x1xf32> to vector<2x1xf32>
    %269 = arith.mulf %268, %214 : vector<2x1xf32>
    %270 = arith.addf %251, %269 : vector<2x1xf32>
    %271 = vector.extract_strided_slice %4 {offsets = [0, 0], sizes = [1, 1], strides = [1, 1]} : vector<4x1xf32> to vector<1x1xf32>
    %272 = vector.broadcast %271 : vector<1x1xf32> to vector<2x1xf32>
    %273 = arith.addf %270, %272 : vector<2x1xf32>
    %274 = arith.negf %273 : vector<2x1xf32>
    %275 = math.exp %274 : vector<2x1xf32>
    %cst_44 = arith.constant 1.000000e+00 : f32
    %276 = vector.broadcast %cst_44 : f32 to vector<2x1xf32>
    %277 = arith.addf %276, %275 : vector<2x1xf32>
    %278 = arith.divf %276, %277 : vector<2x1xf32>
    %279 = vector.extract_strided_slice %3 {offsets = [1, 0], sizes = [1, 1], strides = [1, 1]} : vector<4x1xf32> to vector<1x1xf32>
    %280 = vector.broadcast %279 : vector<1x1xf32> to vector<2x1xf32>
    %281 = arith.mulf %280, %214 : vector<2x1xf32>
    %282 = arith.addf %256, %281 : vector<2x1xf32>
    %283 = vector.extract_strided_slice %4 {offsets = [1, 0], sizes = [1, 1], strides = [1, 1]} : vector<4x1xf32> to vector<1x1xf32>
    %284 = vector.broadcast %283 : vector<1x1xf32> to vector<2x1xf32>
    %285 = arith.addf %282, %284 : vector<2x1xf32>
    %286 = arith.negf %285 : vector<2x1xf32>
    %287 = math.exp %286 : vector<2x1xf32>
    %cst_45 = arith.constant 1.000000e+00 : f32
    %288 = vector.broadcast %cst_45 : f32 to vector<2x1xf32>
    %289 = arith.addf %288, %287 : vector<2x1xf32>
    %290 = arith.divf %288, %289 : vector<2x1xf32>
    %291 = vector.extract_strided_slice %3 {offsets = [2, 0], sizes = [1, 1], strides = [1, 1]} : vector<4x1xf32> to vector<1x1xf32>
    %292 = vector.broadcast %291 : vector<1x1xf32> to vector<2x1xf32>
    %293 = arith.mulf %292, %214 : vector<2x1xf32>
    %294 = arith.addf %261, %293 : vector<2x1xf32>
    %295 = vector.extract_strided_slice %4 {offsets = [2, 0], sizes = [1, 1], strides = [1, 1]} : vector<4x1xf32> to vector<1x1xf32>
    %296 = vector.broadcast %295 : vector<1x1xf32> to vector<2x1xf32>
    %297 = arith.addf %294, %296 : vector<2x1xf32>
    %298 = math.tanh %297 : vector<2x1xf32>
    %299 = vector.extract_strided_slice %3 {offsets = [3, 0], sizes = [1, 1], strides = [1, 1]} : vector<4x1xf32> to vector<1x1xf32>
    %300 = vector.broadcast %299 : vector<1x1xf32> to vector<2x1xf32>
    %301 = arith.mulf %300, %214 : vector<2x1xf32>
    %302 = arith.addf %266, %301 : vector<2x1xf32>
    %303 = vector.extract_strided_slice %4 {offsets = [3, 0], sizes = [1, 1], strides = [1, 1]} : vector<4x1xf32> to vector<1x1xf32>
    %304 = vector.broadcast %303 : vector<1x1xf32> to vector<2x1xf32>
    %305 = arith.addf %302, %304 : vector<2x1xf32>
    %306 = arith.negf %305 : vector<2x1xf32>
    %307 = math.exp %306 : vector<2x1xf32>
    %cst_46 = arith.constant 1.000000e+00 : f32
    %308 = vector.broadcast %cst_46 : f32 to vector<2x1xf32>
    %309 = arith.addf %308, %307 : vector<2x1xf32>
    %310 = arith.divf %308, %309 : vector<2x1xf32>
    %311 = arith.mulf %290, %212 : vector<2x1xf32>
    %312 = arith.mulf %278, %298 : vector<2x1xf32>
    %313 = arith.addf %311, %312 : vector<2x1xf32>
    %314 = math.tanh %313 : vector<2x1xf32>
    %315 = arith.mulf %310, %314 : vector<2x1xf32>
    %316 = vector.extract_strided_slice %5 {offsets = [0, 3], sizes = [2, 1], strides = [1, 1]} : vector<2x8xf32> to vector<2x1xf32>
    %317 = vector.shape_cast %316 : vector<2x1xf32> to vector<2x1xf32>
    %318 = vector.broadcast %317 : vector<2x1xf32> to vector<2x128xf32>
    %319 = arith.select %8, %318, %246 : vector<2x128xi1>, vector<2x128xf32>
    %cst_47 = arith.constant dense<0.000000e+00> : vector<2x512xf32>
    %320 = tpu.matmul %319, %0, %cst_47 {dimension_numbers = #tpu.dot_dimension_numbers<[1], [0], [0], [1], [0, 0, 1, 1], [], []>} : vector<2x128xf32>, vector<128x512xf32>, vector<2x512xf32> -> vector<2x512xf32>
    %321 = vector.broadcast %1 : vector<1x512xf32> to vector<2x512xf32>
    %322 = arith.addf %320, %321 : vector<2x512xf32>
    %323 = vector.extract_strided_slice %322 {offsets = [0, 0], sizes = [2, 128], strides = [1, 1]} : vector<2x512xf32> to vector<2x128xf32>
    %324 = arith.negf %323 : vector<2x128xf32>
    %325 = math.exp %324 : vector<2x128xf32>
    %cst_48 = arith.constant 1.000000e+00 : f32
    %326 = vector.broadcast %cst_48 : f32 to vector<2x128xf32>
    %327 = arith.addf %326, %325 : vector<2x128xf32>
    %328 = arith.divf %326, %327 : vector<2x128xf32>
    %329 = vector.extract_strided_slice %322 {offsets = [0, 128], sizes = [2, 128], strides = [1, 1]} : vector<2x512xf32> to vector<2x128xf32>
    %330 = arith.negf %329 : vector<2x128xf32>
    %331 = math.exp %330 : vector<2x128xf32>
    %cst_49 = arith.constant 1.000000e+00 : f32
    %332 = vector.broadcast %cst_49 : f32 to vector<2x128xf32>
    %333 = arith.addf %332, %331 : vector<2x128xf32>
    %334 = arith.divf %332, %333 : vector<2x128xf32>
    %335 = vector.extract_strided_slice %322 {offsets = [0, 256], sizes = [2, 128], strides = [1, 1]} : vector<2x512xf32> to vector<2x128xf32>
    %336 = math.tanh %335 : vector<2x128xf32>
    %337 = vector.extract_strided_slice %322 {offsets = [0, 384], sizes = [2, 128], strides = [1, 1]} : vector<2x512xf32> to vector<2x128xf32>
    %338 = arith.negf %337 : vector<2x128xf32>
    %339 = math.exp %338 : vector<2x128xf32>
    %cst_50 = arith.constant 1.000000e+00 : f32
    %340 = vector.broadcast %cst_50 : f32 to vector<2x128xf32>
    %341 = arith.addf %340, %339 : vector<2x128xf32>
    %342 = arith.divf %340, %341 : vector<2x128xf32>
    %343 = arith.mulf %334, %244 : vector<2x128xf32>
    %344 = arith.mulf %328, %336 : vector<2x128xf32>
    %345 = arith.addf %343, %344 : vector<2x128xf32>
    %346 = math.tanh %345 : vector<2x128xf32>
    %347 = arith.mulf %342, %346 : vector<2x128xf32>
    %348 = vector.extract_strided_slice %2 {offsets = [0, 0], sizes = [1, 128], strides = [1, 1]} : vector<4x128xf32> to vector<1x128xf32>
    %349 = vector.broadcast %348 : vector<1x128xf32> to vector<2x128xf32>
    %350 = arith.mulf %347, %349 : vector<2x128xf32>
    %cst_51 = arith.constant dense<0.000000e+00> : vector<2xf32>
    %351 = vector.multi_reduction <add>, %350, %cst_51 [1] : vector<2x128xf32> to vector<2xf32>
    %352 = vector.shape_cast %351 : vector<2xf32> to vector<2x1xf32>
    %353 = vector.extract_strided_slice %2 {offsets = [1, 0], sizes = [1, 128], strides = [1, 1]} : vector<4x128xf32> to vector<1x128xf32>
    %354 = vector.broadcast %353 : vector<1x128xf32> to vector<2x128xf32>
    %355 = arith.mulf %347, %354 : vector<2x128xf32>
    %cst_52 = arith.constant dense<0.000000e+00> : vector<2xf32>
    %356 = vector.multi_reduction <add>, %355, %cst_52 [1] : vector<2x128xf32> to vector<2xf32>
    %357 = vector.shape_cast %356 : vector<2xf32> to vector<2x1xf32>
    %358 = vector.extract_strided_slice %2 {offsets = [2, 0], sizes = [1, 128], strides = [1, 1]} : vector<4x128xf32> to vector<1x128xf32>
    %359 = vector.broadcast %358 : vector<1x128xf32> to vector<2x128xf32>
    %360 = arith.mulf %347, %359 : vector<2x128xf32>
    %cst_53 = arith.constant dense<0.000000e+00> : vector<2xf32>
    %361 = vector.multi_reduction <add>, %360, %cst_53 [1] : vector<2x128xf32> to vector<2xf32>
    %362 = vector.shape_cast %361 : vector<2xf32> to vector<2x1xf32>
    %363 = vector.extract_strided_slice %2 {offsets = [3, 0], sizes = [1, 128], strides = [1, 1]} : vector<4x128xf32> to vector<1x128xf32>
    %364 = vector.broadcast %363 : vector<1x128xf32> to vector<2x128xf32>
    %365 = arith.mulf %347, %364 : vector<2x128xf32>
    %cst_54 = arith.constant dense<0.000000e+00> : vector<2xf32>
    %366 = vector.multi_reduction <add>, %365, %cst_54 [1] : vector<2x128xf32> to vector<2xf32>
    %367 = vector.shape_cast %366 : vector<2xf32> to vector<2x1xf32>
    %368 = vector.extract_strided_slice %3 {offsets = [0, 0], sizes = [1, 1], strides = [1, 1]} : vector<4x1xf32> to vector<1x1xf32>
    %369 = vector.broadcast %368 : vector<1x1xf32> to vector<2x1xf32>
    %370 = arith.mulf %369, %315 : vector<2x1xf32>
    %371 = arith.addf %352, %370 : vector<2x1xf32>
    %372 = vector.extract_strided_slice %4 {offsets = [0, 0], sizes = [1, 1], strides = [1, 1]} : vector<4x1xf32> to vector<1x1xf32>
    %373 = vector.broadcast %372 : vector<1x1xf32> to vector<2x1xf32>
    %374 = arith.addf %371, %373 : vector<2x1xf32>
    %375 = arith.negf %374 : vector<2x1xf32>
    %376 = math.exp %375 : vector<2x1xf32>
    %cst_55 = arith.constant 1.000000e+00 : f32
    %377 = vector.broadcast %cst_55 : f32 to vector<2x1xf32>
    %378 = arith.addf %377, %376 : vector<2x1xf32>
    %379 = arith.divf %377, %378 : vector<2x1xf32>
    %380 = vector.extract_strided_slice %3 {offsets = [1, 0], sizes = [1, 1], strides = [1, 1]} : vector<4x1xf32> to vector<1x1xf32>
    %381 = vector.broadcast %380 : vector<1x1xf32> to vector<2x1xf32>
    %382 = arith.mulf %381, %315 : vector<2x1xf32>
    %383 = arith.addf %357, %382 : vector<2x1xf32>
    %384 = vector.extract_strided_slice %4 {offsets = [1, 0], sizes = [1, 1], strides = [1, 1]} : vector<4x1xf32> to vector<1x1xf32>
    %385 = vector.broadcast %384 : vector<1x1xf32> to vector<2x1xf32>
    %386 = arith.addf %383, %385 : vector<2x1xf32>
    %387 = arith.negf %386 : vector<2x1xf32>
    %388 = math.exp %387 : vector<2x1xf32>
    %cst_56 = arith.constant 1.000000e+00 : f32
    %389 = vector.broadcast %cst_56 : f32 to vector<2x1xf32>
    %390 = arith.addf %389, %388 : vector<2x1xf32>
    %391 = arith.divf %389, %390 : vector<2x1xf32>
    %392 = vector.extract_strided_slice %3 {offsets = [2, 0], sizes = [1, 1], strides = [1, 1]} : vector<4x1xf32> to vector<1x1xf32>
    %393 = vector.broadcast %392 : vector<1x1xf32> to vector<2x1xf32>
    %394 = arith.mulf %393, %315 : vector<2x1xf32>
    %395 = arith.addf %362, %394 : vector<2x1xf32>
    %396 = vector.extract_strided_slice %4 {offsets = [2, 0], sizes = [1, 1], strides = [1, 1]} : vector<4x1xf32> to vector<1x1xf32>
    %397 = vector.broadcast %396 : vector<1x1xf32> to vector<2x1xf32>
    %398 = arith.addf %395, %397 : vector<2x1xf32>
    %399 = math.tanh %398 : vector<2x1xf32>
    %400 = vector.extract_strided_slice %3 {offsets = [3, 0], sizes = [1, 1], strides = [1, 1]} : vector<4x1xf32> to vector<1x1xf32>
    %401 = vector.broadcast %400 : vector<1x1xf32> to vector<2x1xf32>
    %402 = arith.mulf %401, %315 : vector<2x1xf32>
    %403 = arith.addf %367, %402 : vector<2x1xf32>
    %404 = vector.extract_strided_slice %4 {offsets = [3, 0], sizes = [1, 1], strides = [1, 1]} : vector<4x1xf32> to vector<1x1xf32>
    %405 = vector.broadcast %404 : vector<1x1xf32> to vector<2x1xf32>
    %406 = arith.addf %403, %405 : vector<2x1xf32>
    %407 = arith.negf %406 : vector<2x1xf32>
    %408 = math.exp %407 : vector<2x1xf32>
    %cst_57 = arith.constant 1.000000e+00 : f32
    %409 = vector.broadcast %cst_57 : f32 to vector<2x1xf32>
    %410 = arith.addf %409, %408 : vector<2x1xf32>
    %411 = arith.divf %409, %410 : vector<2x1xf32>
    %412 = arith.mulf %391, %313 : vector<2x1xf32>
    %413 = arith.mulf %379, %399 : vector<2x1xf32>
    %414 = arith.addf %412, %413 : vector<2x1xf32>
    %415 = math.tanh %414 : vector<2x1xf32>
    %416 = arith.mulf %411, %415 : vector<2x1xf32>
    %417 = vector.extract_strided_slice %5 {offsets = [0, 4], sizes = [2, 1], strides = [1, 1]} : vector<2x8xf32> to vector<2x1xf32>
    %418 = vector.shape_cast %417 : vector<2x1xf32> to vector<2x1xf32>
    %419 = vector.broadcast %418 : vector<2x1xf32> to vector<2x128xf32>
    %420 = arith.select %8, %419, %347 : vector<2x128xi1>, vector<2x128xf32>
    %cst_58 = arith.constant dense<0.000000e+00> : vector<2x512xf32>
    %421 = tpu.matmul %420, %0, %cst_58 {dimension_numbers = #tpu.dot_dimension_numbers<[1], [0], [0], [1], [0, 0, 1, 1], [], []>} : vector<2x128xf32>, vector<128x512xf32>, vector<2x512xf32> -> vector<2x512xf32>
    %422 = vector.broadcast %1 : vector<1x512xf32> to vector<2x512xf32>
    %423 = arith.addf %421, %422 : vector<2x512xf32>
    %424 = vector.extract_strided_slice %423 {offsets = [0, 0], sizes = [2, 128], strides = [1, 1]} : vector<2x512xf32> to vector<2x128xf32>
    %425 = arith.negf %424 : vector<2x128xf32>
    %426 = math.exp %425 : vector<2x128xf32>
    %cst_59 = arith.constant 1.000000e+00 : f32
    %427 = vector.broadcast %cst_59 : f32 to vector<2x128xf32>
    %428 = arith.addf %427, %426 : vector<2x128xf32>
    %429 = arith.divf %427, %428 : vector<2x128xf32>
    %430 = vector.extract_strided_slice %423 {offsets = [0, 128], sizes = [2, 128], strides = [1, 1]} : vector<2x512xf32> to vector<2x128xf32>
    %431 = arith.negf %430 : vector<2x128xf32>
    %432 = math.exp %431 : vector<2x128xf32>
    %cst_60 = arith.constant 1.000000e+00 : f32
    %433 = vector.broadcast %cst_60 : f32 to vector<2x128xf32>
    %434 = arith.addf %433, %432 : vector<2x128xf32>
    %435 = arith.divf %433, %434 : vector<2x128xf32>
    %436 = vector.extract_strided_slice %423 {offsets = [0, 256], sizes = [2, 128], strides = [1, 1]} : vector<2x512xf32> to vector<2x128xf32>
    %437 = math.tanh %436 : vector<2x128xf32>
    %438 = vector.extract_strided_slice %423 {offsets = [0, 384], sizes = [2, 128], strides = [1, 1]} : vector<2x512xf32> to vector<2x128xf32>
    %439 = arith.negf %438 : vector<2x128xf32>
    %440 = math.exp %439 : vector<2x128xf32>
    %cst_61 = arith.constant 1.000000e+00 : f32
    %441 = vector.broadcast %cst_61 : f32 to vector<2x128xf32>
    %442 = arith.addf %441, %440 : vector<2x128xf32>
    %443 = arith.divf %441, %442 : vector<2x128xf32>
    %444 = arith.mulf %435, %345 : vector<2x128xf32>
    %445 = arith.mulf %429, %437 : vector<2x128xf32>
    %446 = arith.addf %444, %445 : vector<2x128xf32>
    %447 = math.tanh %446 : vector<2x128xf32>
    %448 = arith.mulf %443, %447 : vector<2x128xf32>
    %449 = vector.extract_strided_slice %2 {offsets = [0, 0], sizes = [1, 128], strides = [1, 1]} : vector<4x128xf32> to vector<1x128xf32>
    %450 = vector.broadcast %449 : vector<1x128xf32> to vector<2x128xf32>
    %451 = arith.mulf %448, %450 : vector<2x128xf32>
    %cst_62 = arith.constant dense<0.000000e+00> : vector<2xf32>
    %452 = vector.multi_reduction <add>, %451, %cst_62 [1] : vector<2x128xf32> to vector<2xf32>
    %453 = vector.shape_cast %452 : vector<2xf32> to vector<2x1xf32>
    %454 = vector.extract_strided_slice %2 {offsets = [1, 0], sizes = [1, 128], strides = [1, 1]} : vector<4x128xf32> to vector<1x128xf32>
    %455 = vector.broadcast %454 : vector<1x128xf32> to vector<2x128xf32>
    %456 = arith.mulf %448, %455 : vector<2x128xf32>
    %cst_63 = arith.constant dense<0.000000e+00> : vector<2xf32>
    %457 = vector.multi_reduction <add>, %456, %cst_63 [1] : vector<2x128xf32> to vector<2xf32>
    %458 = vector.shape_cast %457 : vector<2xf32> to vector<2x1xf32>
    %459 = vector.extract_strided_slice %2 {offsets = [2, 0], sizes = [1, 128], strides = [1, 1]} : vector<4x128xf32> to vector<1x128xf32>
    %460 = vector.broadcast %459 : vector<1x128xf32> to vector<2x128xf32>
    %461 = arith.mulf %448, %460 : vector<2x128xf32>
    %cst_64 = arith.constant dense<0.000000e+00> : vector<2xf32>
    %462 = vector.multi_reduction <add>, %461, %cst_64 [1] : vector<2x128xf32> to vector<2xf32>
    %463 = vector.shape_cast %462 : vector<2xf32> to vector<2x1xf32>
    %464 = vector.extract_strided_slice %2 {offsets = [3, 0], sizes = [1, 128], strides = [1, 1]} : vector<4x128xf32> to vector<1x128xf32>
    %465 = vector.broadcast %464 : vector<1x128xf32> to vector<2x128xf32>
    %466 = arith.mulf %448, %465 : vector<2x128xf32>
    %cst_65 = arith.constant dense<0.000000e+00> : vector<2xf32>
    %467 = vector.multi_reduction <add>, %466, %cst_65 [1] : vector<2x128xf32> to vector<2xf32>
    %468 = vector.shape_cast %467 : vector<2xf32> to vector<2x1xf32>
    %469 = vector.extract_strided_slice %3 {offsets = [0, 0], sizes = [1, 1], strides = [1, 1]} : vector<4x1xf32> to vector<1x1xf32>
    %470 = vector.broadcast %469 : vector<1x1xf32> to vector<2x1xf32>
    %471 = arith.mulf %470, %416 : vector<2x1xf32>
    %472 = arith.addf %453, %471 : vector<2x1xf32>
    %473 = vector.extract_strided_slice %4 {offsets = [0, 0], sizes = [1, 1], strides = [1, 1]} : vector<4x1xf32> to vector<1x1xf32>
    %474 = vector.broadcast %473 : vector<1x1xf32> to vector<2x1xf32>
    %475 = arith.addf %472, %474 : vector<2x1xf32>
    %476 = arith.negf %475 : vector<2x1xf32>
    %477 = math.exp %476 : vector<2x1xf32>
    %cst_66 = arith.constant 1.000000e+00 : f32
    %478 = vector.broadcast %cst_66 : f32 to vector<2x1xf32>
    %479 = arith.addf %478, %477 : vector<2x1xf32>
    %480 = arith.divf %478, %479 : vector<2x1xf32>
    %481 = vector.extract_strided_slice %3 {offsets = [1, 0], sizes = [1, 1], strides = [1, 1]} : vector<4x1xf32> to vector<1x1xf32>
    %482 = vector.broadcast %481 : vector<1x1xf32> to vector<2x1xf32>
    %483 = arith.mulf %482, %416 : vector<2x1xf32>
    %484 = arith.addf %458, %483 : vector<2x1xf32>
    %485 = vector.extract_strided_slice %4 {offsets = [1, 0], sizes = [1, 1], strides = [1, 1]} : vector<4x1xf32> to vector<1x1xf32>
    %486 = vector.broadcast %485 : vector<1x1xf32> to vector<2x1xf32>
    %487 = arith.addf %484, %486 : vector<2x1xf32>
    %488 = arith.negf %487 : vector<2x1xf32>
    %489 = math.exp %488 : vector<2x1xf32>
    %cst_67 = arith.constant 1.000000e+00 : f32
    %490 = vector.broadcast %cst_67 : f32 to vector<2x1xf32>
    %491 = arith.addf %490, %489 : vector<2x1xf32>
    %492 = arith.divf %490, %491 : vector<2x1xf32>
    %493 = vector.extract_strided_slice %3 {offsets = [2, 0], sizes = [1, 1], strides = [1, 1]} : vector<4x1xf32> to vector<1x1xf32>
    %494 = vector.broadcast %493 : vector<1x1xf32> to vector<2x1xf32>
    %495 = arith.mulf %494, %416 : vector<2x1xf32>
    %496 = arith.addf %463, %495 : vector<2x1xf32>
    %497 = vector.extract_strided_slice %4 {offsets = [2, 0], sizes = [1, 1], strides = [1, 1]} : vector<4x1xf32> to vector<1x1xf32>
    %498 = vector.broadcast %497 : vector<1x1xf32> to vector<2x1xf32>
    %499 = arith.addf %496, %498 : vector<2x1xf32>
    %500 = math.tanh %499 : vector<2x1xf32>
    %501 = vector.extract_strided_slice %3 {offsets = [3, 0], sizes = [1, 1], strides = [1, 1]} : vector<4x1xf32> to vector<1x1xf32>
    %502 = vector.broadcast %501 : vector<1x1xf32> to vector<2x1xf32>
    %503 = arith.mulf %502, %416 : vector<2x1xf32>
    %504 = arith.addf %468, %503 : vector<2x1xf32>
    %505 = vector.extract_strided_slice %4 {offsets = [3, 0], sizes = [1, 1], strides = [1, 1]} : vector<4x1xf32> to vector<1x1xf32>
    %506 = vector.broadcast %505 : vector<1x1xf32> to vector<2x1xf32>
    %507 = arith.addf %504, %506 : vector<2x1xf32>
    %508 = arith.negf %507 : vector<2x1xf32>
    %509 = math.exp %508 : vector<2x1xf32>
    %cst_68 = arith.constant 1.000000e+00 : f32
    %510 = vector.broadcast %cst_68 : f32 to vector<2x1xf32>
    %511 = arith.addf %510, %509 : vector<2x1xf32>
    %512 = arith.divf %510, %511 : vector<2x1xf32>
    %513 = arith.mulf %492, %414 : vector<2x1xf32>
    %514 = arith.mulf %480, %500 : vector<2x1xf32>
    %515 = arith.addf %513, %514 : vector<2x1xf32>
    %516 = math.tanh %515 : vector<2x1xf32>
    %517 = arith.mulf %512, %516 : vector<2x1xf32>
    %518 = vector.extract_strided_slice %5 {offsets = [0, 5], sizes = [2, 1], strides = [1, 1]} : vector<2x8xf32> to vector<2x1xf32>
    %519 = vector.shape_cast %518 : vector<2x1xf32> to vector<2x1xf32>
    %520 = vector.broadcast %519 : vector<2x1xf32> to vector<2x128xf32>
    %521 = arith.select %8, %520, %448 : vector<2x128xi1>, vector<2x128xf32>
    %cst_69 = arith.constant dense<0.000000e+00> : vector<2x512xf32>
    %522 = tpu.matmul %521, %0, %cst_69 {dimension_numbers = #tpu.dot_dimension_numbers<[1], [0], [0], [1], [0, 0, 1, 1], [], []>} : vector<2x128xf32>, vector<128x512xf32>, vector<2x512xf32> -> vector<2x512xf32>
    %523 = vector.broadcast %1 : vector<1x512xf32> to vector<2x512xf32>
    %524 = arith.addf %522, %523 : vector<2x512xf32>
    %525 = vector.extract_strided_slice %524 {offsets = [0, 0], sizes = [2, 128], strides = [1, 1]} : vector<2x512xf32> to vector<2x128xf32>
    %526 = arith.negf %525 : vector<2x128xf32>
    %527 = math.exp %526 : vector<2x128xf32>
    %cst_70 = arith.constant 1.000000e+00 : f32
    %528 = vector.broadcast %cst_70 : f32 to vector<2x128xf32>
    %529 = arith.addf %528, %527 : vector<2x128xf32>
    %530 = arith.divf %528, %529 : vector<2x128xf32>
    %531 = vector.extract_strided_slice %524 {offsets = [0, 128], sizes = [2, 128], strides = [1, 1]} : vector<2x512xf32> to vector<2x128xf32>
    %532 = arith.negf %531 : vector<2x128xf32>
    %533 = math.exp %532 : vector<2x128xf32>
    %cst_71 = arith.constant 1.000000e+00 : f32
    %534 = vector.broadcast %cst_71 : f32 to vector<2x128xf32>
    %535 = arith.addf %534, %533 : vector<2x128xf32>
    %536 = arith.divf %534, %535 : vector<2x128xf32>
    %537 = vector.extract_strided_slice %524 {offsets = [0, 256], sizes = [2, 128], strides = [1, 1]} : vector<2x512xf32> to vector<2x128xf32>
    %538 = math.tanh %537 : vector<2x128xf32>
    %539 = vector.extract_strided_slice %524 {offsets = [0, 384], sizes = [2, 128], strides = [1, 1]} : vector<2x512xf32> to vector<2x128xf32>
    %540 = arith.negf %539 : vector<2x128xf32>
    %541 = math.exp %540 : vector<2x128xf32>
    %cst_72 = arith.constant 1.000000e+00 : f32
    %542 = vector.broadcast %cst_72 : f32 to vector<2x128xf32>
    %543 = arith.addf %542, %541 : vector<2x128xf32>
    %544 = arith.divf %542, %543 : vector<2x128xf32>
    %545 = arith.mulf %536, %446 : vector<2x128xf32>
    %546 = arith.mulf %530, %538 : vector<2x128xf32>
    %547 = arith.addf %545, %546 : vector<2x128xf32>
    %548 = math.tanh %547 : vector<2x128xf32>
    %549 = arith.mulf %544, %548 : vector<2x128xf32>
    %550 = vector.extract_strided_slice %2 {offsets = [0, 0], sizes = [1, 128], strides = [1, 1]} : vector<4x128xf32> to vector<1x128xf32>
    %551 = vector.broadcast %550 : vector<1x128xf32> to vector<2x128xf32>
    %552 = arith.mulf %549, %551 : vector<2x128xf32>
    %cst_73 = arith.constant dense<0.000000e+00> : vector<2xf32>
    %553 = vector.multi_reduction <add>, %552, %cst_73 [1] : vector<2x128xf32> to vector<2xf32>
    %554 = vector.shape_cast %553 : vector<2xf32> to vector<2x1xf32>
    %555 = vector.extract_strided_slice %2 {offsets = [1, 0], sizes = [1, 128], strides = [1, 1]} : vector<4x128xf32> to vector<1x128xf32>
    %556 = vector.broadcast %555 : vector<1x128xf32> to vector<2x128xf32>
    %557 = arith.mulf %549, %556 : vector<2x128xf32>
    %cst_74 = arith.constant dense<0.000000e+00> : vector<2xf32>
    %558 = vector.multi_reduction <add>, %557, %cst_74 [1] : vector<2x128xf32> to vector<2xf32>
    %559 = vector.shape_cast %558 : vector<2xf32> to vector<2x1xf32>
    %560 = vector.extract_strided_slice %2 {offsets = [2, 0], sizes = [1, 128], strides = [1, 1]} : vector<4x128xf32> to vector<1x128xf32>
    %561 = vector.broadcast %560 : vector<1x128xf32> to vector<2x128xf32>
    %562 = arith.mulf %549, %561 : vector<2x128xf32>
    %cst_75 = arith.constant dense<0.000000e+00> : vector<2xf32>
    %563 = vector.multi_reduction <add>, %562, %cst_75 [1] : vector<2x128xf32> to vector<2xf32>
    %564 = vector.shape_cast %563 : vector<2xf32> to vector<2x1xf32>
    %565 = vector.extract_strided_slice %2 {offsets = [3, 0], sizes = [1, 128], strides = [1, 1]} : vector<4x128xf32> to vector<1x128xf32>
    %566 = vector.broadcast %565 : vector<1x128xf32> to vector<2x128xf32>
    %567 = arith.mulf %549, %566 : vector<2x128xf32>
    %cst_76 = arith.constant dense<0.000000e+00> : vector<2xf32>
    %568 = vector.multi_reduction <add>, %567, %cst_76 [1] : vector<2x128xf32> to vector<2xf32>
    %569 = vector.shape_cast %568 : vector<2xf32> to vector<2x1xf32>
    %570 = vector.extract_strided_slice %3 {offsets = [0, 0], sizes = [1, 1], strides = [1, 1]} : vector<4x1xf32> to vector<1x1xf32>
    %571 = vector.broadcast %570 : vector<1x1xf32> to vector<2x1xf32>
    %572 = arith.mulf %571, %517 : vector<2x1xf32>
    %573 = arith.addf %554, %572 : vector<2x1xf32>
    %574 = vector.extract_strided_slice %4 {offsets = [0, 0], sizes = [1, 1], strides = [1, 1]} : vector<4x1xf32> to vector<1x1xf32>
    %575 = vector.broadcast %574 : vector<1x1xf32> to vector<2x1xf32>
    %576 = arith.addf %573, %575 : vector<2x1xf32>
    %577 = arith.negf %576 : vector<2x1xf32>
    %578 = math.exp %577 : vector<2x1xf32>
    %cst_77 = arith.constant 1.000000e+00 : f32
    %579 = vector.broadcast %cst_77 : f32 to vector<2x1xf32>
    %580 = arith.addf %579, %578 : vector<2x1xf32>
    %581 = arith.divf %579, %580 : vector<2x1xf32>
    %582 = vector.extract_strided_slice %3 {offsets = [1, 0], sizes = [1, 1], strides = [1, 1]} : vector<4x1xf32> to vector<1x1xf32>
    %583 = vector.broadcast %582 : vector<1x1xf32> to vector<2x1xf32>
    %584 = arith.mulf %583, %517 : vector<2x1xf32>
    %585 = arith.addf %559, %584 : vector<2x1xf32>
    %586 = vector.extract_strided_slice %4 {offsets = [1, 0], sizes = [1, 1], strides = [1, 1]} : vector<4x1xf32> to vector<1x1xf32>
    %587 = vector.broadcast %586 : vector<1x1xf32> to vector<2x1xf32>
    %588 = arith.addf %585, %587 : vector<2x1xf32>
    %589 = arith.negf %588 : vector<2x1xf32>
    %590 = math.exp %589 : vector<2x1xf32>
    %cst_78 = arith.constant 1.000000e+00 : f32
    %591 = vector.broadcast %cst_78 : f32 to vector<2x1xf32>
    %592 = arith.addf %591, %590 : vector<2x1xf32>
    %593 = arith.divf %591, %592 : vector<2x1xf32>
    %594 = vector.extract_strided_slice %3 {offsets = [2, 0], sizes = [1, 1], strides = [1, 1]} : vector<4x1xf32> to vector<1x1xf32>
    %595 = vector.broadcast %594 : vector<1x1xf32> to vector<2x1xf32>
    %596 = arith.mulf %595, %517 : vector<2x1xf32>
    %597 = arith.addf %564, %596 : vector<2x1xf32>
    %598 = vector.extract_strided_slice %4 {offsets = [2, 0], sizes = [1, 1], strides = [1, 1]} : vector<4x1xf32> to vector<1x1xf32>
    %599 = vector.broadcast %598 : vector<1x1xf32> to vector<2x1xf32>
    %600 = arith.addf %597, %599 : vector<2x1xf32>
    %601 = math.tanh %600 : vector<2x1xf32>
    %602 = vector.extract_strided_slice %3 {offsets = [3, 0], sizes = [1, 1], strides = [1, 1]} : vector<4x1xf32> to vector<1x1xf32>
    %603 = vector.broadcast %602 : vector<1x1xf32> to vector<2x1xf32>
    %604 = arith.mulf %603, %517 : vector<2x1xf32>
    %605 = arith.addf %569, %604 : vector<2x1xf32>
    %606 = vector.extract_strided_slice %4 {offsets = [3, 0], sizes = [1, 1], strides = [1, 1]} : vector<4x1xf32> to vector<1x1xf32>
    %607 = vector.broadcast %606 : vector<1x1xf32> to vector<2x1xf32>
    %608 = arith.addf %605, %607 : vector<2x1xf32>
    %609 = arith.negf %608 : vector<2x1xf32>
    %610 = math.exp %609 : vector<2x1xf32>
    %cst_79 = arith.constant 1.000000e+00 : f32
    %611 = vector.broadcast %cst_79 : f32 to vector<2x1xf32>
    %612 = arith.addf %611, %610 : vector<2x1xf32>
    %613 = arith.divf %611, %612 : vector<2x1xf32>
    %614 = arith.mulf %593, %515 : vector<2x1xf32>
    %615 = arith.mulf %581, %601 : vector<2x1xf32>
    %616 = arith.addf %614, %615 : vector<2x1xf32>
    %617 = math.tanh %616 : vector<2x1xf32>
    %618 = arith.mulf %613, %617 : vector<2x1xf32>
    %619 = vector.extract_strided_slice %5 {offsets = [0, 6], sizes = [2, 1], strides = [1, 1]} : vector<2x8xf32> to vector<2x1xf32>
    %620 = vector.shape_cast %619 : vector<2x1xf32> to vector<2x1xf32>
    %621 = vector.broadcast %620 : vector<2x1xf32> to vector<2x128xf32>
    %622 = arith.select %8, %621, %549 : vector<2x128xi1>, vector<2x128xf32>
    %cst_80 = arith.constant dense<0.000000e+00> : vector<2x512xf32>
    %623 = tpu.matmul %622, %0, %cst_80 {dimension_numbers = #tpu.dot_dimension_numbers<[1], [0], [0], [1], [0, 0, 1, 1], [], []>} : vector<2x128xf32>, vector<128x512xf32>, vector<2x512xf32> -> vector<2x512xf32>
    %624 = vector.broadcast %1 : vector<1x512xf32> to vector<2x512xf32>
    %625 = arith.addf %623, %624 : vector<2x512xf32>
    %626 = vector.extract_strided_slice %625 {offsets = [0, 0], sizes = [2, 128], strides = [1, 1]} : vector<2x512xf32> to vector<2x128xf32>
    %627 = arith.negf %626 : vector<2x128xf32>
    %628 = math.exp %627 : vector<2x128xf32>
    %cst_81 = arith.constant 1.000000e+00 : f32
    %629 = vector.broadcast %cst_81 : f32 to vector<2x128xf32>
    %630 = arith.addf %629, %628 : vector<2x128xf32>
    %631 = arith.divf %629, %630 : vector<2x128xf32>
    %632 = vector.extract_strided_slice %625 {offsets = [0, 128], sizes = [2, 128], strides = [1, 1]} : vector<2x512xf32> to vector<2x128xf32>
    %633 = arith.negf %632 : vector<2x128xf32>
    %634 = math.exp %633 : vector<2x128xf32>
    %cst_82 = arith.constant 1.000000e+00 : f32
    %635 = vector.broadcast %cst_82 : f32 to vector<2x128xf32>
    %636 = arith.addf %635, %634 : vector<2x128xf32>
    %637 = arith.divf %635, %636 : vector<2x128xf32>
    %638 = vector.extract_strided_slice %625 {offsets = [0, 256], sizes = [2, 128], strides = [1, 1]} : vector<2x512xf32> to vector<2x128xf32>
    %639 = math.tanh %638 : vector<2x128xf32>
    %640 = vector.extract_strided_slice %625 {offsets = [0, 384], sizes = [2, 128], strides = [1, 1]} : vector<2x512xf32> to vector<2x128xf32>
    %641 = arith.negf %640 : vector<2x128xf32>
    %642 = math.exp %641 : vector<2x128xf32>
    %cst_83 = arith.constant 1.000000e+00 : f32
    %643 = vector.broadcast %cst_83 : f32 to vector<2x128xf32>
    %644 = arith.addf %643, %642 : vector<2x128xf32>
    %645 = arith.divf %643, %644 : vector<2x128xf32>
    %646 = arith.mulf %637, %547 : vector<2x128xf32>
    %647 = arith.mulf %631, %639 : vector<2x128xf32>
    %648 = arith.addf %646, %647 : vector<2x128xf32>
    %649 = math.tanh %648 : vector<2x128xf32>
    %650 = arith.mulf %645, %649 : vector<2x128xf32>
    %651 = vector.extract_strided_slice %2 {offsets = [0, 0], sizes = [1, 128], strides = [1, 1]} : vector<4x128xf32> to vector<1x128xf32>
    %652 = vector.broadcast %651 : vector<1x128xf32> to vector<2x128xf32>
    %653 = arith.mulf %650, %652 : vector<2x128xf32>
    %cst_84 = arith.constant dense<0.000000e+00> : vector<2xf32>
    %654 = vector.multi_reduction <add>, %653, %cst_84 [1] : vector<2x128xf32> to vector<2xf32>
    %655 = vector.shape_cast %654 : vector<2xf32> to vector<2x1xf32>
    %656 = vector.extract_strided_slice %2 {offsets = [1, 0], sizes = [1, 128], strides = [1, 1]} : vector<4x128xf32> to vector<1x128xf32>
    %657 = vector.broadcast %656 : vector<1x128xf32> to vector<2x128xf32>
    %658 = arith.mulf %650, %657 : vector<2x128xf32>
    %cst_85 = arith.constant dense<0.000000e+00> : vector<2xf32>
    %659 = vector.multi_reduction <add>, %658, %cst_85 [1] : vector<2x128xf32> to vector<2xf32>
    %660 = vector.shape_cast %659 : vector<2xf32> to vector<2x1xf32>
    %661 = vector.extract_strided_slice %2 {offsets = [2, 0], sizes = [1, 128], strides = [1, 1]} : vector<4x128xf32> to vector<1x128xf32>
    %662 = vector.broadcast %661 : vector<1x128xf32> to vector<2x128xf32>
    %663 = arith.mulf %650, %662 : vector<2x128xf32>
    %cst_86 = arith.constant dense<0.000000e+00> : vector<2xf32>
    %664 = vector.multi_reduction <add>, %663, %cst_86 [1] : vector<2x128xf32> to vector<2xf32>
    %665 = vector.shape_cast %664 : vector<2xf32> to vector<2x1xf32>
    %666 = vector.extract_strided_slice %2 {offsets = [3, 0], sizes = [1, 128], strides = [1, 1]} : vector<4x128xf32> to vector<1x128xf32>
    %667 = vector.broadcast %666 : vector<1x128xf32> to vector<2x128xf32>
    %668 = arith.mulf %650, %667 : vector<2x128xf32>
    %cst_87 = arith.constant dense<0.000000e+00> : vector<2xf32>
    %669 = vector.multi_reduction <add>, %668, %cst_87 [1] : vector<2x128xf32> to vector<2xf32>
    %670 = vector.shape_cast %669 : vector<2xf32> to vector<2x1xf32>
    %671 = vector.extract_strided_slice %3 {offsets = [0, 0], sizes = [1, 1], strides = [1, 1]} : vector<4x1xf32> to vector<1x1xf32>
    %672 = vector.broadcast %671 : vector<1x1xf32> to vector<2x1xf32>
    %673 = arith.mulf %672, %618 : vector<2x1xf32>
    %674 = arith.addf %655, %673 : vector<2x1xf32>
    %675 = vector.extract_strided_slice %4 {offsets = [0, 0], sizes = [1, 1], strides = [1, 1]} : vector<4x1xf32> to vector<1x1xf32>
    %676 = vector.broadcast %675 : vector<1x1xf32> to vector<2x1xf32>
    %677 = arith.addf %674, %676 : vector<2x1xf32>
    %678 = arith.negf %677 : vector<2x1xf32>
    %679 = math.exp %678 : vector<2x1xf32>
    %cst_88 = arith.constant 1.000000e+00 : f32
    %680 = vector.broadcast %cst_88 : f32 to vector<2x1xf32>
    %681 = arith.addf %680, %679 : vector<2x1xf32>
    %682 = arith.divf %680, %681 : vector<2x1xf32>
    %683 = vector.extract_strided_slice %3 {offsets = [1, 0], sizes = [1, 1], strides = [1, 1]} : vector<4x1xf32> to vector<1x1xf32>
    %684 = vector.broadcast %683 : vector<1x1xf32> to vector<2x1xf32>
    %685 = arith.mulf %684, %618 : vector<2x1xf32>
    %686 = arith.addf %660, %685 : vector<2x1xf32>
    %687 = vector.extract_strided_slice %4 {offsets = [1, 0], sizes = [1, 1], strides = [1, 1]} : vector<4x1xf32> to vector<1x1xf32>
    %688 = vector.broadcast %687 : vector<1x1xf32> to vector<2x1xf32>
    %689 = arith.addf %686, %688 : vector<2x1xf32>
    %690 = arith.negf %689 : vector<2x1xf32>
    %691 = math.exp %690 : vector<2x1xf32>
    %cst_89 = arith.constant 1.000000e+00 : f32
    %692 = vector.broadcast %cst_89 : f32 to vector<2x1xf32>
    %693 = arith.addf %692, %691 : vector<2x1xf32>
    %694 = arith.divf %692, %693 : vector<2x1xf32>
    %695 = vector.extract_strided_slice %3 {offsets = [2, 0], sizes = [1, 1], strides = [1, 1]} : vector<4x1xf32> to vector<1x1xf32>
    %696 = vector.broadcast %695 : vector<1x1xf32> to vector<2x1xf32>
    %697 = arith.mulf %696, %618 : vector<2x1xf32>
    %698 = arith.addf %665, %697 : vector<2x1xf32>
    %699 = vector.extract_strided_slice %4 {offsets = [2, 0], sizes = [1, 1], strides = [1, 1]} : vector<4x1xf32> to vector<1x1xf32>
    %700 = vector.broadcast %699 : vector<1x1xf32> to vector<2x1xf32>
    %701 = arith.addf %698, %700 : vector<2x1xf32>
    %702 = math.tanh %701 : vector<2x1xf32>
    %703 = vector.extract_strided_slice %3 {offsets = [3, 0], sizes = [1, 1], strides = [1, 1]} : vector<4x1xf32> to vector<1x1xf32>
    %704 = vector.broadcast %703 : vector<1x1xf32> to vector<2x1xf32>
    %705 = arith.mulf %704, %618 : vector<2x1xf32>
    %706 = arith.addf %670, %705 : vector<2x1xf32>
    %707 = vector.extract_strided_slice %4 {offsets = [3, 0], sizes = [1, 1], strides = [1, 1]} : vector<4x1xf32> to vector<1x1xf32>
    %708 = vector.broadcast %707 : vector<1x1xf32> to vector<2x1xf32>
    %709 = arith.addf %706, %708 : vector<2x1xf32>
    %710 = arith.negf %709 : vector<2x1xf32>
    %711 = math.exp %710 : vector<2x1xf32>
    %cst_90 = arith.constant 1.000000e+00 : f32
    %712 = vector.broadcast %cst_90 : f32 to vector<2x1xf32>
    %713 = arith.addf %712, %711 : vector<2x1xf32>
    %714 = arith.divf %712, %713 : vector<2x1xf32>
    %715 = arith.mulf %694, %616 : vector<2x1xf32>
    %716 = arith.mulf %682, %702 : vector<2x1xf32>
    %717 = arith.addf %715, %716 : vector<2x1xf32>
    %718 = math.tanh %717 : vector<2x1xf32>
    %719 = arith.mulf %714, %718 : vector<2x1xf32>
    %720 = vector.extract_strided_slice %5 {offsets = [0, 7], sizes = [2, 1], strides = [1, 1]} : vector<2x8xf32> to vector<2x1xf32>
    %721 = vector.shape_cast %720 : vector<2x1xf32> to vector<2x1xf32>
    %722 = vector.broadcast %721 : vector<2x1xf32> to vector<2x128xf32>
    %723 = arith.select %8, %722, %650 : vector<2x128xi1>, vector<2x128xf32>
    %cst_91 = arith.constant dense<0.000000e+00> : vector<2x512xf32>
    %724 = tpu.matmul %723, %0, %cst_91 {dimension_numbers = #tpu.dot_dimension_numbers<[1], [0], [0], [1], [0, 0, 1, 1], [], []>} : vector<2x128xf32>, vector<128x512xf32>, vector<2x512xf32> -> vector<2x512xf32>
    %725 = vector.broadcast %1 : vector<1x512xf32> to vector<2x512xf32>
    %726 = arith.addf %724, %725 : vector<2x512xf32>
    %727 = vector.extract_strided_slice %726 {offsets = [0, 0], sizes = [2, 128], strides = [1, 1]} : vector<2x512xf32> to vector<2x128xf32>
    %728 = arith.negf %727 : vector<2x128xf32>
    %729 = math.exp %728 : vector<2x128xf32>
    %cst_92 = arith.constant 1.000000e+00 : f32
    %730 = vector.broadcast %cst_92 : f32 to vector<2x128xf32>
    %731 = arith.addf %730, %729 : vector<2x128xf32>
    %732 = arith.divf %730, %731 : vector<2x128xf32>
    %733 = vector.extract_strided_slice %726 {offsets = [0, 128], sizes = [2, 128], strides = [1, 1]} : vector<2x512xf32> to vector<2x128xf32>
    %734 = arith.negf %733 : vector<2x128xf32>
    %735 = math.exp %734 : vector<2x128xf32>
    %cst_93 = arith.constant 1.000000e+00 : f32
    %736 = vector.broadcast %cst_93 : f32 to vector<2x128xf32>
    %737 = arith.addf %736, %735 : vector<2x128xf32>
    %738 = arith.divf %736, %737 : vector<2x128xf32>
    %739 = vector.extract_strided_slice %726 {offsets = [0, 256], sizes = [2, 128], strides = [1, 1]} : vector<2x512xf32> to vector<2x128xf32>
    %740 = math.tanh %739 : vector<2x128xf32>
    %741 = vector.extract_strided_slice %726 {offsets = [0, 384], sizes = [2, 128], strides = [1, 1]} : vector<2x512xf32> to vector<2x128xf32>
    %742 = arith.negf %741 : vector<2x128xf32>
    %743 = math.exp %742 : vector<2x128xf32>
    %cst_94 = arith.constant 1.000000e+00 : f32
    %744 = vector.broadcast %cst_94 : f32 to vector<2x128xf32>
    %745 = arith.addf %744, %743 : vector<2x128xf32>
    %746 = arith.divf %744, %745 : vector<2x128xf32>
    %747 = arith.mulf %738, %648 : vector<2x128xf32>
    %748 = arith.mulf %732, %740 : vector<2x128xf32>
    %749 = arith.addf %747, %748 : vector<2x128xf32>
    %750 = math.tanh %749 : vector<2x128xf32>
    %751 = arith.mulf %746, %750 : vector<2x128xf32>
    %752 = vector.extract_strided_slice %2 {offsets = [0, 0], sizes = [1, 128], strides = [1, 1]} : vector<4x128xf32> to vector<1x128xf32>
    %753 = vector.broadcast %752 : vector<1x128xf32> to vector<2x128xf32>
    %754 = arith.mulf %751, %753 : vector<2x128xf32>
    %cst_95 = arith.constant dense<0.000000e+00> : vector<2xf32>
    %755 = vector.multi_reduction <add>, %754, %cst_95 [1] : vector<2x128xf32> to vector<2xf32>
    %756 = vector.shape_cast %755 : vector<2xf32> to vector<2x1xf32>
    %757 = vector.extract_strided_slice %2 {offsets = [1, 0], sizes = [1, 128], strides = [1, 1]} : vector<4x128xf32> to vector<1x128xf32>
    %758 = vector.broadcast %757 : vector<1x128xf32> to vector<2x128xf32>
    %759 = arith.mulf %751, %758 : vector<2x128xf32>
    %cst_96 = arith.constant dense<0.000000e+00> : vector<2xf32>
    %760 = vector.multi_reduction <add>, %759, %cst_96 [1] : vector<2x128xf32> to vector<2xf32>
    %761 = vector.shape_cast %760 : vector<2xf32> to vector<2x1xf32>
    %762 = vector.extract_strided_slice %2 {offsets = [2, 0], sizes = [1, 128], strides = [1, 1]} : vector<4x128xf32> to vector<1x128xf32>
    %763 = vector.broadcast %762 : vector<1x128xf32> to vector<2x128xf32>
    %764 = arith.mulf %751, %763 : vector<2x128xf32>
    %cst_97 = arith.constant dense<0.000000e+00> : vector<2xf32>
    %765 = vector.multi_reduction <add>, %764, %cst_97 [1] : vector<2x128xf32> to vector<2xf32>
    %766 = vector.shape_cast %765 : vector<2xf32> to vector<2x1xf32>
    %767 = vector.extract_strided_slice %2 {offsets = [3, 0], sizes = [1, 128], strides = [1, 1]} : vector<4x128xf32> to vector<1x128xf32>
    %768 = vector.broadcast %767 : vector<1x128xf32> to vector<2x128xf32>
    %769 = arith.mulf %751, %768 : vector<2x128xf32>
    %cst_98 = arith.constant dense<0.000000e+00> : vector<2xf32>
    %770 = vector.multi_reduction <add>, %769, %cst_98 [1] : vector<2x128xf32> to vector<2xf32>
    %771 = vector.shape_cast %770 : vector<2xf32> to vector<2x1xf32>
    %772 = vector.extract_strided_slice %3 {offsets = [0, 0], sizes = [1, 1], strides = [1, 1]} : vector<4x1xf32> to vector<1x1xf32>
    %773 = vector.broadcast %772 : vector<1x1xf32> to vector<2x1xf32>
    %774 = arith.mulf %773, %719 : vector<2x1xf32>
    %775 = arith.addf %756, %774 : vector<2x1xf32>
    %776 = vector.extract_strided_slice %4 {offsets = [0, 0], sizes = [1, 1], strides = [1, 1]} : vector<4x1xf32> to vector<1x1xf32>
    %777 = vector.broadcast %776 : vector<1x1xf32> to vector<2x1xf32>
    %778 = arith.addf %775, %777 : vector<2x1xf32>
    %779 = arith.negf %778 : vector<2x1xf32>
    %780 = math.exp %779 : vector<2x1xf32>
    %cst_99 = arith.constant 1.000000e+00 : f32
    %781 = vector.broadcast %cst_99 : f32 to vector<2x1xf32>
    %782 = arith.addf %781, %780 : vector<2x1xf32>
    %783 = arith.divf %781, %782 : vector<2x1xf32>
    %784 = vector.extract_strided_slice %3 {offsets = [1, 0], sizes = [1, 1], strides = [1, 1]} : vector<4x1xf32> to vector<1x1xf32>
    %785 = vector.broadcast %784 : vector<1x1xf32> to vector<2x1xf32>
    %786 = arith.mulf %785, %719 : vector<2x1xf32>
    %787 = arith.addf %761, %786 : vector<2x1xf32>
    %788 = vector.extract_strided_slice %4 {offsets = [1, 0], sizes = [1, 1], strides = [1, 1]} : vector<4x1xf32> to vector<1x1xf32>
    %789 = vector.broadcast %788 : vector<1x1xf32> to vector<2x1xf32>
    %790 = arith.addf %787, %789 : vector<2x1xf32>
    %791 = arith.negf %790 : vector<2x1xf32>
    %792 = math.exp %791 : vector<2x1xf32>
    %cst_100 = arith.constant 1.000000e+00 : f32
    %793 = vector.broadcast %cst_100 : f32 to vector<2x1xf32>
    %794 = arith.addf %793, %792 : vector<2x1xf32>
    %795 = arith.divf %793, %794 : vector<2x1xf32>
    %796 = vector.extract_strided_slice %3 {offsets = [2, 0], sizes = [1, 1], strides = [1, 1]} : vector<4x1xf32> to vector<1x1xf32>
    %797 = vector.broadcast %796 : vector<1x1xf32> to vector<2x1xf32>
    %798 = arith.mulf %797, %719 : vector<2x1xf32>
    %799 = arith.addf %766, %798 : vector<2x1xf32>
    %800 = vector.extract_strided_slice %4 {offsets = [2, 0], sizes = [1, 1], strides = [1, 1]} : vector<4x1xf32> to vector<1x1xf32>
    %801 = vector.broadcast %800 : vector<1x1xf32> to vector<2x1xf32>
    %802 = arith.addf %799, %801 : vector<2x1xf32>
    %803 = math.tanh %802 : vector<2x1xf32>
    %804 = vector.extract_strided_slice %3 {offsets = [3, 0], sizes = [1, 1], strides = [1, 1]} : vector<4x1xf32> to vector<1x1xf32>
    %805 = vector.broadcast %804 : vector<1x1xf32> to vector<2x1xf32>
    %806 = arith.mulf %805, %719 : vector<2x1xf32>
    %807 = arith.addf %771, %806 : vector<2x1xf32>
    %808 = vector.extract_strided_slice %4 {offsets = [3, 0], sizes = [1, 1], strides = [1, 1]} : vector<4x1xf32> to vector<1x1xf32>
    %809 = vector.broadcast %808 : vector<1x1xf32> to vector<2x1xf32>
    %810 = arith.addf %807, %809 : vector<2x1xf32>
    %811 = arith.negf %810 : vector<2x1xf32>
    %812 = math.exp %811 : vector<2x1xf32>
    %cst_101 = arith.constant 1.000000e+00 : f32
    %813 = vector.broadcast %cst_101 : f32 to vector<2x1xf32>
    %814 = arith.addf %813, %812 : vector<2x1xf32>
    %815 = arith.divf %813, %814 : vector<2x1xf32>
    %816 = arith.mulf %795, %717 : vector<2x1xf32>
    %817 = arith.mulf %783, %803 : vector<2x1xf32>
    %818 = arith.addf %816, %817 : vector<2x1xf32>
    %819 = math.tanh %818 : vector<2x1xf32>
    %820 = arith.mulf %815, %819 : vector<2x1xf32>
    %821 = tpu.concatenate %113, %214, %315, %416, %517, %618, %719, %820 in 1 : vector<2x1xf32>, vector<2x1xf32>, vector<2x1xf32>, vector<2x1xf32>, vector<2x1xf32>, vector<2x1xf32>, vector<2x1xf32>, vector<2x1xf32> -> vector<2x8xf32>
    %c0_102 = arith.constant 0 : index
    %c0_103 = arith.constant 0 : index
    %822 = vector.load %arg6[%c0_102, %c0_103] : memref<2x8xf32, #tpu.memory_space<vmem>>, vector<2x8xf32>
    tpu.vector_store %arg6[%c0_102, %c0_103], %821 {strides = array<i32>} : memref<2x8xf32, #tpu.memory_space<vmem>>, vector<2x8xf32>,
    return
  }
}

</mosaic_0001>

<bundles_post_ra>
// kernel: tpu_custom_call.1
= control target key start
LH: loop header
LB: loop body
LE: loop exit
PB: predicated region body
PF: predicated region fallthrough
CT: control target
= control target key end

     0   :  { %11 = vsyncpa [#allocation3], 0  ;;  %s3673_s0 = inlined_call_operand.vmem [shape: f32[2,8], index: 0, kind: input, shape index: {}]   ;;  %s3674_s1 = inlined_call_operand.hbm [shape: f32[128,512], index: 1, kind: input, shape index: {}]   ;;  %s3675_s2 = inlined_call_operand.vmem [shape: f32[1,512], index: 2, kind: input, shape index: {}]   ;;  %s3676_s3 = inlined_call_operand.vmem [shape: f32[4,128], index: 3, kind: input, shape index: {}]   ;;  %s3677_s4 = inlined_call_operand.vmem [shape: f32[4,1], index: 4, kind: input, shape index: {}]   ;;  %s3678_s5 = inlined_call_operand.vmem [shape: f32[4,1], index: 5, kind: input, shape index: {}]   ;;  %s3679_s6 = inlined_call_operand.hbm [shape: f32[2,8], index: 6, kind: output, shape index: {}]  }
   0x1   :  { %12 = vsyncpa [#allocation4], 0  ;;  %s2918_s21 = smov [#allocation2]   ;;  %s2870_s25 = scalar_lea.hbm %s3674_s1, 8192 }
   0x2   :  { %s20_s22 = sshll.u32 %s2918_s21, 4  ;;  %p2871_p0 = scmp.ne.s32.totalorder %s3674_s1, %s2870_s25  ;;  %s21_s22 = int_to_ptr.vmem [resolvable:$true] %s20_s22 }
   0x3   :  { %p2874_p1 = scmp.lt.u32.totalorder %s2870_s25, %s3674_s1 }
   0x5   :  { %p2876_p2 = pnand %p2874_p1, %p2871_p0 }
   0x7   :  { %2879 = shalt.err (!%p2876_p2)
}
   0x8   :  { %s2880_s30 = scalar_lea.vmem %s21_s22, 8192  ;;  %p2885_p4 = scmp.lt.s32.totalorder %s21_s22, %s21_s22 }
   0x9   :  { %p2881_p3 = scmp.ne.s32.totalorder %s21_s22, %s2880_s30  ;;  %p2886_p5 = scmp.lt.s32.totalorder %s2880_s30, %s2880_s30 }
   0xb   :  { %p2887_p6 = por %p2886_p5, %p2885_p4 }
   0xd   :  { %p2888_p7 = pnand %p2887_p6, %p2881_p3 }
   0xf   :  { %2891 = shalt.err (!%p2888_p7)
}
  0x10   :  { %s2919_s7 = smov 512   ;;  %s2920_s8 = smov 32  }
  0x11   :  { %26 = dma.hbm_to_vmem [thread:$0]  %s3674_s1, 8192, %s21_s22, [#allocation3], %s2919_s7, %s2919_s7, %s2920_s8  }
  0x12   :  { %2914 = dma.done.wait [#allocation3], 8192  }
  0x13   :  { %2915 = vsyncadd [#allocation3], 4294959104  ;;  %v2921_v0 = vmov 0   ;;  %v2922_v1 = vmov 0.0   ;;  %v2990_v2 = vld [vmem:[%s3673_s0] sm:$0x3] }
  0x14   :  { %2606 = vset.pattern.permute.xlu0 %v2921_v0  ;;  %201 = vmatprep.mubr.f32.mxu0 %v2922_v1  ;;  %v39_v3 = vld [vmem:[#allocation2 + $0x8] sm:$0xff]  ;;  %v41_v6 = vld [vmem:[#allocation2 + $0x18] sm:$0xff]  ;;  %v38_v8 = vld [vmem:[#allocation2] sm:$0xff]  ;;  %v2923_v13 = vmov 2   ;;  %v2924_v32 = vmov 1   ;;  %vm308_vm1 = vcmask 1041408  }
  0x15   :  { %272 = vmatprep.mubr.f32.mxu1 %v2922_v1  ;;  %v43_v4 = vld [vmem:[#allocation2 + $0x28] sm:$0xff]  ;;  %112 = vperm.xlu0 %2606, %v2990_v2   ;;  %v45_v7 = vld [vmem:[#allocation2 + $0x38] sm:$0xff]  ;;  %v42_v10 = vld [vmem:[#allocation2 + $0x20] sm:$0xff]  ;;  %s2932_s17 = smov 1   ;;  %s2933_s18 = smov 5   ;;  %vm1993_vm2 = vcmask 7168  }
  0x16   :  { %v2993_v5 = vpack.c.bf16 %v43_v4, %v39_v3  ;;  %v2995_v9 = vpack.c.bf16 %v45_v7, %v41_v6  ;;  %v40_v11 = vld [vmem:[#allocation2 + $0x10] sm:$0xff]  ;;  %2608 = vset.pattern.permute.xlu1 %v2923_v13  ;;  %v2998_v14 = vpack.c.bf16 %v42_v10, %v38_v8  ;;  %v47_v16 = vld [vmem:[#allocation2 + $0x48] sm:$0xff]  ;;  %v49_v18 = vld [vmem:[#allocation2 + $0x58] sm:$0xff]  ;;  %s2934_s19 = smov 4   ;;  %s2935_s20 = smov 6   ;;  %vm1995_vm3 = vcmask 15360  }
  0x17   :  { %v44_v12 = vld [vmem:[#allocation2 + $0x30] sm:$0xff]  ;;  %v51_v17 = vld [vmem:[#allocation2 + $0x68] sm:$0xff]  ;;  %628 = vperm.xlu1 %2608, %v2990_v2   ;;  %v53_v20 = vld [vmem:[#allocation2 + $0x78] sm:$0xff]  ;;  %s2936_s21 = smov 7   ;;  %vm1997_vm4 = vcmask 23552   ;;  %vm1999_vm5 = vcmask 31744  }
  0x18   :  { %2075 = vmatprep.subr.bf16.mxu0 %v2993_v5  ;;  %v3000_v15 = vpack.c.bf16 %v44_v12, %v40_v11  ;;  %2107 = vmatprep.subr.bf16.mxu1 %v2995_v9  ;;  %v3004_v19 = vpack.c.bf16 %v51_v17, %v47_v16  ;;  %v46_v21 = vld [vmem:[#allocation2 + $0x40] sm:$0xff]  ;;  %v3008_v23 = vpack.c.bf16 %v53_v20, %v49_v18  ;;  %v48_v25 = vld [vmem:[#allocation2 + $0x50] sm:$0xff]  ;;  %v55_v27 = vld [vmem:[#allocation2 + $0x88] sm:$0xff]  ;;  %vm2001_vm6 = vcmask 39936   ;;  %s2937_s22 = smov [#allocation5]  }
  0x19   :  { %v50_v22 = vld [vmem:[#allocation2 + $0x60] sm:$0xff]  ;;  %2077 = vmatpush1.bf16.msra.mxu0 %v2998_v14  ;;  %v52_v26 = vld [vmem:[#allocation2 + $0x70] sm:$0xff]  ;;  %v59_v29 = vld [vmem:[#allocation2 + $0xa8] sm:$0xff]  ;;  %2607 = vset.pattern.permute.xlu0 %v2924_v32  ;;  %vm2003_vm7 = vcmask 48128   ;;  %s2015_s23 = sshll.u32 %s2937_s22, 4  ;;  %vm2005_vm8 = vcmask 56320   ;;  %s2016_s23 = int_to_ptr.vmem [resolvable:$true] %s2015_s23 }
  0x1a   :  { %2109 = vmatpush1.bf16.msra.mxu1 %v3000_v15  ;;  %v3010_v24 = vpack.c.bf16 %v50_v22, %v46_v21  ;;  %2079 = vmatprep.subr.bf16.mxu0 %v3004_v19  ;;  %v3013_v28 = vpack.c.bf16 %v52_v26, %v48_v25  ;;  %v57_v30 = vld [vmem:[#allocation2 + $0x98] sm:$0xff]  ;;  %v3016_v33 = vpack.c.bf16 %v59_v29, %v55_v27  ;;  %v54_v35 = vld [vmem:[#allocation2 + $0x80] sm:$0xff]  ;;  %v56_v37 = vld [vmem:[#allocation2 + $0x90] sm:$0xff]  ;;  %vm2007_vm9 = vcmask 58368   ;;  %s2892_s24 = scalar_lea.vmem %s2016_s23, 32  ;;  %p2897_p9 = scmp.lt.s32.totalorder %s2016_s23, %s2016_s23 }
  0x1b   :  { %v61_v31 = vld [vmem:[#allocation2 + $0xb8] sm:$0xff]  ;;  %2111 = vmatprep.subr.bf16.mxu1 %v3008_v23  ;;  %v58_v36 = vld [vmem:[#allocation2 + $0xa0] sm:$0xff]  ;;  %405 = vperm.xlu0 %2607, %v2990_v2   ;;  %v60_v38 = vld [vmem:[#allocation2 + $0xb0] sm:$0xff]  ;;  %p2893_p8 = scmp.ne.s32.totalorder %s2016_s23, %s2892_s24  ;;  %p2898_p10 = scmp.lt.s32.totalorder %s2892_s24, %s2892_s24 }
  0x1c   :  { %v3018_v34 = vpack.c.bf16 %v61_v31, %v57_v30  ;;  %v63_v39 = vld [vmem:[#allocation2 + $0xc8] sm:$0xff]  ;;  %v3023_v41 = vpack.c.bf16 %v58_v36, %v54_v35  ;;  %v3025_v42 = vpack.c.bf16 %v60_v38, %v56_v37  ;;  %v65_v43 = vld [vmem:[#allocation2 + $0xd8] sm:$0xff]  ;;  %v62_v45 = vld [vmem:[#allocation2 + $0xc0] sm:$0xff] }
  0x1d   :  { %v67_v40 = vld [vmem:[#allocation2 + $0xe8] sm:$0xff]  ;;  %2081 = vmatpush1.bf16.msra.mxu0 %v3010_v24  ;;  %v69_v44 = vld [vmem:[#allocation2 + $0xf8] sm:$0xff]  ;;  %v66_v48 = vld [vmem:[#allocation2 + $0xe0] sm:$0xff]  ;;  %p2899_p11 = por %p2898_p10, %p2897_p9 }
  0x1e   :  { %2113 = vmatpush1.bf16.msra.mxu1 %v3013_v28  ;;  %2083 = vmatprep.subr.bf16.mxu0 %v3016_v33  ;;  %v3029_v46 = vpack.c.bf16 %v67_v40, %v63_v39  ;;  %v3031_v47 = vpack.c.bf16 %v69_v44, %v65_v43  ;;  %v64_v49 = vld [vmem:[#allocation2 + $0xd0] sm:$0xff]  ;;  %v71_v51 = vld [vmem:[#allocation2 + $0x108] sm:$0xff]  ;;  %v73_v53 = vld [vmem:[#allocation2 + $0x118] sm:$0xff]  ;;  %v3035_v55 = vpack.c.bf16 %v66_v48, %v62_v45 }
  0x1f   :  { %2115 = vmatprep.subr.bf16.mxu1 %v3018_v34  ;;  %v68_v50 = vld [vmem:[#allocation2 + $0xf0] sm:$0xff]  ;;  %v75_v52 = vld [vmem:[#allocation2 + $0x128] sm:$0xff]  ;;  %v77_v54 = vld [vmem:[#allocation2 + $0x138] sm:$0xff]  ;;  %p2900_p12 = pnand %p2899_p11, %p2893_p8 }
  0x20   :  { %v3037_v56 = vpack.c.bf16 %v68_v50, %v64_v49  ;;  %v70_v57 = vld [vmem:[#allocation2 + $0x100] sm:$0xff]  ;;  %v3041_v59 = vpack.c.bf16 %v75_v52, %v71_v51  ;;  %v3043_v60 = vpack.c.bf16 %v77_v54, %v73_v53  ;;  %v72_v61 = vld [vmem:[#allocation2 + $0x110] sm:$0xff]  ;;  %v79_v63 = vld [vmem:[#allocation2 + $0x148] sm:$0xff]  ;;  %v107_v53 = vlaneseq }
  0x21   :  { %2085 = vmatpush1.bf16.msra.mxu0 %v3023_v41  ;;  %v74_v58 = vld [vmem:[#allocation2 + $0x120] sm:$0xff]  ;;  %v76_v62 = vld [vmem:[#allocation2 + $0x130] sm:$0xff]  ;;  %v83_v0 = vld [vmem:[#allocation2 + $0x168] sm:$0xff] }
  0x22   :  { %2117 = vmatpush1.bf16.msra.mxu1 %v3025_v42  ;;  %2087 = vmatprep.subr.bf16.mxu0 %v3029_v46  ;;  %v81_v3 = vld [vmem:[#allocation2 + $0x158] sm:$0xff]  ;;  %v3047_v6 = vpack.c.bf16 %v74_v58, %v70_v57  ;;  %v3049_v7 = vpack.c.bf16 %v76_v62, %v72_v61  ;;  %v78_v8 = vld [vmem:[#allocation2 + $0x140] sm:$0xff]  ;;  %v3053_v11 = vpack.c.bf16 %v83_v0, %v79_v63  ;;  %v80_v13 = vld [vmem:[#allocation2 + $0x150] sm:$0xff]  ;;  %v3093_v54 = vand.u32 127, %v107_v53 }
  0x23   :  { %2119 = vmatprep.subr.bf16.mxu1 %v3031_v47  ;;  %v85_v4 = vld [vmem:[#allocation2 + $0x178] sm:$0xff]  ;;  %v82_v10 = vld [vmem:[#allocation2 + $0x160] sm:$0xff]  ;;  %v84_v16 = vld [vmem:[#allocation2 + $0x170] sm:$0xff]  ;;  %v2925_v58 = vmov 3   ;;  %v2926_v61 = vmov 4   ;;  %v2927_v62 = vmov 6  }
  0x24   :  { %v3055_v12 = vpack.c.bf16 %v85_v4, %v81_v3  ;;  %v87_v17 = vld [vmem:[#allocation2 + $0x188] sm:$0xff]  ;;  %v89_v20 = vld [vmem:[#allocation2 + $0x198] sm:$0xff]  ;;  %v3059_v22 = vpack.c.bf16 %v82_v10, %v78_v8  ;;  %v3061_v25 = vpack.c.bf16 %v84_v16, %v80_v13  ;;  %v86_v26 = vld [vmem:[#allocation2 + $0x180] sm:$0xff]  ;;  %vm109_vm0 = vcmp.eq.s32.totalorder %v3093_v54, 127  ;;  %2609 = vset.pattern.permute.xlu1 %v2925_v58 }
  0x25   :  { %2089 = vmatpush1.bf16.msra.mxu0 %v3035_v55  ;;  %v91_v18 = vld [vmem:[#allocation2 + $0x1a8] sm:$0xff]  ;;  %v93_v21 = vld [vmem:[#allocation2 + $0x1b8] sm:$0xff]  ;;  %v90_v27 = vld [vmem:[#allocation2 + $0x1a0] sm:$0xff]  ;;  %851 = vperm.xlu1 %2609, %v2990_v2   ;;  %v2928_v63 = vmov 5   ;;  %v118_v0 = vshrl.u32 %v107_v53, 7 }
  0x26   :  { %2121 = vmatpush1.bf16.msra.mxu1 %v3037_v56  ;;  %2091 = vmatprep.subr.bf16.mxu0 %v3041_v59  ;;  %v3065_v29 = vpack.c.bf16 %v91_v18, %v87_v17  ;;  %v3067_v30 = vpack.c.bf16 %v93_v21, %v89_v20  ;;  %v88_v31 = vld [vmem:[#allocation2 + $0x190] sm:$0xff]  ;;  %v95_v35 = vld [vmem:[#allocation2 + $0x1c8] sm:$0xff]  ;;  %v97_v37 = vld [vmem:[#allocation2 + $0x1d8] sm:$0xff]  ;;  %v3071_v39 = vpack.c.bf16 %v90_v27, %v86_v26 }
  0x27   :  { %2123 = vmatprep.subr.bf16.mxu1 %v3043_v60  ;;  %v92_v32 = vld [vmem:[#allocation2 + $0x1b0] sm:$0xff]  ;;  %v99_v36 = vld [vmem:[#allocation2 + $0x1e8] sm:$0xff]  ;;  %v101_v38 = vld [vmem:[#allocation2 + $0x1f8] sm:$0xff]  ;;  %2611 = vset.pattern.permute.xlu0 %v2928_v63  ;;  %v3138_v3 = vsub.s32 0, %v118_v0  ;;  %v3140_v4 = vsub.s32 1, %v118_v0  ;;  %v3151_v16 = vsub.s32 3, %v118_v0 }
  0x28   :  { %v3073_v40 = vpack.c.bf16 %v92_v32, %v88_v31  ;;  %v94_v43 = vld [vmem:[#allocation2 + $0x1c0] sm:$0xff]  ;;  %v3077_v44 = vpack.c.bf16 %v99_v36, %v95_v35  ;;  %v3079_v45 = vpack.c.bf16 %v101_v38, %v97_v37  ;;  %v96_v49 = vld [vmem:[#allocation2 + $0x1d0] sm:$0xff]  ;;  %1297 = vperm.xlu0 %2611, %v2990_v2   ;;  %v3158_v36 = vsub.s32 2, %v118_v0 }
  0x29   :  { %2093 = vmatpush1.bf16.msra.mxu0 %v3047_v6  ;;  %v98_v48 = vld [vmem:[#allocation2 + $0x1e0] sm:$0xff]  ;;  %v100_v50 = vld [vmem:[#allocation2 + $0x1f0] sm:$0xff]  ;;  %2610 = vset.pattern.permute.xlu1 %v2926_v61 }
  0x2a   :  { %2125 = vmatpush1.bf16.msra.mxu1 %v3049_v7  ;;  %2095 = vmatprep.subr.bf16.mxu0 %v3053_v11  ;;  %v3083_v51 = vpack.c.bf16 %v98_v48, %v94_v43  ;;  %v3085_v52 = vpack.c.bf16 %v100_v50, %v96_v49  ;;  %v102_v8 = vld [vmem:[%s3675_s2] sm:$0xf] }
  0x2b   :  { %2127 = vmatprep.subr.bf16.mxu1 %v3055_v12  ;;  %1074 = vperm.xlu1 %2610, %v2990_v2   ;;  %v3146_v10 = vrot.slane %v102_v8, %v3138_v3  ;;  %v3149_v13 = vrot.slane %v102_v8, %v3140_v4  ;;  %v3156_v35 = vrot.slane %v102_v8, %v3151_v16 }
  0x2c   :  { %v3162_v38 = vrot.slane %v102_v8, %v3158_v36 }
  0x2d   :  { %2097 = vmatpush1.bf16.msra.mxu0 %v3059_v22 }
  0x2e   :  { %2129 = vmatpush1.bf16.msra.mxu1 %v3061_v25  ;;  %2099 = vmatprep.subr.bf16.mxu0 %v3065_v29 }
  0x2f   :  { %2131 = vmatprep.subr.bf16.mxu1 %v3067_v30  ;;  %2612 = vset.pattern.permute.xlu1 %v2927_v62 }
  0x30   :  { %1520 = vperm.xlu1 %2612, %v2990_v2  }
  0x31   :  { %2101 = vmatpush1.bf16.msra.mxu0 %v3071_v39 }
  0x32   :  { %2133 = vmatpush1.bf16.msra.mxu1 %v3073_v40  ;;  %2103 = vmatprep.subr.bf16.mxu0 %v3077_v44 }
  0x33   :  { %2135 = vmatprep.subr.bf16.mxu1 %v3079_v45 }
  0x35   :  { %2105 = vmatpush1.bf16.msra.mxu0 %v3083_v51 }
  0x36   :  { %2137 = vmatpush1.bf16.msra.mxu1 %v3085_v52  ;;  %2139 = vmatprep.subr.bf16.mxu0 %v2993_v5 }
  0x37   :  { %2171 = vmatprep.subr.bf16.mxu1 %v2995_v9 }
  0x94   :  { %v113_v57 = vpop.permute.xlu0 %112 }
  0x95   :  { %2024 = vmatmul.mubr.msk.f32.vlgmr.msra.gmra.mrb[0].mxu0 %vm109_vm0, %v113_v57  ;;  %2025 = vmatmul.mubr.msk.f32.vlgmr.msra.gmra.mrb[0].mxu1 %vm109_vm0, %v113_v57 }
  0x96   :  { %2141 = vmatpush1.bf16.msra.mxu0 %v2998_v14  ;;  %2173 = vmatpush1.bf16.msra.mxu1 %v3000_v15 }
  0x97   :  { %2143 = vmatprep.subr.bf16.mxu0 %v3004_v19  ;;  %2175 = vmatprep.subr.bf16.mxu1 %v3008_v23 }
  0x98   :  { %473 = vmatprep.mubr.f32.mxu0 %v2922_v1  ;;  %544 = vmatprep.mubr.f32.mxu1 %v2922_v1 }
  0x9a   :  { %2145 = vmatpush1.bf16.msra.mxu0 %v3010_v24  ;;  %2177 = vmatpush1.bf16.msra.mxu1 %v3013_v28 }
  0x9b   :  { %2147 = vmatprep.subr.bf16.mxu0 %v3016_v33  ;;  %2179 = vmatprep.subr.bf16.mxu1 %v3018_v34 }
  0x9e   :  { %2149 = vmatpush1.bf16.msra.mxu0 %v3023_v41  ;;  %2181 = vmatpush1.bf16.msra.mxu1 %v3025_v42 }
  0x9f   :  { %2151 = vmatprep.subr.bf16.mxu0 %v3029_v46  ;;  %2183 = vmatprep.subr.bf16.mxu1 %v3031_v47 }
  0xa2   :  { %2153 = vmatpush1.bf16.msra.mxu0 %v3035_v55  ;;  %2185 = vmatpush1.bf16.msra.mxu1 %v3037_v56 }
  0xa3   :  { %2155 = vmatprep.subr.bf16.mxu0 %v3041_v59  ;;  %2187 = vmatprep.subr.bf16.mxu1 %v3043_v60 }
  0xa6   :  { %2157 = vmatpush1.bf16.msra.mxu0 %v3047_v6  ;;  %2189 = vmatpush1.bf16.msra.mxu1 %v3049_v7 }
  0xa7   :  { %2159 = vmatprep.subr.bf16.mxu0 %v3053_v11  ;;  %2191 = vmatprep.subr.bf16.mxu1 %v3055_v12 }
  0xaa   :  { %2161 = vmatpush1.bf16.msra.mxu0 %v3059_v22  ;;  %2193 = vmatpush1.bf16.msra.mxu1 %v3061_v25 }
  0xab   :  { %2163 = vmatprep.subr.bf16.mxu0 %v3065_v29  ;;  %2195 = vmatprep.subr.bf16.mxu1 %v3067_v30 }
  0xae   :  { %2165 = vmatpush1.bf16.msra.mxu0 %v3071_v39  ;;  %2197 = vmatpush1.bf16.msra.mxu1 %v3073_v40 }
  0xaf   :  { %2167 = vmatprep.subr.bf16.mxu0 %v3077_v44  ;;  %2199 = vmatprep.subr.bf16.mxu1 %v3079_v45 }
  0xb2   :  { %2169 = vmatpush1.bf16.msra.mxu0 %v3083_v51  ;;  %2201 = vmatpush1.bf16.msra.mxu1 %v3085_v52 }
  0xb3   :  { %2203 = vmatprep.subr.bf16.mxu0 %v2993_v5  ;;  %2235 = vmatprep.subr.bf16.mxu1 %v2995_v9 }
 0x168   :  { %v203_v17 = vpop.f32.mrb[0].mxu0  ;;  %v274_v18 = vpop.f32.mrb[0].mxu1 }
 0x169   :  { %v204_v20 = vadd.f32 %v203_v17, %v3146_v10  ;;  %v205_v21 = vpop.f32.mrb[1].mxu0  ;;  %v276_v26 = vpop.f32.mrb[1].mxu1  ;;  %v275_v48 = vadd.f32 %v274_v18, %v3162_v38  ;;  %v103_v18 = vld [vmem:[%s3676_s3] sm:$0xf] }
 0x16a   :  { %v206_v27 = vadd.f32 %v205_v21, %v3149_v13  ;;  %v277_v37 = vadd.f32 %v276_v26, %v3156_v35  ;;  %v3172_v26 = vrot.slane %v103_v18, %v3140_v4 }
 0x16b   :  { %v2026_v31 = vmul.f32 -1.442695, %v204_v20 }
 0x16c   :  { %v2027_v32 = vmul.f32 -1.442695, %v206_v27  ;;  %v2028_v43 = vmul.f32 -1.442695, %v277_v37  ;;  %v3175_v27 = vrot.slane %v103_v18, %v3138_v3 }
 0x16d   :  { %2614 = vpow2.f32 %v2026_v31 }
 0x16e   :  { %2616 = vpow2.f32 %v2027_v32  ;;  %v406_v32 = vpop.permute.xlu0 %405 }
 0x16f   :  { %2618 = vpow2.f32 %v2028_v43  ;;  %v3178_v43 = vrot.slane %v103_v18, %v3158_v36 }
 0x170   :  { %2620 = vtanh.f32 %v275_v48  ;;  %v3181_v48 = vrot.slane %v103_v18, %v3151_v16 }
 0x177   :  { %v2615_v49 = vpop.eup %2614 }
 0x178   :  { %v2617_v50 = vpop.eup %2616  ;;  %v282_v53 = vadd.f32 1.0, %v2615_v49 }
 0x179   :  { %v288_v57 = vadd.f32 1.0, %v2617_v50  ;;  %v2619_v58 = vpop.eup %2618 }
 0x17a   :  { %2622 = vrcp.f32 %v282_v53  ;;  %v2621_v61 = vpop.eup %2620  ;;  %v295_v17 = vadd.f32 1.0, %v2619_v58 }
 0x17b   :  { %2624 = vrcp.f32 %v288_v57 }
 0x17c   :  { %2626 = vrcp.f32 %v295_v17 }
 0x184   :  { %v2623_v62 = vpop.eup %2622 }
 0x185   :  { %v2625_v63 = vpop.eup %2624  ;;  %v299_v0 = vmul.f32 %v2623_v62, %v2621_v61 }
 0x186   :  { %v298_v20 = vmul.f32 0.0, %v2625_v63  ;;  %v2627_v21 = vpop.eup %2626 }
 0x188   :  { %v3165_v8 = vadd.f32 %v299_v0, %v298_v20 }
 0x18a   :  { %2628 = vtanh.f32 %v3165_v8 }
 0x194   :  { %v2629_v31 = vpop.eup %2628 }
 0x195   :  { %v302_v37 = vmul.f32 %v2629_v31, %v2627_v21 }
 0x197   :  { %v408_v49 = vsel %vm109_vm0, %v406_v32, %v302_v37  ;;  %v316_v50 = vmul.f32 %v3172_v26, %v302_v37  ;;  %v307_v53 = vmul.f32 %v3175_v27, %v302_v37  ;;  %v324_v61 = vmul.f32 %v3178_v43, %v302_v37 }
 0x198   :  { %474 = vmatmul.mubr.f32.vlgmr.msra.gmra.mrb[2].mxu0 %v408_v49  ;;  %545 = vmatmul.mubr.f32.vlgmr.msra.gmra.mrb[2].mxu1 %v408_v49  ;;  %v332_v62 = vmul.f32 %v3181_v48, %v302_v37 }
 0x199   :  { %v317_v57 = vsel %vm308_vm1, %v316_v50, 0.0  ;;  %v309_v58 = vsel %vm308_vm1, %v307_v53, 0.0  ;;  %2205 = vmatpush1.bf16.msra.mxu0 %v2998_v14  ;;  %2237 = vmatpush1.bf16.msra.mxu1 %v3000_v15  ;;  %v325_v63 = vsel %vm308_vm1, %v324_v61, 0.0 }
 0x19a   :  { %318 = vadd.xlane.f32.xlu0 %v317_v57  ;;  %310 = vadd.xlane.f32.xlu1 %v309_v58  ;;  %v333_v0 = vsel %vm308_vm1, %v332_v62, 0.0 }
 0x19b   :  { %2207 = vmatprep.subr.bf16.mxu0 %v3004_v19  ;;  %2239 = vmatprep.subr.bf16.mxu1 %v3008_v23 }
 0x19c   :  { %696 = vmatprep.mubr.f32.mxu0 %v2922_v1  ;;  %767 = vmatprep.mubr.f32.mxu1 %v2922_v1 }
 0x19d   :  { %2209 = vmatpush1.bf16.msra.mxu0 %v3010_v24  ;;  %2241 = vmatpush1.bf16.msra.mxu1 %v3013_v28 }
 0x19e   :  { %326 = vadd.xlane.f32.xlu0 %v325_v63  ;;  %334 = vadd.xlane.f32.xlu1 %v333_v0 }
 0x19f   :  { %2211 = vmatprep.subr.bf16.mxu0 %v3016_v33  ;;  %2243 = vmatprep.subr.bf16.mxu1 %v3018_v34 }
 0x1a1   :  { %2213 = vmatpush1.bf16.msra.mxu0 %v3023_v41  ;;  %2245 = vmatpush1.bf16.msra.mxu1 %v3025_v42 }
 0x1a2   :  { %2215 = vmatprep.subr.bf16.mxu0 %v3029_v46  ;;  %2247 = vmatprep.subr.bf16.mxu1 %v3031_v47 }
 0x1a5   :  { %2217 = vmatpush1.bf16.msra.mxu0 %v3035_v55  ;;  %2249 = vmatpush1.bf16.msra.mxu1 %v3037_v56 }
 0x1a6   :  { %2219 = vmatprep.subr.bf16.mxu0 %v3041_v59  ;;  %2251 = vmatprep.subr.bf16.mxu1 %v3043_v60 }
 0x1a9   :  { %2221 = vmatpush1.bf16.msra.mxu0 %v3047_v6  ;;  %2253 = vmatpush1.bf16.msra.mxu1 %v3049_v7 }
 0x1aa   :  { %2223 = vmatprep.subr.bf16.mxu0 %v3053_v11  ;;  %2255 = vmatprep.subr.bf16.mxu1 %v3055_v12 }
 0x1ad   :  { %2225 = vmatpush1.bf16.msra.mxu0 %v3059_v22  ;;  %2257 = vmatpush1.bf16.msra.mxu1 %v3061_v25 }
 0x1ae   :  { %2227 = vmatprep.subr.bf16.mxu0 %v3065_v29  ;;  %2259 = vmatprep.subr.bf16.mxu1 %v3067_v30 }
 0x1b1   :  { %2229 = vmatpush1.bf16.msra.mxu0 %v3071_v39  ;;  %2261 = vmatpush1.bf16.msra.mxu1 %v3073_v40 }
 0x1b2   :  { %2231 = vmatprep.subr.bf16.mxu0 %v3077_v44  ;;  %2263 = vmatprep.subr.bf16.mxu1 %v3079_v45 }
 0x1b5   :  { %2233 = vmatpush1.bf16.msra.mxu0 %v3083_v51  ;;  %2265 = vmatpush1.bf16.msra.mxu1 %v3085_v52 }
 0x1b6   :  { %2267 = vmatprep.subr.bf16.mxu0 %v2993_v5  ;;  %2299 = vmatprep.subr.bf16.mxu1 %v2995_v9 }
 0x26b   :  { %v475_v17 = vpop.f32.mrb[2].mxu0  ;;  %v546_v20 = vpop.f32.mrb[2].mxu1 }
 0x26c   :  { %v476_v18 = vadd.f32 %v475_v17, %v3146_v10  ;;  %v477_v21 = vpop.f32.mrb[3].mxu0  ;;  %v548_v31 = vpop.f32.mrb[3].mxu1  ;;  %v547_v57 = vadd.f32 %v546_v20, %v3162_v38 }
 0x26d   :  { %v478_v32 = vadd.f32 %v477_v21, %v3149_v13  ;;  %v549_v50 = vadd.f32 %v548_v31, %v3156_v35 }
 0x26e   :  { %v2032_v37 = vmul.f32 -1.442695, %v476_v18 }
 0x26f   :  { %v2033_v49 = vmul.f32 -1.442695, %v478_v32  ;;  %v2034_v53 = vmul.f32 -1.442695, %v549_v50 }
 0x270   :  { %2630 = vpow2.f32 %v2032_v37 }
 0x271   :  { %2632 = vpow2.f32 %v2033_v49 }
 0x272   :  { %2634 = vpow2.f32 %v2034_v53 }
 0x273   :  { %2636 = vtanh.f32 %v547_v57  ;;  %v629_v57 = vpop.permute.xlu1 %628 }
 0x27a   :  { %v2631_v58 = vpop.eup %2630 }
 0x27b   :  { %v2633_v61 = vpop.eup %2632  ;;  %v554_v62 = vadd.f32 1.0, %v2631_v58 }
 0x27c   :  { %v560_v63 = vadd.f32 1.0, %v2633_v61  ;;  %v2635_v0 = vpop.eup %2634 }
 0x27d   :  { %2638 = vrcp.f32 %v554_v62  ;;  %v2637_v17 = vpop.eup %2636  ;;  %v567_v37 = vadd.f32 1.0, %v2635_v0 }
 0x27e   :  { %2640 = vrcp.f32 %v560_v63 }
 0x27f   :  { %2642 = vrcp.f32 %v567_v37 }
 0x287   :  { %v2639_v21 = vpop.eup %2638 }
 0x288   :  { %v2641_v18 = vpop.eup %2640  ;;  %v571_v32 = vmul.f32 %v2639_v21, %v2637_v17 }
 0x289   :  { %v570_v49 = vmul.f32 %v2641_v18, %v3165_v8  ;;  %v2643_v20 = vpop.eup %2642 }
 0x28b   :  { %v3232_v31 = vadd.f32 %v571_v32, %v570_v49 }
 0x28d   :  { %2644 = vtanh.f32 %v3232_v31 }
 0x297   :  { %v2645_v50 = vpop.eup %2644 }
 0x298   :  { %v574_v53 = vmul.f32 %v2645_v50, %v2643_v20 }
 0x29a   :  { %v631_v58 = vsel %vm109_vm0, %v629_v57, %v574_v53  ;;  %v575_v61 = vmul.f32 %v574_v53, %v3175_v27  ;;  %v579_v8 = vmul.f32 %v574_v53, %v3172_v26  ;;  %v583_v0 = vmul.f32 %v574_v53, %v3178_v43 }
 0x29b   :  { %697 = vmatmul.mubr.f32.vlgmr.msra.gmra.mrb[4].mxu0 %v631_v58  ;;  %768 = vmatmul.mubr.f32.vlgmr.msra.gmra.mrb[4].mxu1 %v631_v58  ;;  %v587_v21 = vmul.f32 %v574_v53, %v3181_v48 }
 0x29c   :  { %v576_v62 = vsel %vm308_vm1, %v575_v61, 0.0  ;;  %2269 = vmatpush1.bf16.msra.mxu0 %v2998_v14  ;;  %2301 = vmatpush1.bf16.msra.mxu1 %v3000_v15  ;;  %v580_v63 = vsel %vm308_vm1, %v579_v8, 0.0  ;;  %v584_v17 = vsel %vm308_vm1, %v583_v0, 0.0 }
 0x29d   :  { %577 = vadd.xlane.f32.xlu1 %v576_v62  ;;  %2271 = vmatprep.subr.bf16.mxu0 %v3004_v19  ;;  %v588_v18 = vsel %vm308_vm1, %v587_v21, 0.0 }
 0x29e   :  { %2303 = vmatprep.subr.bf16.mxu1 %v3008_v23  ;;  %919 = vmatprep.mubr.f32.mxu0 %v2922_v1 }
 0x29f   :  { %990 = vmatprep.mubr.f32.mxu1 %v2922_v1 }
 0x2a0   :  { %2273 = vmatpush1.bf16.msra.mxu0 %v3010_v24  ;;  %2305 = vmatpush1.bf16.msra.mxu1 %v3013_v28 }
 0x2a1   :  { %581 = vadd.xlane.f32.xlu1 %v580_v63  ;;  %2275 = vmatprep.subr.bf16.mxu0 %v3016_v33 }
 0x2a2   :  { %2307 = vmatprep.subr.bf16.mxu1 %v3018_v34 }
 0x2a4   :  { %2277 = vmatpush1.bf16.msra.mxu0 %v3023_v41  ;;  %2309 = vmatpush1.bf16.msra.mxu1 %v3025_v42 }
 0x2a5   :  { %585 = vadd.xlane.f32.xlu1 %v584_v17  ;;  %2279 = vmatprep.subr.bf16.mxu0 %v3029_v46 }
 0x2a6   :  { %2311 = vmatprep.subr.bf16.mxu1 %v3031_v47 }
 0x2a8   :  { %2281 = vmatpush1.bf16.msra.mxu0 %v3035_v55  ;;  %2313 = vmatpush1.bf16.msra.mxu1 %v3037_v56 }
 0x2a9   :  { %589 = vadd.xlane.f32.xlu1 %v588_v18  ;;  %2283 = vmatprep.subr.bf16.mxu0 %v3041_v59 }
 0x2aa   :  { %2315 = vmatprep.subr.bf16.mxu1 %v3043_v60 }
 0x2ac   :  { %2285 = vmatpush1.bf16.msra.mxu0 %v3047_v6  ;;  %2317 = vmatpush1.bf16.msra.mxu1 %v3049_v7 }
 0x2ad   :  { %2287 = vmatprep.subr.bf16.mxu0 %v3053_v11  ;;  %2319 = vmatprep.subr.bf16.mxu1 %v3055_v12 }
 0x2b0   :  { %2289 = vmatpush1.bf16.msra.mxu0 %v3059_v22  ;;  %2321 = vmatpush1.bf16.msra.mxu1 %v3061_v25 }
 0x2b1   :  { %2291 = vmatprep.subr.bf16.mxu0 %v3065_v29  ;;  %2323 = vmatprep.subr.bf16.mxu1 %v3067_v30 }
 0x2b4   :  { %2293 = vmatpush1.bf16.msra.mxu0 %v3071_v39  ;;  %2325 = vmatpush1.bf16.msra.mxu1 %v3073_v40 }
 0x2b5   :  { %2295 = vmatprep.subr.bf16.mxu0 %v3077_v44  ;;  %2327 = vmatprep.subr.bf16.mxu1 %v3079_v45 }
 0x2b8   :  { %2297 = vmatpush1.bf16.msra.mxu0 %v3083_v51  ;;  %2329 = vmatpush1.bf16.msra.mxu1 %v3085_v52 }
 0x2b9   :  { %2331 = vmatprep.subr.bf16.mxu0 %v2993_v5  ;;  %2363 = vmatprep.subr.bf16.mxu1 %v2995_v9 }
 0x36e   :  { %v698_v32 = vpop.f32.mrb[4].mxu0  ;;  %v769_v37 = vpop.f32.mrb[4].mxu1 }
 0x36f   :  { %v699_v49 = vadd.f32 %v698_v32, %v3146_v10  ;;  %v700_v20 = vpop.f32.mrb[5].mxu0  ;;  %v771_v50 = vpop.f32.mrb[5].mxu1  ;;  %v770_v8 = vadd.f32 %v769_v37, %v3162_v38 }
 0x370   :  { %v701_v53 = vadd.f32 %v700_v20, %v3149_v13  ;;  %v772_v61 = vadd.f32 %v771_v50, %v3156_v35 }
 0x371   :  { %v2038_v57 = vmul.f32 -1.442695, %v699_v49 }
 0x372   :  { %v2039_v58 = vmul.f32 -1.442695, %v701_v53  ;;  %v2040_v62 = vmul.f32 -1.442695, %v772_v61 }
 0x373   :  { %2646 = vpow2.f32 %v2038_v57 }
 0x374   :  { %2648 = vpow2.f32 %v2039_v58 }
 0x375   :  { %2650 = vpow2.f32 %v2040_v62 }
 0x376   :  { %2652 = vtanh.f32 %v770_v8  ;;  %v852_v8 = vpop.permute.xlu1 %851 }
 0x37d   :  { %v2647_v63 = vpop.eup %2646 }
 0x37e   :  { %v2649_v0 = vpop.eup %2648  ;;  %v777_v17 = vadd.f32 1.0, %v2647_v63 }
 0x37f   :  { %v783_v21 = vadd.f32 1.0, %v2649_v0  ;;  %v2651_v18 = vpop.eup %2650 }
 0x380   :  { %2654 = vrcp.f32 %v777_v17  ;;  %v2653_v32 = vpop.eup %2652  ;;  %v790_v57 = vadd.f32 1.0, %v2651_v18 }
 0x381   :  { %2656 = vrcp.f32 %v783_v21 }
 0x382   :  { %2658 = vrcp.f32 %v790_v57 }
 0x38a   :  { %v2655_v20 = vpop.eup %2654 }
 0x38b   :  { %v2657_v49 = vpop.eup %2656  ;;  %v794_v53 = vmul.f32 %v2655_v20, %v2653_v32 }
 0x38c   :  { %v793_v58 = vmul.f32 %v2657_v49, %v3232_v31  ;;  %v2659_v37 = vpop.eup %2658 }
 0x38e   :  { %v3284_v50 = vadd.f32 %v794_v53, %v793_v58  ;;  %v2929_v53 = vmov 7  }
 0x38f   :  { %2613 = vset.pattern.permute.xlu0 %v2929_v53 }
 0x390   :  { %2660 = vtanh.f32 %v3284_v50  ;;  %1743 = vperm.xlu0 %2613, %v2990_v2  }
 0x39a   :  { %v2661_v61 = vpop.eup %2660 }
 0x39b   :  { %v797_v62 = vmul.f32 %v2661_v61, %v2659_v37 }
 0x39d   :  { %v854_v63 = vsel %vm109_vm0, %v852_v8, %v797_v62  ;;  %v798_v0 = vmul.f32 %v797_v62, %v3175_v27  ;;  %v802_v31 = vmul.f32 %v797_v62, %v3172_v26  ;;  %v806_v18 = vmul.f32 %v797_v62, %v3178_v43 }
 0x39e   :  { %920 = vmatmul.mubr.f32.vlgmr.msra.gmra.mrb[6].mxu0 %v854_v63  ;;  %991 = vmatmul.mubr.f32.vlgmr.msra.gmra.mrb[6].mxu1 %v854_v63  ;;  %v810_v20 = vmul.f32 %v797_v62, %v3181_v48 }
 0x39f   :  { %v799_v17 = vsel %vm308_vm1, %v798_v0, 0.0  ;;  %2333 = vmatpush1.bf16.msra.mxu0 %v2998_v14  ;;  %2365 = vmatpush1.bf16.msra.mxu1 %v3000_v15  ;;  %v803_v21 = vsel %vm308_vm1, %v802_v31, 0.0  ;;  %v807_v32 = vsel %vm308_vm1, %v806_v18, 0.0 }
 0x3a0   :  { %800 = vadd.xlane.f32.xlu1 %v799_v17  ;;  %2335 = vmatprep.subr.bf16.mxu0 %v3004_v19  ;;  %v811_v49 = vsel %vm308_vm1, %v810_v20, 0.0 }
 0x3a1   :  { %2367 = vmatprep.subr.bf16.mxu1 %v3008_v23  ;;  %1142 = vmatprep.mubr.f32.mxu0 %v2922_v1 }
 0x3a2   :  { %1213 = vmatprep.mubr.f32.mxu1 %v2922_v1 }
 0x3a3   :  { %2337 = vmatpush1.bf16.msra.mxu0 %v3010_v24  ;;  %2369 = vmatpush1.bf16.msra.mxu1 %v3013_v28 }
 0x3a4   :  { %804 = vadd.xlane.f32.xlu1 %v803_v21  ;;  %2339 = vmatprep.subr.bf16.mxu0 %v3016_v33 }
 0x3a5   :  { %2371 = vmatprep.subr.bf16.mxu1 %v3018_v34 }
 0x3a7   :  { %2341 = vmatpush1.bf16.msra.mxu0 %v3023_v41  ;;  %2373 = vmatpush1.bf16.msra.mxu1 %v3025_v42 }
 0x3a8   :  { %808 = vadd.xlane.f32.xlu1 %v807_v32  ;;  %2343 = vmatprep.subr.bf16.mxu0 %v3029_v46 }
 0x3a9   :  { %2375 = vmatprep.subr.bf16.mxu1 %v3031_v47 }
 0x3ab   :  { %2345 = vmatpush1.bf16.msra.mxu0 %v3035_v55  ;;  %2377 = vmatpush1.bf16.msra.mxu1 %v3037_v56 }
 0x3ac   :  { %812 = vadd.xlane.f32.xlu1 %v811_v49  ;;  %2347 = vmatprep.subr.bf16.mxu0 %v3041_v59 }
 0x3ad   :  { %2379 = vmatprep.subr.bf16.mxu1 %v3043_v60 }
 0x3af   :  { %2349 = vmatpush1.bf16.msra.mxu0 %v3047_v6  ;;  %2381 = vmatpush1.bf16.msra.mxu1 %v3049_v7 }
 0x3b0   :  { %2351 = vmatprep.subr.bf16.mxu0 %v3053_v11  ;;  %2383 = vmatprep.subr.bf16.mxu1 %v3055_v12 }
 0x3b3   :  { %2353 = vmatpush1.bf16.msra.mxu0 %v3059_v22  ;;  %2385 = vmatpush1.bf16.msra.mxu1 %v3061_v25 }
 0x3b4   :  { %2355 = vmatprep.subr.bf16.mxu0 %v3065_v29  ;;  %2387 = vmatprep.subr.bf16.mxu1 %v3067_v30 }
 0x3b7   :  { %2357 = vmatpush1.bf16.msra.mxu0 %v3071_v39  ;;  %2389 = vmatpush1.bf16.msra.mxu1 %v3073_v40 }
 0x3b8   :  { %2359 = vmatprep.subr.bf16.mxu0 %v3077_v44  ;;  %2391 = vmatprep.subr.bf16.mxu1 %v3079_v45 }
 0x3bb   :  { %2361 = vmatpush1.bf16.msra.mxu0 %v3083_v51  ;;  %2393 = vmatpush1.bf16.msra.mxu1 %v3085_v52 }
 0x3bc   :  { %2395 = vmatprep.subr.bf16.mxu0 %v2993_v5  ;;  %2427 = vmatprep.subr.bf16.mxu1 %v2995_v9 }
 0x471   :  { %v921_v57 = vpop.f32.mrb[6].mxu0  ;;  %v992_v58 = vpop.f32.mrb[6].mxu1 }
 0x472   :  { %v922_v37 = vadd.f32 %v921_v57, %v3146_v10  ;;  %v923_v61 = vpop.f32.mrb[7].mxu0  ;;  %v994_v62 = vpop.f32.mrb[7].mxu1  ;;  %v993_v21 = vadd.f32 %v992_v58, %v3162_v38 }
 0x473   :  { %v924_v8 = vadd.f32 %v923_v61, %v3149_v13  ;;  %v995_v17 = vadd.f32 %v994_v62, %v3156_v35 }
 0x474   :  { %v2044_v63 = vmul.f32 -1.442695, %v922_v37 }
 0x475   :  { %v2045_v0 = vmul.f32 -1.442695, %v924_v8  ;;  %v2046_v31 = vmul.f32 -1.442695, %v995_v17 }
 0x476   :  { %2662 = vpow2.f32 %v2044_v63 }
 0x477   :  { %2664 = vpow2.f32 %v2045_v0 }
 0x478   :  { %2666 = vpow2.f32 %v2046_v31  ;;  %v1075_v31 = vpop.permute.xlu1 %1074 }
 0x479   :  { %2668 = vtanh.f32 %v993_v21 }
 0x480   :  { %v2663_v18 = vpop.eup %2662 }
 0x481   :  { %v2665_v32 = vpop.eup %2664  ;;  %v1000_v2 = vadd.f32 1.0, %v2663_v18 }
 0x482   :  { %v1006_v20 = vadd.f32 1.0, %v2665_v32  ;;  %v2667_v49 = vpop.eup %2666 }
 0x483   :  { %2670 = vrcp.f32 %v1000_v2  ;;  %v2669_v53 = vpop.eup %2668  ;;  %v1013_v8 = vadd.f32 1.0, %v2667_v49 }
 0x484   :  { %2672 = vrcp.f32 %v1006_v20 }
 0x485   :  { %2674 = vrcp.f32 %v1013_v8 }
 0x48d   :  { %v2671_v57 = vpop.eup %2670 }
 0x48e   :  { %v2673_v37 = vpop.eup %2672  ;;  %v1017_v61 = vmul.f32 %v2671_v57, %v2669_v53 }
 0x48f   :  { %v1016_v63 = vmul.f32 %v2673_v37, %v3284_v50  ;;  %v2675_v58 = vpop.eup %2674 }
 0x491   :  { %v3337_v62 = vadd.f32 %v1017_v61, %v1016_v63 }
 0x493   :  { %2676 = vtanh.f32 %v3337_v62 }
 0x49d   :  { %v2677_v0 = vpop.eup %2676 }
 0x49e   :  { %v1020_v17 = vmul.f32 %v2677_v0, %v2675_v58 }
 0x4a0   :  { %v1077_v21 = vsel %vm109_vm0, %v1075_v31, %v1020_v17  ;;  %v1033_v18 = vmul.f32 %v1020_v17, %v3181_v48  ;;  %v1021_v32 = vmul.f32 %v1020_v17, %v3175_v27  ;;  %v1025_v20 = vmul.f32 %v1020_v17, %v3172_v26 }
 0x4a1   :  { %1143 = vmatmul.mubr.f32.vlgmr.msra.gmra.mrb[8].mxu0 %v1077_v21  ;;  %1214 = vmatmul.mubr.f32.vlgmr.msra.gmra.mrb[8].mxu1 %v1077_v21  ;;  %v1029_v53 = vmul.f32 %v1020_v17, %v3178_v43 }
 0x4a2   :  { %v1034_v50 = vsel %vm308_vm1, %v1033_v18, 0.0  ;;  %v1022_v2 = vsel %vm308_vm1, %v1021_v32, 0.0  ;;  %2397 = vmatpush1.bf16.msra.mxu0 %v2998_v14  ;;  %2429 = vmatpush1.bf16.msra.mxu1 %v3000_v15  ;;  %v1026_v49 = vsel %vm308_vm1, %v1025_v20, 0.0 }
 0x4a3   :  { %1035 = vadd.xlane.f32.xlu0 %v1034_v50  ;;  %1023 = vadd.xlane.f32.xlu1 %v1022_v2  ;;  %v1030_v57 = vsel %vm308_vm1, %v1029_v53, 0.0 }
 0x4a4   :  { %2399 = vmatprep.subr.bf16.mxu0 %v3004_v19  ;;  %2431 = vmatprep.subr.bf16.mxu1 %v3008_v23 }
 0x4a5   :  { %1365 = vmatprep.mubr.f32.mxu0 %v2922_v1  ;;  %1436 = vmatprep.mubr.f32.mxu1 %v2922_v1 }
 0x4a6   :  { %2401 = vmatpush1.bf16.msra.mxu0 %v3010_v24  ;;  %2433 = vmatpush1.bf16.msra.mxu1 %v3013_v28 }
 0x4a7   :  { %1027 = vadd.xlane.f32.xlu1 %v1026_v49  ;;  %2403 = vmatprep.subr.bf16.mxu0 %v3016_v33 }
 0x4a8   :  { %2435 = vmatprep.subr.bf16.mxu1 %v3018_v34 }
 0x4aa   :  { %2405 = vmatpush1.bf16.msra.mxu0 %v3023_v41  ;;  %2437 = vmatpush1.bf16.msra.mxu1 %v3025_v42 }
 0x4ab   :  { %1031 = vadd.xlane.f32.xlu1 %v1030_v57  ;;  %2407 = vmatprep.subr.bf16.mxu0 %v3029_v46 }
 0x4ac   :  { %2439 = vmatprep.subr.bf16.mxu1 %v3031_v47 }
 0x4ae   :  { %2409 = vmatpush1.bf16.msra.mxu0 %v3035_v55  ;;  %2441 = vmatpush1.bf16.msra.mxu1 %v3037_v56 }
 0x4af   :  { %2411 = vmatprep.subr.bf16.mxu0 %v3041_v59  ;;  %2443 = vmatprep.subr.bf16.mxu1 %v3043_v60 }
 0x4b2   :  { %2413 = vmatpush1.bf16.msra.mxu0 %v3047_v6  ;;  %2445 = vmatpush1.bf16.msra.mxu1 %v3049_v7 }
 0x4b3   :  { %2415 = vmatprep.subr.bf16.mxu0 %v3053_v11  ;;  %2447 = vmatprep.subr.bf16.mxu1 %v3055_v12 }
 0x4b6   :  { %2417 = vmatpush1.bf16.msra.mxu0 %v3059_v22  ;;  %2449 = vmatpush1.bf16.msra.mxu1 %v3061_v25 }
 0x4b7   :  { %2419 = vmatprep.subr.bf16.mxu0 %v3065_v29  ;;  %2451 = vmatprep.subr.bf16.mxu1 %v3067_v30 }
 0x4ba   :  { %2421 = vmatpush1.bf16.msra.mxu0 %v3071_v39  ;;  %2453 = vmatpush1.bf16.msra.mxu1 %v3073_v40 }
 0x4bb   :  { %2423 = vmatprep.subr.bf16.mxu0 %v3077_v44  ;;  %2455 = vmatprep.subr.bf16.mxu1 %v3079_v45 }
 0x4be   :  { %2425 = vmatpush1.bf16.msra.mxu0 %v3083_v51  ;;  %2457 = vmatpush1.bf16.msra.mxu1 %v3085_v52 }
 0x4bf   :  { %2459 = vmatprep.subr.bf16.mxu0 %v2993_v5  ;;  %2491 = vmatprep.subr.bf16.mxu1 %v2995_v9 }
 0x574   :  { %v1144_v37 = vpop.f32.mrb[8].mxu0  ;;  %v1215_v61 = vpop.f32.mrb[8].mxu1 }
 0x575   :  { %v1145_v8 = vadd.f32 %v1144_v37, %v3146_v10  ;;  %v1146_v63 = vpop.f32.mrb[9].mxu0  ;;  %v1217_v58 = vpop.f32.mrb[9].mxu1  ;;  %v1216_v32 = vadd.f32 %v1215_v61, %v3162_v38 }
 0x576   :  { %v1147_v0 = vadd.f32 %v1146_v63, %v3149_v13  ;;  %v1218_v21 = vadd.f32 %v1217_v58, %v3156_v35 }
 0x577   :  { %v2050_v17 = vmul.f32 -1.442695, %v1145_v8 }
 0x578   :  { %v2051_v31 = vmul.f32 -1.442695, %v1147_v0  ;;  %v2052_v18 = vmul.f32 -1.442695, %v1218_v21 }
 0x579   :  { %2678 = vpow2.f32 %v2050_v17 }
 0x57a   :  { %2680 = vpow2.f32 %v2051_v31 }
 0x57b   :  { %2682 = vpow2.f32 %v2052_v18  ;;  %v1298_v18 = vpop.permute.xlu0 %1297 }
 0x57c   :  { %2684 = vtanh.f32 %v1216_v32 }
 0x583   :  { %v2679_v50 = vpop.eup %2678 }
 0x584   :  { %v2681_v2 = vpop.eup %2680  ;;  %v1223_v20 = vadd.f32 1.0, %v2679_v50 }
 0x585   :  { %v1229_v49 = vadd.f32 1.0, %v2681_v2  ;;  %v2683_v53 = vpop.eup %2682 }
 0x586   :  { %2686 = vrcp.f32 %v1223_v20  ;;  %v2685_v57 = vpop.eup %2684  ;;  %v1236_v0 = vadd.f32 1.0, %v2683_v53 }
 0x587   :  { %2688 = vrcp.f32 %v1229_v49 }
 0x588   :  { %2690 = vrcp.f32 %v1236_v0 }
 0x590   :  { %v2687_v37 = vpop.eup %2686 }
 0x591   :  { %v2689_v8 = vpop.eup %2688  ;;  %v1240_v63 = vmul.f32 %v2687_v37, %v2685_v57 }
 0x592   :  { %v1239_v17 = vmul.f32 %v2689_v8, %v3337_v62  ;;  %v2691_v61 = vpop.eup %2690 }
 0x594   :  { %v3389_v58 = vadd.f32 %v1240_v63, %v1239_v17 }
 0x596   :  { %2692 = vtanh.f32 %v3389_v58 }
 0x5a0   :  { %v2693_v31 = vpop.eup %2692 }
 0x5a1   :  { %v1243_v21 = vmul.f32 %v2693_v31, %v2691_v61 }
 0x5a3   :  { %v1300_v32 = vsel %vm109_vm0, %v1298_v18, %v1243_v21  ;;  %v1244_v50 = vmul.f32 %v1243_v21, %v3175_v27  ;;  %v1248_v62 = vmul.f32 %v1243_v21, %v3172_v26  ;;  %v1252_v49 = vmul.f32 %v1243_v21, %v3178_v43 }
 0x5a4   :  { %1366 = vmatmul.mubr.f32.vlgmr.msra.gmra.mrb[10].mxu0 %v1300_v32  ;;  %1437 = vmatmul.mubr.f32.vlgmr.msra.gmra.mrb[10].mxu1 %v1300_v32  ;;  %v1256_v57 = vmul.f32 %v1243_v21, %v3181_v48 }
 0x5a5   :  { %v1245_v2 = vsel %vm308_vm1, %v1244_v50, 0.0  ;;  %2461 = vmatpush1.bf16.msra.mxu0 %v2998_v14  ;;  %2493 = vmatpush1.bf16.msra.mxu1 %v3000_v15  ;;  %v1249_v20 = vsel %vm308_vm1, %v1248_v62, 0.0  ;;  %v1253_v53 = vsel %vm308_vm1, %v1252_v49, 0.0 }
 0x5a6   :  { %1246 = vadd.xlane.f32.xlu1 %v1245_v2  ;;  %2463 = vmatprep.subr.bf16.mxu0 %v3004_v19  ;;  %v1257_v37 = vsel %vm308_vm1, %v1256_v57, 0.0 }
 0x5a7   :  { %2495 = vmatprep.subr.bf16.mxu1 %v3008_v23  ;;  %1588 = vmatprep.mubr.f32.mxu0 %v2922_v1 }
 0x5a8   :  { %1659 = vmatprep.mubr.f32.mxu1 %v2922_v1 }
 0x5a9   :  { %2465 = vmatpush1.bf16.msra.mxu0 %v3010_v24  ;;  %2497 = vmatpush1.bf16.msra.mxu1 %v3013_v28 }
 0x5aa   :  { %1250 = vadd.xlane.f32.xlu1 %v1249_v20  ;;  %2467 = vmatprep.subr.bf16.mxu0 %v3016_v33 }
 0x5ab   :  { %2499 = vmatprep.subr.bf16.mxu1 %v3018_v34 }
 0x5ad   :  { %2469 = vmatpush1.bf16.msra.mxu0 %v3023_v41  ;;  %2501 = vmatpush1.bf16.msra.mxu1 %v3025_v42 }
 0x5ae   :  { %1254 = vadd.xlane.f32.xlu1 %v1253_v53  ;;  %2471 = vmatprep.subr.bf16.mxu0 %v3029_v46 }
 0x5af   :  { %2503 = vmatprep.subr.bf16.mxu1 %v3031_v47 }
 0x5b1   :  { %2473 = vmatpush1.bf16.msra.mxu0 %v3035_v55  ;;  %2505 = vmatpush1.bf16.msra.mxu1 %v3037_v56 }
 0x5b2   :  { %1258 = vadd.xlane.f32.xlu1 %v1257_v37  ;;  %2475 = vmatprep.subr.bf16.mxu0 %v3041_v59 }
 0x5b3   :  { %2507 = vmatprep.subr.bf16.mxu1 %v3043_v60 }
 0x5b5   :  { %2477 = vmatpush1.bf16.msra.mxu0 %v3047_v6  ;;  %2509 = vmatpush1.bf16.msra.mxu1 %v3049_v7 }
 0x5b6   :  { %2479 = vmatprep.subr.bf16.mxu0 %v3053_v11  ;;  %2511 = vmatprep.subr.bf16.mxu1 %v3055_v12 }
 0x5b9   :  { %2481 = vmatpush1.bf16.msra.mxu0 %v3059_v22  ;;  %2513 = vmatpush1.bf16.msra.mxu1 %v3061_v25 }
 0x5ba   :  { %2483 = vmatprep.subr.bf16.mxu0 %v3065_v29  ;;  %2515 = vmatprep.subr.bf16.mxu1 %v3067_v30 }
 0x5bd   :  { %2485 = vmatpush1.bf16.msra.mxu0 %v3071_v39  ;;  %2517 = vmatpush1.bf16.msra.mxu1 %v3073_v40 }
 0x5be   :  { %2487 = vmatprep.subr.bf16.mxu0 %v3077_v44  ;;  %2519 = vmatprep.subr.bf16.mxu1 %v3079_v45 }
 0x5c1   :  { %2489 = vmatpush1.bf16.msra.mxu0 %v3083_v51  ;;  %2521 = vmatpush1.bf16.msra.mxu1 %v3085_v52 }
 0x5c2   :  { %2523 = vmatprep.subr.bf16.mxu0 %v2993_v5  ;;  %2555 = vmatprep.subr.bf16.mxu1 %v2995_v9 }
 0x677   :  { %v1367_v8 = vpop.f32.mrb[10].mxu0  ;;  %v1438_v63 = vpop.f32.mrb[10].mxu1 }
 0x678   :  { %v1368_v0 = vadd.f32 %v1367_v8, %v3146_v10  ;;  %v1369_v17 = vpop.f32.mrb[11].mxu0  ;;  %v1440_v61 = vpop.f32.mrb[11].mxu1  ;;  %v1439_v2 = vadd.f32 %v1438_v63, %v3162_v38 }
 0x679   :  { %v1370_v31 = vadd.f32 %v1369_v17, %v3149_v13  ;;  %v1441_v32 = vadd.f32 %v1440_v61, %v3156_v35 }
 0x67a   :  { %v2056_v21 = vmul.f32 -1.442695, %v1368_v0 }
 0x67b   :  { %v2057_v18 = vmul.f32 -1.442695, %v1370_v31  ;;  %v2058_v50 = vmul.f32 -1.442695, %v1441_v32 }
 0x67c   :  { %2694 = vpow2.f32 %v2056_v21 }
 0x67d   :  { %2696 = vpow2.f32 %v2057_v18  ;;  %v1521_v18 = vpop.permute.xlu1 %1520 }
 0x67e   :  { %2698 = vpow2.f32 %v2058_v50 }
 0x67f   :  { %2700 = vtanh.f32 %v1439_v2 }
 0x686   :  { %v2695_v5 = vpop.eup %2694 }
 0x687   :  { %v2697_v62 = vpop.eup %2696  ;;  %v1446_v9 = vadd.f32 1.0, %v2695_v5 }
 0x688   :  { %v1452_v20 = vadd.f32 1.0, %v2697_v62  ;;  %v2699_v49 = vpop.eup %2698 }
 0x689   :  { %2702 = vrcp.f32 %v1446_v9  ;;  %v2701_v53 = vpop.eup %2700  ;;  %v1459_v0 = vadd.f32 1.0, %v2699_v49 }
 0x68a   :  { %2704 = vrcp.f32 %v1452_v20 }
 0x68b   :  { %2706 = vrcp.f32 %v1459_v0 }
 0x693   :  { %v2703_v57 = vpop.eup %2702 }
 0x694   :  { %v2705_v37 = vpop.eup %2704  ;;  %v1463_v8 = vmul.f32 %v2703_v57, %v2701_v53 }
 0x695   :  { %v1462_v17 = vmul.f32 %v2705_v37, %v3389_v58  ;;  %v2707_v63 = vpop.eup %2706 }
 0x697   :  { %v3441_v61 = vadd.f32 %v1463_v8, %v1462_v17 }
 0x699   :  { %2708 = vtanh.f32 %v3441_v61 }
 0x6a3   :  { %v2709_v31 = vpop.eup %2708 }
 0x6a4   :  { %v1466_v21 = vmul.f32 %v2709_v31, %v2707_v63 }
 0x6a6   :  { %v1523_v32 = vsel %vm109_vm0, %v1521_v18, %v1466_v21  ;;  %v1467_v50 = vmul.f32 %v1466_v21, %v3175_v27  ;;  %v1471_v58 = vmul.f32 %v1466_v21, %v3172_v26  ;;  %v1475_v62 = vmul.f32 %v1466_v21, %v3178_v43 }
 0x6a7   :  { %1589 = vmatmul.mubr.f32.vlgmr.msra.gmra.mrb[12].mxu0 %v1523_v32  ;;  %1660 = vmatmul.mubr.f32.vlgmr.msra.gmra.mrb[12].mxu1 %v1523_v32 }
 0x6a8   :  { %v1468_v2 = vsel %vm308_vm1, %v1467_v50, 0.0  ;;  %2525 = vmatpush1.bf16.msra.mxu0 %v2998_v14  ;;  %2557 = vmatpush1.bf16.msra.mxu1 %v3000_v15  ;;  %v1472_v5 = vsel %vm308_vm1, %v1471_v58, 0.0  ;;  %v1476_v14 = vsel %vm308_vm1, %v1475_v62, 0.0  ;;  %v1479_v15 = vmul.f32 %v1466_v21, %v3181_v48 }
 0x6a9   :  { %1469 = vadd.xlane.f32.xlu1 %v1468_v2  ;;  %2527 = vmatprep.subr.bf16.mxu0 %v3004_v19  ;;  %v104_v19 = vld [vmem:[%s3677_s4] sm:$0xf]  ;;  %s2930_s4 = smov 2  }
 0x6aa   :  { %2559 = vmatprep.subr.bf16.mxu1 %v3008_v23  ;;  %1811 = vmatprep.mubr.f32.mxu0 %v2922_v1  ;;  %v3490_v23 = vrot.slane %v104_v19, %v3140_v4 }
 0x6ab   :  { %1882 = vmatprep.mubr.f32.mxu1 %v2922_v1  ;;  %v1480_v1 = vsel %vm308_vm1, %v1479_v15, 0.0 }
 0x6ac   :  { %2529 = vmatpush1.bf16.msra.mxu0 %v3010_v24  ;;  %2561 = vmatpush1.bf16.msra.mxu1 %v3013_v28  ;;  %v3493_v24 = vrot.slane %v104_v19, %v3138_v3  ;;  %v357_v28 = vmul.f32 0.0, %v3490_v23 }
 0x6ad   :  { %1473 = vadd.xlane.f32.xlu1 %v1472_v5  ;;  %2531 = vmatprep.subr.bf16.mxu0 %v3016_v33  ;;  %v105_v33 = vld [vmem:[%s3678_s5] sm:$0xf]  ;;  %s2931_s5 = smov 3  }
 0x6ae   :  { %2563 = vmatprep.subr.bf16.mxu1 %v3018_v34  ;;  %v319_v34 = vpop.xlane.xlu0 %318 }
 0x6b0   :  { %2533 = vmatpush1.bf16.msra.mxu0 %v3023_v41  ;;  %2565 = vmatpush1.bf16.msra.mxu1 %v3025_v42  ;;  %v340_v41 = vmul.f32 0.0, %v3493_v24  ;;  %v311_v42 = vpop.xlane.xlu1 %310 }
 0x6b1   :  { %1477 = vadd.xlane.f32.xlu1 %v1476_v14  ;;  %2535 = vmatprep.subr.bf16.mxu0 %v3029_v46  ;;  %v3501_v46 = vrot.slane %v105_v33, %v3140_v4 }
 0x6b2   :  { %2567 = vmatprep.subr.bf16.mxu1 %v3031_v47  ;;  %v358_v47 = vadd.f32 %v357_v28, %v319_v34 }
 0x6b4   :  { %2537 = vmatpush1.bf16.msra.mxu0 %v3035_v55  ;;  %2569 = vmatpush1.bf16.msra.mxu1 %v3037_v56  ;;  %v3504_v55 = vrot.slane %v105_v33, %v3138_v3  ;;  %v341_v56 = vadd.f32 %v340_v41, %v311_v42 }
 0x6b5   :  { %1481 = vadd.xlane.f32.xlu1 %v1480_v1  ;;  %2539 = vmatprep.subr.bf16.mxu0 %v3041_v59  ;;  %v363_v59 = vadd.f32 %v3501_v46, %v358_v47 }
 0x6b6   :  { %2571 = vmatprep.subr.bf16.mxu1 %v3043_v60  ;;  %v346_v60 = vadd.f32 %v3504_v55, %v341_v56 }
 0x6b8   :  { %2541 = vmatpush1.bf16.msra.mxu0 %v3047_v6  ;;  %2573 = vmatpush1.bf16.msra.mxu1 %v3049_v7  ;;  %v2030_v6 = vmul.f32 -1.442695, %v363_v59  ;;  %v2029_v7 = vmul.f32 -1.442695, %v346_v60 }
 0x6b9   :  { %2543 = vmatprep.subr.bf16.mxu0 %v3053_v11  ;;  %2575 = vmatprep.subr.bf16.mxu1 %v3055_v12  ;;  %v3509_v11 = vrot.slane %v104_v19, %v3158_v36  ;;  %v3512_v12 = vrot.slane %v104_v19, %v3151_v16 }
 0x6ba   :  { %2710 = vpow2.f32 %v2030_v6 }
 0x6bb   :  { %2712 = vpow2.f32 %v2029_v7 }
 0x6bc   :  { %2545 = vmatpush1.bf16.msra.mxu0 %v3059_v22  ;;  %2577 = vmatpush1.bf16.msra.mxu1 %v3061_v25  ;;  %v374_v22 = vmul.f32 0.0, %v3509_v11  ;;  %v386_v25 = vmul.f32 0.0, %v3512_v12 }
 0x6bd   :  { %2547 = vmatprep.subr.bf16.mxu0 %v3065_v29  ;;  %2579 = vmatprep.subr.bf16.mxu1 %v3067_v30  ;;  %v327_v29 = vpop.xlane.xlu0 %326  ;;  %v335_v30 = vpop.xlane.xlu1 %334 }
 0x6c0   :  { %2549 = vmatpush1.bf16.msra.mxu0 %v3071_v39  ;;  %2581 = vmatpush1.bf16.msra.mxu1 %v3073_v40 }
 0x6c1   :  { %2551 = vmatprep.subr.bf16.mxu0 %v3077_v44  ;;  %2583 = vmatprep.subr.bf16.mxu1 %v3079_v45  ;;  %v3517_v44 = vrot.slane %v105_v33, %v3158_v36  ;;  %v375_v45 = vadd.f32 %v374_v22, %v327_v29  ;;  %v578_v31 = vpop.xlane.xlu1 %577 }
 0x6c3   :  { %v380_v9 = vadd.f32 %v3517_v44, %v375_v45 }
 0x6c4   :  { %2553 = vmatpush1.bf16.msra.mxu0 %v3083_v51  ;;  %2585 = vmatpush1.bf16.msra.mxu1 %v3085_v52  ;;  %v2711_v39 = vpop.eup %2710  ;;  %v3520_v51 = vrot.slane %v105_v33, %v3151_v16  ;;  %v387_v52 = vadd.f32 %v386_v25, %v335_v30 }
 0x6c5   :  { %v2713_v40 = vpop.eup %2712  ;;  %v367_v3 = vadd.f32 1.0, %v2711_v39  ;;  %v582_v32 = vpop.xlane.xlu1 %581 }
 0x6c6   :  { %v350_v4 = vadd.f32 1.0, %v2713_v40  ;;  %v392_v20 = vadd.f32 %v3520_v51, %v387_v52 }
 0x6c7   :  { %2714 = vrcp.f32 %v367_v3 }
 0x6c8   :  { %2716 = vrcp.f32 %v350_v4  ;;  %v2031_v49 = vmul.f32 -1.442695, %v392_v20 }
 0x6c9   :  { %2718 = vtanh.f32 %v380_v9  ;;  %v586_v19 = vpop.xlane.xlu1 %585 }
 0x6ca   :  { %2720 = vpow2.f32 %v2031_v49 }
 0x6cd   :  { %v590_v28 = vpop.xlane.xlu1 %589 }
 0x6d1   :  { %v2715_v53 = vpop.eup %2714  ;;  %v801_v9 = vpop.xlane.xlu1 %800 }
 0x6d2   :  { %v2717_v57 = vpop.eup %2716  ;;  %v399_v37 = vmul.f32 0.0, %v2715_v53 }
 0x6d3   :  { %v2719_v36 = vpop.eup %2718 }
 0x6d4   :  { %v400_v8 = vmul.f32 %v2719_v36, %v2717_v57  ;;  %v2721_v0 = vpop.eup %2720 }
 0x6d5   :  { %v396_v17 = vadd.f32 1.0, %v2721_v0  ;;  %v805_v53 = vpop.xlane.xlu1 %804 }
 0x6d6   :  { %v401_v16 = vadd.f32 %v400_v8, %v399_v37 }
 0x6d8   :  { %2722 = vtanh.f32 %v401_v16 }
 0x6d9   :  { %2724 = vrcp.f32 %v396_v17 }
 0x6e2   :  { %v2723_v63 = vpop.eup %2722 }
 0x6e3   :  { %v2725_v21 = vpop.eup %2724 }
 0x6e4   :  { %v3524_v18 = vmul.f32 %v2725_v21, %v2723_v63 }
 0x6e6   :  { %v600_v50 = vmul.f32 %v3524_v18, %v3490_v23  ;;  %v591_v2 = vmul.f32 %v3524_v18, %v3493_v24  ;;  %v613_v33 = vmul.f32 %v3524_v18, %v3512_v12  ;;  %v609_v41 = vmul.f32 %v3524_v18, %v3509_v11 }
 0x6e8   :  { %v601_v58 = vadd.f32 %v600_v50, %v582_v32  ;;  %v592_v5 = vadd.f32 %v591_v2, %v578_v31  ;;  %v614_v42 = vadd.f32 %v613_v33, %v590_v28  ;;  %v610_v59 = vadd.f32 %v609_v41, %v586_v19  ;;  %v809_v19 = vpop.xlane.xlu1 %808 }
 0x6ea   :  { %v602_v62 = vadd.f32 %v601_v58, %v3501_v46  ;;  %v593_v14 = vadd.f32 %v592_v5, %v3504_v55  ;;  %v615_v6 = vadd.f32 %v614_v42, %v3520_v51  ;;  %v611_v7 = vadd.f32 %v610_v59, %v3517_v44 }
 0x6ec   :  { %v2036_v15 = vmul.f32 -1.442695, %v602_v62  ;;  %v2035_v1 = vmul.f32 -1.442695, %v593_v14  ;;  %v2037_v22 = vmul.f32 -1.442695, %v615_v6  ;;  %v813_v42 = vpop.xlane.xlu1 %812 }
 0x6ee   :  { %2726 = vpow2.f32 %v2036_v15 }
 0x6ef   :  { %2728 = vpow2.f32 %v2035_v1 }
 0x6f8   :  { %v2727_v34 = vpop.eup %2726 }
 0x6f9   :  { %v2729_v47 = vpop.eup %2728  ;;  %v606_v56 = vadd.f32 1.0, %v2727_v34 }
 0x6fa   :  { %v597_v60 = vadd.f32 1.0, %v2729_v47 }
 0x6fb   :  { %2730 = vrcp.f32 %v606_v56 }
 0x6fc   :  { %2732 = vrcp.f32 %v597_v60 }
 0x6fd   :  { %2734 = vtanh.f32 %v611_v7 }
 0x6fe   :  { %2736 = vpow2.f32 %v2037_v22 }
 0x705   :  { %v2731_v25 = vpop.eup %2730 }
 0x706   :  { %v2733_v29 = vpop.eup %2732  ;;  %v622_v30 = vmul.f32 %v2731_v25, %v401_v16 }
 0x707   :  { %v2735_v39 = vpop.eup %2734 }
 0x708   :  { %v623_v40 = vmul.f32 %v2735_v39, %v2733_v29  ;;  %v2737_v45 = vpop.eup %2736 }
 0x709   :  { %v619_v3 = vadd.f32 1.0, %v2737_v45 }
 0x70a   :  { %v3538_v52 = vadd.f32 %v623_v40, %v622_v30 }
 0x70c   :  { %2738 = vtanh.f32 %v3538_v52 }
 0x70d   :  { %2740 = vrcp.f32 %v619_v3 }
 0x716   :  { %v2739_v4 = vpop.eup %2738 }
 0x717   :  { %v2741_v20 = vpop.eup %2740 }
 0x718   :  { %v3541_v49 = vmul.f32 %v2741_v20, %v2739_v4 }
 0x71a   :  { %v823_v57 = vmul.f32 %v3541_v49, %v3490_v23  ;;  %v814_v8 = vmul.f32 %v3541_v49, %v3493_v24  ;;  %v832_v47 = vmul.f32 %v3541_v49, %v3509_v11  ;;  %v836_v56 = vmul.f32 %v3541_v49, %v3512_v12 }
 0x71c   :  { %v824_v0 = vadd.f32 %v823_v57, %v805_v53  ;;  %v815_v21 = vadd.f32 %v814_v8, %v801_v9  ;;  %v833_v60 = vadd.f32 %v832_v47, %v809_v19  ;;  %v837_v6 = vadd.f32 %v836_v56, %v813_v42 }
 0x71e   :  { %v825_v2 = vadd.f32 %v824_v0, %v3501_v46  ;;  %v816_v58 = vadd.f32 %v815_v21, %v3504_v55  ;;  %v834_v30 = vadd.f32 %v833_v60, %v3517_v44  ;;  %v838_v39 = vadd.f32 %v837_v6, %v3520_v51 }
 0x720   :  { %v2042_v62 = vmul.f32 -1.442695, %v825_v2  ;;  %v2041_v14 = vmul.f32 -1.442695, %v816_v58  ;;  %v2043_v53 = vmul.f32 -1.442695, %v838_v39 }
 0x77a   :  { %v1590_v36 = vpop.f32.mrb[12].mxu0  ;;  %v1661_v37 = vpop.f32.mrb[12].mxu1 }
 0x77b   :  { %v1591_v16 = vadd.f32 %v1590_v36, %v3146_v10  ;;  %v1592_v17 = vpop.f32.mrb[13].mxu0  ;;  %v1663_v63 = vpop.f32.mrb[13].mxu1  ;;  %v1662_v1 = vadd.f32 %v1661_v37, %v3162_v38 }
 0x77c   :  { %v1593_v31 = vadd.f32 %v1592_v17, %v3149_v13  ;;  %v1664_v5 = vadd.f32 %v1663_v63, %v3156_v35 }
 0x77d   :  { %v2062_v32 = vmul.f32 -1.442695, %v1591_v16 }
 0x77e   :  { %v2063_v50 = vmul.f32 -1.442695, %v1593_v31  ;;  %v2064_v15 = vmul.f32 -1.442695, %v1664_v5 }
 0x77f   :  { %2742 = vpow2.f32 %v2062_v32 }
 0x780   :  { %2744 = vpow2.f32 %v2063_v50 }
 0x781   :  { %2746 = vpow2.f32 %v2042_v62 }
 0x782   :  { %2748 = vpow2.f32 %v2041_v14 }
 0x783   :  { %2750 = vpow2.f32 %v2064_v15 }
 0x784   :  { %2752 = vtanh.f32 %v1662_v1 }
 0x789   :  { %v2743_v28 = vpop.eup %2742 }
 0x78a   :  { %v2745_v33 = vpop.eup %2744  ;;  %v1669_v34 = vadd.f32 1.0, %v2743_v28  ;;  %v1024_v28 = vpop.xlane.xlu1 %1023 }
 0x78b   :  { %v1675_v41 = vadd.f32 1.0, %v2745_v33  ;;  %v2747_v59 = vpop.eup %2746 }
 0x78c   :  { %2754 = vrcp.f32 %v1669_v34  ;;  %v2749_v7 = vpop.eup %2748  ;;  %v829_v25 = vadd.f32 1.0, %v2747_v59 }
 0x78d   :  { %2756 = vrcp.f32 %v1675_v41  ;;  %v2751_v22 = vpop.eup %2750  ;;  %v820_v45 = vadd.f32 1.0, %v2749_v7 }
 0x78e   :  { %v2753_v29 = vpop.eup %2752  ;;  %v1682_v9 = vadd.f32 1.0, %v2751_v22  ;;  %2758 = vrcp.f32 %v829_v25  ;;  %v1028_v41 = vpop.xlane.xlu1 %1027 }
 0x78f   :  { %2760 = vtanh.f32 %v834_v30 }
 0x790   :  { %2762 = vrcp.f32 %v820_v45 }
 0x791   :  { %2764 = vrcp.f32 %v1682_v9 }
 0x792   :  { %v1032_v39 = vpop.xlane.xlu1 %1031 }
 0x796   :  { %v2755_v40 = vpop.eup %2754 }
 0x797   :  { %v2757_v3 = vpop.eup %2756  ;;  %v1686_v4 = vmul.f32 %v2755_v40, %v2753_v29 }
 0x798   :  { %v1685_v20 = vmul.f32 %v2757_v3, %v3441_v61  ;;  %v2759_v36 = vpop.eup %2758  ;;  %v1744_v61 = vpop.permute.xlu0 %1743 }
 0x799   :  { %v2761_v37 = vpop.eup %2760  ;;  %v845_v16 = vmul.f32 %v2759_v36, %v3538_v52 }
 0x79a   :  { %v3560_v57 = vadd.f32 %v1686_v4, %v1685_v20  ;;  %v2763_v8 = vpop.eup %2762 }
 0x79b   :  { %v2765_v0 = vpop.eup %2764  ;;  %v846_v31 = vmul.f32 %v2763_v8, %v2761_v37 }
 0x79c   :  { %2766 = vtanh.f32 %v3560_v57  ;;  %v1036_v25 = vpop.xlane.xlu0 %1035 }
 0x79d   :  { %2768 = vpow2.f32 %v2043_v53  ;;  %v847_v32 = vadd.f32 %v846_v31, %v845_v16 }
 0x79f   :  { %2770 = vtanh.f32 %v847_v32 }
 0x7a6   :  { %v2767_v17 = vpop.eup %2766 }
 0x7a7   :  { %v2769_v63 = vpop.eup %2768  ;;  %v1689_v21 = vmul.f32 %v2767_v17, %v2765_v0 }
 0x7a8   :  { %v842_v5 = vadd.f32 1.0, %v2769_v63 }
 0x7a9   :  { %v1746_v50 = vsel %vm109_vm0, %v1744_v61, %v1689_v21  ;;  %v1690_v2 = vmul.f32 %v1689_v21, %v3175_v27  ;;  %v1694_v58 = vmul.f32 %v1689_v21, %v3172_v26  ;;  %v1698_v14 = vmul.f32 %v1689_v21, %v3178_v43  ;;  %v2771_v19 = vpop.eup %2770 }
 0x7aa   :  { %1812 = vmatmul.mubr.f32.vlgmr.msra.gmra.mrb[14].mxu0 %v1746_v50  ;;  %1883 = vmatmul.mubr.f32.vlgmr.msra.gmra.mrb[14].mxu1 %v1746_v50  ;;  %v1702_v15 = vmul.f32 %v1689_v21, %v3181_v48  ;;  %2772 = vrcp.f32 %v842_v5 }
 0x7ab   :  { %v1691_v62 = vsel %vm308_vm1, %v1690_v2, 0.0  ;;  %v1695_v52 = vsel %vm308_vm1, %v1694_v58, 0.0  ;;  %v1699_v54 = vsel %vm308_vm1, %v1698_v14, 0.0  ;;  %v1247_v2 = vpop.xlane.xlu1 %1246 }
 0x7ac   :  { %1692 = vadd.xlane.f32.xlu0 %v1691_v62  ;;  %1696 = vadd.xlane.f32.xlu1 %v1695_v52  ;;  %v1703_v1 = vsel %vm308_vm1, %v1702_v15, 0.0 }
 0x7af   :  { %v1251_v62 = vpop.xlane.xlu1 %1250 }
 0x7b0   :  { %1700 = vadd.xlane.f32.xlu0 %v1699_v54  ;;  %1704 = vadd.xlane.f32.xlu1 %v1703_v1 }
 0x7b4   :  { %v2773_v33 = vpop.eup %2772 }
 0x7b5   :  { %v3574_v34 = vmul.f32 %v2773_v33, %v2771_v19  ;;  %v1255_v33 = vpop.xlane.xlu1 %1254 }
 0x7b7   :  { %v1046_v42 = vmul.f32 %v3574_v34, %v3490_v23  ;;  %v1037_v47 = vmul.f32 %v3574_v34, %v3493_v24  ;;  %v1059_v29 = vmul.f32 %v3574_v34, %v3512_v12  ;;  %v1055_v45 = vmul.f32 %v3574_v34, %v3509_v11 }
 0x7b9   :  { %v1047_v56 = vadd.f32 %v1046_v42, %v1028_v41  ;;  %v1038_v59 = vadd.f32 %v1037_v47, %v1024_v28  ;;  %v1060_v40 = vadd.f32 %v1059_v29, %v1036_v25  ;;  %v1056_v9 = vadd.f32 %v1055_v45, %v1032_v39  ;;  %v1259_v41 = vpop.xlane.xlu1 %1258 }
 0x7bb   :  { %v1048_v60 = vadd.f32 %v1047_v56, %v3501_v46  ;;  %v1039_v6 = vadd.f32 %v1038_v59, %v3504_v55  ;;  %v1061_v20 = vadd.f32 %v1060_v40, %v3520_v51  ;;  %v1057_v36 = vadd.f32 %v1056_v9, %v3517_v44 }
 0x7bd   :  { %v2048_v7 = vmul.f32 -1.442695, %v1048_v60  ;;  %v2047_v22 = vmul.f32 -1.442695, %v1039_v6  ;;  %v2049_v37 = vmul.f32 -1.442695, %v1061_v20 }
 0x7bf   :  { %2774 = vpow2.f32 %v2048_v7 }
 0x7c0   :  { %2776 = vpow2.f32 %v2047_v22 }
 0x7c9   :  { %v2775_v30 = vpop.eup %2774 }
 0x7ca   :  { %v2777_v3 = vpop.eup %2776  ;;  %v1052_v4 = vadd.f32 1.0, %v2775_v30 }
 0x7cb   :  { %v1043_v53 = vadd.f32 1.0, %v2777_v3 }
 0x7cc   :  { %2778 = vrcp.f32 %v1052_v4 }
 0x7cd   :  { %2780 = vrcp.f32 %v1043_v53 }
 0x7ce   :  { %2782 = vtanh.f32 %v1057_v36 }
 0x7cf   :  { %2784 = vpow2.f32 %v2049_v37  ;;  %v1470_v37 = vpop.xlane.xlu1 %1469 }
 0x7d6   :  { %v2779_v8 = vpop.eup %2778 }
 0x7d7   :  { %v2781_v0 = vpop.eup %2780  ;;  %v1068_v16 = vmul.f32 %v2779_v8, %v847_v32 }
 0x7d8   :  { %v2783_v17 = vpop.eup %2782 }
 0x7d9   :  { %v1069_v63 = vmul.f32 %v2783_v17, %v2781_v0  ;;  %v2785_v31 = vpop.eup %2784 }
 0x7da   :  { %v1065_v61 = vadd.f32 1.0, %v2785_v31 }
 0x7db   :  { %v1070_v21 = vadd.f32 %v1069_v63, %v1068_v16  ;;  %v1474_v16 = vpop.xlane.xlu1 %1473 }
 0x7dd   :  { %2786 = vtanh.f32 %v1070_v21 }
 0x7de   :  { %2788 = vrcp.f32 %v1065_v61 }
 0x7e7   :  { %v2787_v50 = vpop.eup %2786 }
 0x7e8   :  { %v2789_v58 = vpop.eup %2788 }
 0x7e9   :  { %v3588_v5 = vmul.f32 %v2789_v58, %v2787_v50 }
 0x7eb   :  { %v1269_v52 = vmul.f32 %v3588_v5, %v3490_v23  ;;  %v1260_v14 = vmul.f32 %v3588_v5, %v3493_v24  ;;  %v1282_v42 = vmul.f32 %v3588_v5, %v3512_v12  ;;  %v1278_v56 = vmul.f32 %v3588_v5, %v3509_v11 }
 0x7ed   :  { %v1270_v32 = vadd.f32 %v1269_v52, %v1251_v62  ;;  %v1261_v15 = vadd.f32 %v1260_v14, %v1247_v2  ;;  %v1283_v59 = vadd.f32 %v1282_v42, %v1259_v41  ;;  %v1279_v7 = vadd.f32 %v1278_v56, %v1255_v33  ;;  %v1478_v62 = vpop.xlane.xlu1 %1477 }
 0x7ef   :  { %v1271_v54 = vadd.f32 %v1270_v32, %v3501_v46  ;;  %v1262_v1 = vadd.f32 %v1261_v15, %v3504_v55  ;;  %v1284_v25 = vadd.f32 %v1283_v59, %v3520_v51  ;;  %v1280_v29 = vadd.f32 %v1279_v7, %v3517_v44 }
 0x7f1   :  { %v2054_v19 = vmul.f32 -1.442695, %v1271_v54  ;;  %v2053_v28 = vmul.f32 -1.442695, %v1262_v1  ;;  %v2055_v30 = vmul.f32 -1.442695, %v1284_v25  ;;  %v1482_v52 = vpop.xlane.xlu1 %1481 }
 0x7f3   :  { %2790 = vpow2.f32 %v2054_v19 }
 0x7f4   :  { %2792 = vpow2.f32 %v2053_v28 }
 0x7fd   :  { %v2791_v47 = vpop.eup %2790 }
 0x7fe   :  { %v2793_v60 = vpop.eup %2792  ;;  %v1275_v6 = vadd.f32 1.0, %v2791_v47 }
 0x7ff   :  { %v1266_v22 = vadd.f32 1.0, %v2793_v60 }
 0x800   :  { %2794 = vrcp.f32 %v1275_v6 }
 0x801   :  { %2796 = vrcp.f32 %v1266_v22 }
 0x802   :  { %2798 = vtanh.f32 %v1280_v29 }
 0x803   :  { %2800 = vpow2.f32 %v2055_v30 }
 0x80a   :  { %v2795_v39 = vpop.eup %2794 }
 0x80b   :  { %v2797_v40 = vpop.eup %2796  ;;  %v1291_v45 = vmul.f32 %v2795_v39, %v1070_v21 }
 0x80c   :  { %v2799_v3 = vpop.eup %2798 }
 0x80d   :  { %v1292_v4 = vmul.f32 %v2799_v3, %v2797_v40  ;;  %v2801_v9 = vpop.eup %2800 }
 0x80e   :  { %v1288_v53 = vadd.f32 1.0, %v2801_v9 }
 0x80f   :  { %v1293_v20 = vadd.f32 %v1292_v4, %v1291_v45 }
 0x811   :  { %2802 = vtanh.f32 %v1293_v20 }
 0x812   :  { %2804 = vrcp.f32 %v1288_v53 }
 0x81b   :  { %v2803_v36 = vpop.eup %2802 }
 0x81c   :  { %v2805_v8 = vpop.eup %2804 }
 0x81d   :  { %v3602_v0 = vmul.f32 %v2805_v8, %v2803_v36 }
 0x81f   :  { %v1492_v17 = vmul.f32 %v3602_v0, %v3490_v23  ;;  %v1483_v63 = vmul.f32 %v3602_v0, %v3493_v24  ;;  %v1505_v14 = vmul.f32 %v3602_v0, %v3512_v12  ;;  %v1501_v15 = vmul.f32 %v3602_v0, %v3509_v11 }
 0x821   :  { %v1493_v31 = vadd.f32 %v1492_v17, %v1474_v16  ;;  %v1484_v21 = vadd.f32 %v1483_v63, %v1470_v37  ;;  %v1506_v54 = vadd.f32 %v1505_v14, %v1482_v52  ;;  %v1502_v28 = vadd.f32 %v1501_v15, %v1478_v62 }
 0x823   :  { %v1494_v61 = vadd.f32 %v1493_v31, %v3501_v46  ;;  %v1485_v50 = vadd.f32 %v1484_v21, %v3504_v55  ;;  %v1507_v41 = vadd.f32 %v1506_v54, %v3520_v51  ;;  %v1503_v42 = vadd.f32 %v1502_v28, %v3517_v44 }
 0x825   :  { %v2060_v2 = vmul.f32 -1.442695, %v1494_v61  ;;  %v2059_v58 = vmul.f32 -1.442695, %v1485_v50  ;;  %v2061_v47 = vmul.f32 -1.442695, %v1507_v41 }
 0x827   :  { %2806 = vpow2.f32 %v2060_v2 }
 0x828   :  { %2808 = vpow2.f32 %v2059_v58 }
 0x831   :  { %v2807_v32 = vpop.eup %2806 }
 0x832   :  { %v2809_v1 = vpop.eup %2808  ;;  %v1498_v19 = vadd.f32 1.0, %v2807_v32 }
 0x833   :  { %v1489_v33 = vadd.f32 1.0, %v2809_v1 }
 0x834   :  { %2810 = vrcp.f32 %v1498_v19 }
 0x835   :  { %2812 = vrcp.f32 %v1489_v33 }
 0x836   :  { %2814 = vtanh.f32 %v1503_v42 }
 0x837   :  { %2816 = vpow2.f32 %v2061_v47 }
 0x839   :  { %v1693_v31 = vpop.xlane.xlu0 %1692 }
 0x83d   :  { %v1701_v42 = vpop.xlane.xlu0 %1700 }
 0x83e   :  { %v2811_v56 = vpop.eup %2810 }
 0x83f   :  { %v2813_v59 = vpop.eup %2812  ;;  %v1514_v60 = vmul.f32 %v2811_v56, %v1293_v20 }
 0x840   :  { %v2815_v6 = vpop.eup %2814 }
 0x841   :  { %v1515_v7 = vmul.f32 %v2815_v6, %v2813_v59  ;;  %v2817_v22 = vpop.eup %2816 }
 0x842   :  { %v1511_v29 = vadd.f32 1.0, %v2817_v22 }
 0x843   :  { %v3616_v25 = vadd.f32 %v1515_v7, %v1514_v60 }
 0x845   :  { %2818 = vtanh.f32 %v3616_v25 }
 0x846   :  { %2820 = vrcp.f32 %v1511_v29 }
 0x84f   :  { %v2819_v36 = vpop.eup %2818 }
 0x850   :  { %v2821_v37 = vpop.eup %2820 }
 0x851   :  { %v3622_v8 = vmul.f32 %v2821_v37, %v2819_v36 }
 0x853   :  { %v1706_v21 = vmul.f32 %v3622_v8, %v3493_v24  ;;  %v1715_v50 = vmul.f32 %v3622_v8, %v3490_v23  ;;  %v1724_v59 = vmul.f32 %v3622_v8, %v3509_v11  ;;  %v1728_v60 = vmul.f32 %v3622_v8, %v3512_v12 }
 0x855   :  { %v1707_v2 = vadd.f32 %v1706_v21, %v1693_v31  ;;  %v1725_v7 = vadd.f32 %v1724_v59, %v1701_v42 }
 0x87d   :  { %v1813_v30 = vpop.f32.mrb[14].mxu0  ;;  %v1884_v39 = vpop.f32.mrb[14].mxu1 }
 0x87e   :  { %v1814_v40 = vadd.f32 %v1813_v30, %v3146_v10  ;;  %v1815_v45 = vpop.f32.mrb[15].mxu0  ;;  %v1886_v3 = vpop.f32.mrb[15].mxu1  ;;  %v1885_v17 = vadd.f32 %v1884_v39, %v3162_v38  ;;  %v1708_v38 = vadd.f32 %v1707_v2, %v3504_v55 }
 0x87f   :  { %v1816_v4 = vadd.f32 %v1815_v45, %v3149_v13  ;;  %v1887_v20 = vadd.f32 %v1886_v3, %v3156_v35  ;;  %v1697_v13 = vpop.xlane.xlu1 %1696  ;;  %v1726_v45 = vadd.f32 %v1725_v7, %v3517_v44 }
 0x880   :  { %v2068_v9 = vmul.f32 -1.442695, %v1814_v40  ;;  %v1716_v58 = vadd.f32 %v1715_v50, %v1697_v13  ;;  %v2065_v14 = vmul.f32 -1.442695, %v1708_v38 }
 0x881   :  { %v2069_v53 = vmul.f32 -1.442695, %v1816_v4  ;;  %v2070_v16 = vmul.f32 -1.442695, %v1887_v20 }
 0x882   :  { %2822 = vpow2.f32 %v2068_v9  ;;  %v1717_v62 = vadd.f32 %v1716_v58, %v3501_v46 }
 0x883   :  { %2824 = vpow2.f32 %v2069_v53  ;;  %v1705_v47 = vpop.xlane.xlu1 %1704 }
 0x884   :  { %2826 = vpow2.f32 %v2070_v16  ;;  %v2066_v15 = vmul.f32 -1.442695, %v1717_v62  ;;  %v1729_v22 = vadd.f32 %v1728_v60, %v1705_v47 }
 0x885   :  { %2828 = vtanh.f32 %v1885_v17 }
 0x886   :  { %v1730_v3 = vadd.f32 %v1729_v22, %v3520_v51 }
 0x888   :  { %v2067_v16 = vmul.f32 -1.442695, %v1730_v3 }
 0x88c   :  { %v2823_v63 = vpop.eup %2822 }
 0x88d   :  { %v2825_v10 = vpop.eup %2824  ;;  %v1892_v61 = vadd.f32 1.0, %v2823_v63 }
 0x88e   :  { %v1898_v35 = vadd.f32 1.0, %v2825_v10  ;;  %v2827_v52 = vpop.eup %2826 }
 0x88f   :  { %2830 = vrcp.f32 %v1892_v61  ;;  %v2829_v32 = vpop.eup %2828  ;;  %v1905_v28 = vadd.f32 1.0, %v2827_v52 }
 0x890   :  { %2832 = vrcp.f32 %v1898_v35 }
 0x891   :  { %2834 = vpow2.f32 %v2065_v14 }
 0x892   :  { %2836 = vpow2.f32 %v2066_v15 }
 0x893   :  { %2838 = vrcp.f32 %v1905_v28 }
 0x899   :  { %v2831_v54 = vpop.eup %2830 }
 0x89a   :  { %v2833_v1 = vpop.eup %2832  ;;  %v1909_v19 = vmul.f32 %v2831_v54, %v2829_v32 }
 0x89b   :  { %v1908_v33 = vmul.f32 %v2833_v1, %v3560_v57  ;;  %v2835_v56 = vpop.eup %2834 }
 0x89c   :  { %v2837_v6 = vpop.eup %2836  ;;  %v1712_v30 = vadd.f32 1.0, %v2835_v56 }
 0x89d   :  { %v1910_v41 = vadd.f32 %v1909_v19, %v1908_v33  ;;  %v2839_v29 = vpop.eup %2838  ;;  %v1721_v57 = vadd.f32 1.0, %v2837_v6 }
 0x89f   :  { %2840 = vtanh.f32 %v1910_v41 }
 0x8a0   :  { %2842 = vrcp.f32 %v1712_v30 }
 0x8a1   :  { %2844 = vrcp.f32 %v1721_v57 }
 0x8a2   :  { %2846 = vtanh.f32 %v1726_v45 }
 0x8a3   :  { %2848 = vpow2.f32 %v2067_v16 }
 0x8a9   :  { %v2841_v39 = vpop.eup %2840 }
 0x8aa   :  { %v1912_v40 = vmul.f32 %v2841_v39, %v2839_v29 }
 0x8ac   :  { %v1913_v4 = vmul.f32 %v1912_v40, %v3175_v27  ;;  %v1917_v9 = vmul.f32 %v1912_v40, %v3172_v26  ;;  %v1921_v36 = vmul.f32 %v1912_v40, %v3178_v43  ;;  %v1925_v37 = vmul.f32 %v1912_v40, %v3181_v48  ;;  %v2843_v26 = vpop.eup %2842 }
 0x8ad   :  { %v2845_v27 = vpop.eup %2844 }
 0x8ae   :  { %v1914_v53 = vsel %vm308_vm1, %v1913_v4, 0.0  ;;  %v1918_v20 = vsel %vm308_vm1, %v1917_v9, 0.0  ;;  %v1922_v17 = vsel %vm308_vm1, %v1921_v36, 0.0  ;;  %v1926_v63 = vsel %vm308_vm1, %v1925_v37, 0.0  ;;  %v2847_v31 = vpop.eup %2846 }
 0x8af   :  { %1915 = vadd.xlane.f32.xlu0 %v1914_v53  ;;  %1919 = vadd.xlane.f32.xlu1 %v1918_v20  ;;  %v1737_v10 = vmul.f32 %v2845_v27, %v3616_v25  ;;  %v1738_v21 = vmul.f32 %v2847_v31, %v2843_v26  ;;  %v2849_v43 = vpop.eup %2848 }
 0x8b0   :  { %v1734_v48 = vadd.f32 1.0, %v2849_v43 }
 0x8b1   :  { %v1739_v13 = vadd.f32 %v1738_v21, %v1737_v10 }
 0x8b3   :  { %1923 = vadd.xlane.f32.xlu0 %v1922_v17  ;;  %1927 = vadd.xlane.f32.xlu1 %v1926_v63  ;;  %2850 = vtanh.f32 %v1739_v13 }
 0x8b4   :  { %2852 = vrcp.f32 %v1734_v48 }
 0x8bd   :  { %v2851_v61 = vpop.eup %2850 }
 0x8be   :  { %v2853_v25 = vpop.eup %2852 }
 0x8bf   :  { %v1741_v50 = vmul.f32 %v2853_v25, %v2851_v61 }
 0x8c1   :  { %v1929_v35 = vmul.f32 %v1741_v50, %v3493_v24  ;;  %v1947_v24 = vmul.f32 %v1741_v50, %v3509_v11 }
 0x8c4   :  { %1970 = vrot.lane.b32.xlu1 %v3574_v34, %s2930_s4  ;;  %v1938_v34 = vmul.f32 %v1741_v50, %v3490_v23 }
 0x8c8   :  { %1974 = vrot.lane.b32.xlu1 %v3588_v5, %s2931_s5 }
 0x8c9   :  { %1966 = vrot.lane.b32.xlu0 %v3541_v49, %s2932_s17 }
 0x8cc   :  { %1982 = vrot.lane.b32.xlu1 %v3622_v8, %s2933_s18  ;;  %v1951_v8 = vmul.f32 %v1741_v50, %v3512_v12 }
 0x8cd   :  { %1978 = vrot.lane.b32.xlu0 %v3602_v0, %s2934_s19 }
 0x8d1   :  { %1986 = vrot.lane.b32.xlu0 %v1741_v50, %s2935_s20 }
 0x93c   :  { %v1916_v2 = vpop.xlane.xlu0 %1915  ;;  %v1920_v5 = vpop.xlane.xlu1 %1919 }
 0x93d   :  { %v1930_v58 = vadd.f32 %v1929_v35, %v1916_v2  ;;  %v1939_v38 = vadd.f32 %v1938_v34, %v1920_v5 }
 0x93f   :  { %v1931_v49 = vadd.f32 %v1930_v58, %v3504_v55  ;;  %v1940_v62 = vadd.f32 %v1939_v38, %v3501_v46 }
 0x940   :  { %v1928_v52 = vpop.xlane.xlu1 %1927  ;;  %v1924_v15 = vpop.xlane.xlu0 %1923 }
 0x941   :  { %v2071_v0 = vmul.f32 -1.442695, %v1931_v49  ;;  %v2072_v14 = vmul.f32 -1.442695, %v1940_v62  ;;  %v1952_v32 = vadd.f32 %v1951_v8, %v1928_v52  ;;  %v1948_v54 = vadd.f32 %v1947_v24, %v1924_v15 }
 0x943   :  { %2854 = vpow2.f32 %v2071_v0  ;;  %v1953_v23 = vadd.f32 %v1952_v32, %v3520_v51  ;;  %v1949_v19 = vadd.f32 %v1948_v54, %v3517_v44 }
 0x944   :  { %2856 = vpow2.f32 %v2072_v14  ;;  %v1971_v7 = vpop.permute.xlu1 %1970  ;;  %v1967_v22 = vpop.permute.xlu0 %1966 }
 0x945   :  { %v2073_v1 = vmul.f32 -1.442695, %v1953_v23  ;;  %v1994_v30 = vsel %vm1993_vm2, %v3524_v18, %v1967_v22 }
 0x946   :  { %v1996_v57 = vsel %vm1995_vm3, %v1994_v30, %v1971_v7 }
 0x947   :  { %2858 = vpow2.f32 %v2073_v1 }
 0x948   :  { %2860 = vtanh.f32 %v1949_v19  ;;  %v1975_v29 = vpop.permute.xlu1 %1974  ;;  %v1979_v39 = vpop.permute.xlu0 %1978 }
 0x949   :  { %v1998_v40 = vsel %vm1997_vm4, %v1996_v57, %v1975_v29 }
 0x94a   :  { %v2000_v3 = vsel %vm1999_vm5, %v1998_v40, %v1979_v39 }
 0x94c   :  { %v1983_v45 = vpop.permute.xlu1 %1982  ;;  %v1987_v4 = vpop.permute.xlu0 %1986 }
 0x94d   :  { %v2855_v55 = vpop.eup %2854  ;;  %v2002_v9 = vsel %vm2001_vm6, %v2000_v3, %v1983_v45 }
 0x94e   :  { %v2857_v28 = vpop.eup %2856  ;;  %v1935_v46 = vadd.f32 1.0, %v2855_v55  ;;  %v2004_v53 = vsel %vm2003_vm7, %v2002_v9, %v1987_v4 }
 0x94f   :  { %v1944_v12 = vadd.f32 1.0, %v2857_v28 }
 0x950   :  { %2862 = vrcp.f32 %v1935_v46 }
 0x951   :  { %2864 = vrcp.f32 %v1944_v12  ;;  %v2859_v33 = vpop.eup %2858 }
 0x952   :  { %v2861_v41 = vpop.eup %2860  ;;  %v1957_v11 = vadd.f32 1.0, %v2859_v33 }
 0x954   :  { %2866 = vrcp.f32 %v1957_v11 }
 0x95a   :  { %v2863_v42 = vpop.eup %2862 }
 0x95b   :  { %v2865_v47 = vpop.eup %2864  ;;  %v1961_v56 = vmul.f32 %v2863_v42, %v2861_v41 }
 0x95c   :  { %v1960_v59 = vmul.f32 %v2865_v47, %v1739_v13 }
 0x95e   :  { %v1962_v51 = vadd.f32 %v1961_v56, %v1960_v59  ;;  %v2867_v60 = vpop.eup %2866 }
 0x960   :  { %2868 = vtanh.f32 %v1962_v51 }
 0x96a   :  { %v2869_v44 = vpop.eup %2868 }
 0x96b   :  { %v1964_v6 = vmul.f32 %v2869_v44, %v2867_v60 }
 0x96d   :  { %1990 = vrot.lane.b32.xlu1 %v1964_v6, %s2936_s21 }
 0x9df   :  { %v1991_v20 = vpop.permute.xlu1 %1990 }
 0x9e0   :  { %v2006_v18 = vsel %vm2005_vm8, %v2004_v53, %v1991_v20 }
 0x9e1   :  { %2008 = vst.msk [vmem:[#allocation5] sm:$0x3] %vm2007_vm9, %v2006_v18 }
 0x9e2   :  { %2903 = shalt.err (!%p2900_p12)
}
 0x9e3   :  { %s2904_s27 = scalar_lea.hbm %s3679_s6, 32 }
 0x9e4   :  { %p2905_p13 = scmp.ne.s32.totalorder %s3679_s6, %s2904_s27  ;;  %p2908_p0 = scmp.lt.u32.totalorder %s2904_s27, %s3679_s6 }
 0x9e6   :  { %p2910_p1 = pnand %p2908_p0, %p2905_p13 }
 0x9e8   :  { %2913 = shalt.err (!%p2910_p1)
}
 0x9e9   :  { %2018 = dma.vmem_to_hbm [thread:$0]  %s2016_s23, 32, %s3679_s6, [#allocation4]  }
 0x9ea   :  { %2916 = dma.done.wait [#allocation4], 32  }
 0x9eb   :  { %2917 = vsyncadd [#allocation4], 4294967264 }
 0x9ec   :  { %2022 = vsyncpa [#allocation3], 1 }
 0x9ed   :  { %2023 = vsyncpa [#allocation4], 1 }

</bundles_post_ra>
